<compile_context>
chip_gen: v7x
topology: tpu7x:2x2x1
jax: 0.10.0
libtpu: 0.0.40
codegen_flags: <defaults>
</compile_context>

<pallas_src>
import jax
import jax.numpy as jnp
from jax.experimental import pallas as pl
from jax.experimental.pallas import tpu as pltpu


# ----------------------------------------------------------------------------
# Fused embedding kernel: one grid step processes a tile of `bt` images.
# ----------------------------------------------------------------------------
def fused_embed_kernel(x_ref, w1_ref, b1_ref, w2_ref, b2_ref, pool_ref,
                       o_ref, h1_ref):
    # x_ref    : (bt, H+2, W*cin)  f32   input, pre-padded in H by the wrapper
    # w1_ref   : (3, W*cin, W*c1)  bf16  banded conv1 weights (one per kh)
    # b1_ref   : (1, W*c1)         f32   conv1 bias tiled over w
    # w2_ref   : (3, W*c1, W*c2)   bf16  banded conv2 weights
    # b2_ref   : (1, W*c2)         f32   conv2 bias tiled over w
    # pool_ref : (W*c2, c2)        f32   GAP selection-sum matrix
    # o_ref    : (bt, 1, c2)       f32   embedding output
    # h1_ref   : (bt, H+2, W*c1)   bf16  VMEM scratch, h1 padded in H
    bt, hp, k1 = x_ref.shape
    H = hp - 2
    n1 = w1_ref.shape[2]                       # W * c1
    n2 = w2_ref.shape[2]                       # W * c2
    c2 = pool_ref.shape[1]
    W = pool_ref.shape[0] // c2

    # ---- conv1 + ReLU: 3 band matmuls (kh sweep), lane-dense operands ------
    x = x_ref[...].astype(jnp.bfloat16)        # (bt, H+2, W*cin)
    acc1 = jnp.zeros((bt * H, n1), jnp.float32)
    for kh in range(3):
        lhs = x[:, kh:kh + H, :].reshape(bt * H, k1)
        acc1 = acc1 + jnp.dot(lhs, w1_ref[kh],
                              preferred_element_type=jnp.float32)
    h1 = jnp.maximum(acc1 + b1_ref[...], 0.0).astype(jnp.bfloat16)

    # h1 never leaves VMEM; zero only the 2 border rows per image (cheap,
    # correct on every grid step / core), then write the interior once.
    h1_ref[:, 0:1, :] = jnp.zeros((bt, 1, n1), jnp.bfloat16)
    h1_ref[:, H + 1:H + 2, :] = jnp.zeros((bt, 1, n1), jnp.bfloat16)
    h1_ref[:, 1:H + 1, :] = h1.reshape(bt, H, n1)

    # ---- conv2 + ReLU -------------------------------------------------------
    acc2 = jnp.zeros((bt * H, n2), jnp.float32)
    for kh in range(3):
        lhs = h1_ref[:, kh:kh + H, :].reshape(bt * H, n1)
        acc2 = acc2 + jnp.dot(lhs, w2_ref[kh],
                              preferred_element_type=jnp.float32)
    h2 = jnp.maximum(acc2 + b2_ref[...], 0.0)  # (bt*H, W*c2) f32

    # ---- AdaptiveAvgPool2d(1) + flatten -------------------------------------
    # W-reduction as an MXU matmul (MXU is ~idle), H-reduction as a small
    # sublane sum; scale by 1/(H*W).
    s_w = jnp.dot(h2, pool_ref[...], preferred_element_type=jnp.float32)
    gap = jnp.sum(s_w.reshape(bt, H, c2), axis=1) * (1.0 / (H * W))
    o_ref[...] = gap.reshape(bt, 1, c2).astype(o_ref.dtype)


# ----------------------------------------------------------------------------
# Wrappers.
# ----------------------------------------------------------------------------
def _batch_tile(b_total):
    # Cap at 8 images/step so the fused working set (bf16 band weights ~3.3 MB
    # resident + activations/temporaries) stays well inside every generation's
    # scoped VMEM; prefer 2 grid steps when possible so the "parallel" batch
    # axis can feed both v7x TensorCores (near-neutral on v5e/v6e).
    if b_total <= 1:
        return 1
    return min(8, -(-b_total // 2))


def _band_weights(w_hwio, W):
    """(3, 3, cin, cout) HWIO conv weights -> (3, W*cin, W*cout) band matrices.

    band[kh][w_in*cin + ci, w_out*cout + co] = w[kh, w_in - w_out + 1, ci, co]
    (zero outside the 3-wide band), so `row @ band[kh]` performs the kw sweep
    of a 3x3 SAME conv along one spatial row laid out as (w, cin) lanes; the
    truncated off-diagonals realize the horizontal zero padding exactly.
    """
    _, _, cin, cout = w_hwio.shape
    bands = []
    for kh in range(3):
        acc = jnp.zeros((W * cin, W * cout), w_hwio.dtype)
        for kw in range(3):
            sel = jnp.eye(W, W, k=1 - kw, dtype=w_hwio.dtype)   # [w_in, w_out]
            acc = acc + jnp.kron(sel, w_hwio[kh, kw])
        bands.append(acc)
    return jnp.stack(bands, axis=0)


def embedding_net_forward(x_nchw, params):
    """EmbeddingNet forward: (B, C, H, W) NCHW -> (B, 64) embedding."""
    x = jnp.transpose(x_nchw, (0, 2, 3, 1)).astype(jnp.float32)   # NCHW -> NHWC
    b, H, W, cin = x.shape
    c1 = params["w1"].shape[-1]
    c2 = params["w2"].shape[-1]

    bt = _batch_tile(b)
    pad_b = (-b) % bt
    # SAME padding in H done once here (tiny); W padding is folded into the
    # band matrices.  Flatten (W, cin) onto the lane axis -> lane-dense rows.
    x = jnp.pad(x, ((0, pad_b), (1, 1), (0, 0), (0, 0)))
    bp = b + pad_b
    x = x.reshape(bp, H + 2, W * cin)
    grid = bp // bt

    # Weight/bias/pool operands precomputed in XLA (cheap, done per call).
    w1 = _band_weights(params["w1"], W).astype(jnp.bfloat16)   # (3, W*cin, W*c1)
    w2 = _band_weights(params["w2"], W).astype(jnp.bfloat16)   # (3, W*c1, W*c2)
    b1 = jnp.tile(params["b1"].reshape(1, c1).astype(jnp.float32), (1, W))
    b2 = jnp.tile(params["b2"].reshape(1, c2).astype(jnp.float32), (1, W))
    pool = jnp.tile(jnp.eye(c2, dtype=jnp.float32), (W, 1))    # (W*c2, c2)

    out = pl.pallas_call(
        fused_embed_kernel,
        out_shape=jax.ShapeDtypeStruct((bp, 1, c2), jnp.float32),
        grid=(grid,),
        in_specs=[
            pl.BlockSpec((bt, H + 2, W * cin), lambda i: (i, 0, 0)),
            pl.BlockSpec((3, W * cin, W * c1), lambda i: (0, 0, 0)),  # resident
            pl.BlockSpec((1, W * c1), lambda i: (0, 0)),
            pl.BlockSpec((3, W * c1, W * c2), lambda i: (0, 0, 0)),   # resident
            pl.BlockSpec((1, W * c2), lambda i: (0, 0)),
            pl.BlockSpec((W * c2, c2), lambda i: (0, 0)),
        ],
        out_specs=pl.BlockSpec((bt, 1, c2), lambda i: (i, 0, 0)),
        scratch_shapes=[
            pltpu.VMEM((bt, H + 2, W * c1), jnp.bfloat16),   # padded h1
        ],
        compiler_params=pltpu.CompilerParams(
            dimension_semantics=("parallel",),
            vmem_limit_bytes=32 * 1024 * 1024,
        ),
    )(x, w1, b1, w2, b2, pool)
    return out[:b, 0, :]


@jax.jit
def triplet_net_forward(x1, x2, x3, params):
    """TripletNet.forward: the three branches share the embedding net, so fold
    them into one batched kernel launch (exact; the net is per-sample)."""
    b = x1.shape[0]
    x = jnp.concatenate([x1, x2, x3], axis=0)
    emb = embedding_net_forward(x, params)
    return emb[:b], emb[b:2 * b], emb[2 * b:]


get_embedding = jax.jit(embedding_net_forward)   # TripletNet.get_embedding


def init_params(key, c_in=4, c1=32, c2=64):
    k1, k2, k3, k4 = jax.random.split(key, 4)
    s1 = (2.0 / (3 * 3 * c_in)) ** 0.5
    s2 = (2.0 / (3 * 3 * c1)) ** 0.5
    return {
        "w1": jax.random.normal(k1, (3, 3, c_in, c1), jnp.float32) * s1,
        "b1": jax.random.normal(k2, (1, c1), jnp.float32) * 0.01,
        "w2": jax.random.normal(k3, (3, 3, c1, c2), jnp.float32) * s2,
        "b2": jax.random.normal(k4, (1, c2), jnp.float32) * 0.01,
    }


# Pure-JAX f32 reference (correctness sanity check).
def _ref_forward(x_nchw, params):
    x = jnp.transpose(x_nchw, (0, 2, 3, 1)).astype(jnp.float32)

    def conv(x, w, b):
        y = jax.lax.conv_general_dilated(
            x, w, window_strides=(1, 1), padding="SAME",
            dimension_numbers=("NHWC", "HWIO", "NHWC"),
            preferred_element_type=jnp.float32,
        )
        return jnp.maximum(y + b, 0.0)

    h = conv(conv(x, params["w1"], params["b1"]), params["w2"], params["b2"])
    return jnp.mean(h, axis=(1, 2))


if __name__ == "__main__":
    key = jax.random.PRNGKey(0)
    k1, k2, k3, kp = jax.random.split(key, 4)

    B, C, H, W = 2, 4, 16, 16
    x1 = jax.random.normal(k1, (B, C, H, W), jnp.float32)   # NCHW inputs
    x2 = jax.random.normal(k2, (B, C, H, W), jnp.float32)
    x3 = jax.random.normal(k3, (B, C, H, W), jnp.float32)
    params = init_params(kp, c_in=C)

    o1, o2, o3 = jax.block_until_ready(triplet_net_forward(x1, x2, x3, params))

    # bf16-MXU kernel vs f32 reference: modest tolerance.
    for out, x in ((o1, x1), (o2, x2), (o3, x3)):
        assert out.shape == (B, 64), out.shape
        ref = _ref_forward(x, params)
        assert jnp.allclose(out, ref, rtol=2e-2, atol=2e-2), "mismatch vs reference"

    print("KERNEL_OK")
</pallas_src>

<mosaic_0001>
module attributes {stable_mosaic.version = 11 : i64} {
  func.func @fused_embed_kernel(%arg0: i32, %arg1: memref<3x18x64xf32, #tpu.memory_space<vmem>>, %arg2: memref<3x64x512xbf16, #tpu.memory_space<vmem>>, %arg3: memref<1x512xf32, #tpu.memory_space<vmem>>, %arg4: memref<3x512x1024xbf16, #tpu.memory_space<vmem>>, %arg5: memref<1x1024xf32, #tpu.memory_space<vmem>>, %arg6: memref<1024x64xf32, #tpu.memory_space<vmem>>, %arg7: memref<3x1x64xf32, #tpu.memory_space<vmem>>, %arg8: memref<3x18x512xbf16, #tpu.memory_space<vmem>>) attributes {dimension_semantics = [#tpu.dimension_semantics<parallel>], iteration_bounds = array<i64: 2>, scalar_prefetch = 0 : i64, scratch_operands = 1 : i64, tpu.core_type = #tpu.core_type<tc>, window_params = [{transform_indices = @transform_0, window_bounds = array<i64: 3, 18, 64>}, {pipeline_mode = #tpu.pipeline_mode<synchronous>, transform_indices = @transform_1, window_bounds = array<i64: 3, 64, 512>}, {pipeline_mode = #tpu.pipeline_mode<synchronous>, transform_indices = @transform_2, window_bounds = array<i64: 1, 512>}, {pipeline_mode = #tpu.pipeline_mode<synchronous>, transform_indices = @transform_3, window_bounds = array<i64: 3, 512, 1024>}, {pipeline_mode = #tpu.pipeline_mode<synchronous>, transform_indices = @transform_4, window_bounds = array<i64: 1, 1024>}, {pipeline_mode = #tpu.pipeline_mode<synchronous>, transform_indices = @transform_5, window_bounds = array<i64: 1024, 64>}, {transform_indices = @transform_6, window_bounds = array<i64: 3, 1, 64>}]} {
    %c0 = arith.constant 0 : index
    %c0_0 = arith.constant 0 : index
    %c0_1 = arith.constant 0 : index
    %0 = vector.load %arg1[%c0, %c0_0, %c0_1] : memref<3x18x64xf32, #tpu.memory_space<vmem>>, vector<3x18x64xf32>
    %1 = arith.truncf %0 : vector<3x18x64xf32> to vector<3x18x64xbf16>
    %cst = arith.constant 0.000000e+00 : f32
    %2 = vector.broadcast %cst : f32 to vector<48x512xf32>
    %3 = vector.extract_strided_slice %1 {offsets = [0, 0, 0], sizes = [3, 16, 64], strides = [1, 1, 1]} : vector<3x18x64xbf16> to vector<3x16x64xbf16>
    %4 = vector.shape_cast %3 : vector<3x16x64xbf16> to vector<48x64xbf16>
    %c0_2 = arith.constant 0 : index
    %c0_3 = arith.constant 0 : index
    %c0_4 = arith.constant 0 : index
    %5 = vector.load %arg2[%c0_2, %c0_3, %c0_4] : memref<3x64x512xbf16, #tpu.memory_space<vmem>>, vector<1x64x512xbf16>
    %6 = vector.shape_cast %5 : vector<1x64x512xbf16> to vector<64x512xbf16>
    %cst_5 = arith.constant dense<0.000000e+00> : vector<48x512xf32>
    %7 = tpu.matmul %4, %6, %cst_5 {dimension_numbers = #tpu.dot_dimension_numbers<[1], [0], [0], [1], [0, 0, 1, 1], [], []>} : vector<48x64xbf16>, vector<64x512xbf16>, vector<48x512xf32> -> vector<48x512xf32>
    %8 = arith.addf %2, %7 : vector<48x512xf32>
    %9 = vector.extract_strided_slice %1 {offsets = [0, 1, 0], sizes = [3, 16, 64], strides = [1, 1, 1]} : vector<3x18x64xbf16> to vector<3x16x64xbf16>
    %10 = vector.shape_cast %9 : vector<3x16x64xbf16> to vector<48x64xbf16>
    %c1 = arith.constant 1 : index
    %c0_6 = arith.constant 0 : index
    %c0_7 = arith.constant 0 : index
    %11 = vector.load %arg2[%c1, %c0_6, %c0_7] : memref<3x64x512xbf16, #tpu.memory_space<vmem>>, vector<1x64x512xbf16>
    %12 = vector.shape_cast %11 : vector<1x64x512xbf16> to vector<64x512xbf16>
    %cst_8 = arith.constant dense<0.000000e+00> : vector<48x512xf32>
    %13 = tpu.matmul %10, %12, %cst_8 {dimension_numbers = #tpu.dot_dimension_numbers<[1], [0], [0], [1], [0, 0, 1, 1], [], []>} : vector<48x64xbf16>, vector<64x512xbf16>, vector<48x512xf32> -> vector<48x512xf32>
    %14 = arith.addf %8, %13 : vector<48x512xf32>
    %15 = vector.extract_strided_slice %1 {offsets = [0, 2, 0], sizes = [3, 16, 64], strides = [1, 1, 1]} : vector<3x18x64xbf16> to vector<3x16x64xbf16>
    %16 = vector.shape_cast %15 : vector<3x16x64xbf16> to vector<48x64xbf16>
    %c2 = arith.constant 2 : index
    %c0_9 = arith.constant 0 : index
    %c0_10 = arith.constant 0 : index
    %17 = vector.load %arg2[%c2, %c0_9, %c0_10] : memref<3x64x512xbf16, #tpu.memory_space<vmem>>, vector<1x64x512xbf16>
    %18 = vector.shape_cast %17 : vector<1x64x512xbf16> to vector<64x512xbf16>
    %cst_11 = arith.constant dense<0.000000e+00> : vector<48x512xf32>
    %19 = tpu.matmul %16, %18, %cst_11 {dimension_numbers = #tpu.dot_dimension_numbers<[1], [0], [0], [1], [0, 0, 1, 1], [], []>} : vector<48x64xbf16>, vector<64x512xbf16>, vector<48x512xf32> -> vector<48x512xf32>
    %20 = arith.addf %14, %19 : vector<48x512xf32>
    %c0_12 = arith.constant 0 : index
    %c0_13 = arith.constant 0 : index
    %21 = vector.load %arg3[%c0_12, %c0_13] : memref<1x512xf32, #tpu.memory_space<vmem>>, vector<1x512xf32>
    %22 = vector.broadcast %21 : vector<1x512xf32> to vector<48x512xf32>
    %23 = arith.addf %20, %22 : vector<48x512xf32>
    %cst_14 = arith.constant 0.000000e+00 : f32
    %24 = vector.broadcast %cst_14 : f32 to vector<48x512xf32>
    %25 = arith.maximumf %23, %24 : vector<48x512xf32>
    %26 = arith.truncf %25 : vector<48x512xf32> to vector<48x512xbf16>
    %cst_15 = arith.constant 0.000000e+00 : bf16
    %27 = vector.broadcast %cst_15 : bf16 to vector<3x1x512xbf16>
    %c0_16 = arith.constant 0 : index
    %c0_17 = arith.constant 0 : index
    %c0_18 = arith.constant 0 : index
    %28 = vector.load %arg8[%c0_16, %c0_17, %c0_18] : memref<3x18x512xbf16, #tpu.memory_space<vmem>>, vector<3x1x512xbf16>
    tpu.vector_store %arg8[%c0_16, %c0_17, %c0_18], %27 {strides = array<i32>} : memref<3x18x512xbf16, #tpu.memory_space<vmem>>, vector<3x1x512xbf16>,
    %cst_19 = arith.constant 0.000000e+00 : bf16
    %29 = vector.broadcast %cst_19 : bf16 to vector<3x1x512xbf16>
    %c0_20 = arith.constant 0 : index
    %c17 = arith.constant 17 : index
    %c0_21 = arith.constant 0 : index
    %30 = vector.load %arg8[%c0_20, %c17, %c0_21] : memref<3x18x512xbf16, #tpu.memory_space<vmem>>, vector<3x1x512xbf16>
    tpu.vector_store %arg8[%c0_20, %c17, %c0_21], %29 {strides = array<i32>} : memref<3x18x512xbf16, #tpu.memory_space<vmem>>, vector<3x1x512xbf16>,
    %31 = vector.shape_cast %26 : vector<48x512xbf16> to vector<3x16x512xbf16>
    %c0_22 = arith.constant 0 : index
    %c1_23 = arith.constant 1 : index
    %c0_24 = arith.constant 0 : index
    %32 = vector.load %arg8[%c0_22, %c1_23, %c0_24] : memref<3x18x512xbf16, #tpu.memory_space<vmem>>, vector<3x16x512xbf16>
    tpu.vector_store %arg8[%c0_22, %c1_23, %c0_24], %31 {strides = array<i32>} : memref<3x18x512xbf16, #tpu.memory_space<vmem>>, vector<3x16x512xbf16>,
    %cst_25 = arith.constant 0.000000e+00 : f32
    %33 = vector.broadcast %cst_25 : f32 to vector<48x1024xf32>
    %c0_26 = arith.constant 0 : index
    %c0_27 = arith.constant 0 : index
    %c0_28 = arith.constant 0 : index
    %34 = vector.load %arg8[%c0_26, %c0_27, %c0_28] : memref<3x18x512xbf16, #tpu.memory_space<vmem>>, vector<3x16x512xbf16>
    %35 = vector.shape_cast %34 : vector<3x16x512xbf16> to vector<48x512xbf16>
    %c0_29 = arith.constant 0 : index
    %c0_30 = arith.constant 0 : index
    %c0_31 = arith.constant 0 : index
    %36 = vector.load %arg4[%c0_29, %c0_30, %c0_31] : memref<3x512x1024xbf16, #tpu.memory_space<vmem>>, vector<1x512x1024xbf16>
    %37 = vector.shape_cast %36 : vector<1x512x1024xbf16> to vector<512x1024xbf16>
    %cst_32 = arith.constant dense<0.000000e+00> : vector<48x1024xf32>
    %38 = tpu.matmul %35, %37, %cst_32 {dimension_numbers = #tpu.dot_dimension_numbers<[1], [0], [0], [1], [0, 0, 1, 1], [], []>} : vector<48x512xbf16>, vector<512x1024xbf16>, vector<48x1024xf32> -> vector<48x1024xf32>
    %39 = arith.addf %33, %38 : vector<48x1024xf32>
    %c0_33 = arith.constant 0 : index
    %c1_34 = arith.constant 1 : index
    %c0_35 = arith.constant 0 : index
    %40 = vector.load %arg8[%c0_33, %c1_34, %c0_35] : memref<3x18x512xbf16, #tpu.memory_space<vmem>>, vector<3x16x512xbf16>
    %41 = vector.shape_cast %40 : vector<3x16x512xbf16> to vector<48x512xbf16>
    %c1_36 = arith.constant 1 : index
    %c0_37 = arith.constant 0 : index
    %c0_38 = arith.constant 0 : index
    %42 = vector.load %arg4[%c1_36, %c0_37, %c0_38] : memref<3x512x1024xbf16, #tpu.memory_space<vmem>>, vector<1x512x1024xbf16>
    %43 = vector.shape_cast %42 : vector<1x512x1024xbf16> to vector<512x1024xbf16>
    %cst_39 = arith.constant dense<0.000000e+00> : vector<48x1024xf32>
    %44 = tpu.matmul %41, %43, %cst_39 {dimension_numbers = #tpu.dot_dimension_numbers<[1], [0], [0], [1], [0, 0, 1, 1], [], []>} : vector<48x512xbf16>, vector<512x1024xbf16>, vector<48x1024xf32> -> vector<48x1024xf32>
    %45 = arith.addf %39, %44 : vector<48x1024xf32>
    %c0_40 = arith.constant 0 : index
    %c2_41 = arith.constant 2 : index
    %c0_42 = arith.constant 0 : index
    %46 = vector.load %arg8[%c0_40, %c2_41, %c0_42] : memref<3x18x512xbf16, #tpu.memory_space<vmem>>, vector<3x16x512xbf16>
    %47 = vector.shape_cast %46 : vector<3x16x512xbf16> to vector<48x512xbf16>
    %c2_43 = arith.constant 2 : index
    %c0_44 = arith.constant 0 : index
    %c0_45 = arith.constant 0 : index
    %48 = vector.load %arg4[%c2_43, %c0_44, %c0_45] : memref<3x512x1024xbf16, #tpu.memory_space<vmem>>, vector<1x512x1024xbf16>
    %49 = vector.shape_cast %48 : vector<1x512x1024xbf16> to vector<512x1024xbf16>
    %cst_46 = arith.constant dense<0.000000e+00> : vector<48x1024xf32>
    %50 = tpu.matmul %47, %49, %cst_46 {dimension_numbers = #tpu.dot_dimension_numbers<[1], [0], [0], [1], [0, 0, 1, 1], [], []>} : vector<48x512xbf16>, vector<512x1024xbf16>, vector<48x1024xf32> -> vector<48x1024xf32>
    %51 = arith.addf %45, %50 : vector<48x1024xf32>
    %c0_47 = arith.constant 0 : index
    %c0_48 = arith.constant 0 : index
    %52 = vector.load %arg5[%c0_47, %c0_48] : memref<1x1024xf32, #tpu.memory_space<vmem>>, vector<1x1024xf32>
    %53 = vector.broadcast %52 : vector<1x1024xf32> to vector<48x1024xf32>
    %54 = arith.addf %51, %53 : vector<48x1024xf32>
    %cst_49 = arith.constant 0.000000e+00 : f32
    %55 = vector.broadcast %cst_49 : f32 to vector<48x1024xf32>
    %56 = arith.maximumf %54, %55 : vector<48x1024xf32>
    %c0_50 = arith.constant 0 : index
    %c0_51 = arith.constant 0 : index
    %57 = vector.load %arg6[%c0_50, %c0_51] : memref<1024x64xf32, #tpu.memory_space<vmem>>, vector<1024x64xf32>
    %cst_52 = arith.constant dense<0.000000e+00> : vector<48x64xf32>
    %58 = tpu.matmul %56, %57, %cst_52 {dimension_numbers = #tpu.dot_dimension_numbers<[1], [0], [0], [1], [0, 0, 1, 1], [], []>} : vector<48x1024xf32>, vector<1024x64xf32>, vector<48x64xf32> -> vector<48x64xf32>
    %59 = vector.shape_cast %58 : vector<48x64xf32> to vector<3x16x64xf32>
    %cst_53 = arith.constant dense<0.000000e+00> : vector<3x64xf32>
    %60 = vector.multi_reduction <add>, %59, %cst_53 [1] : vector<3x16x64xf32> to vector<3x64xf32>
    %cst_54 = arith.constant 3.906250e-03 : f32
    %61 = vector.broadcast %cst_54 : f32 to vector<3x64xf32>
    %62 = arith.mulf %60, %61 : vector<3x64xf32>
    %63 = vector.shape_cast %62 : vector<3x64xf32> to vector<3x1x64xf32>
    %c0_55 = arith.constant 0 : index
    %c0_56 = arith.constant 0 : index
    %c0_57 = arith.constant 0 : index
    %64 = vector.load %arg7[%c0_55, %c0_56, %c0_57] : memref<3x1x64xf32, #tpu.memory_space<vmem>>, vector<3x1x64xf32>
    tpu.vector_store %arg7[%c0_55, %c0_56, %c0_57], %63 {strides = array<i32>} : memref<3x1x64xf32, #tpu.memory_space<vmem>>, vector<3x1x64xf32>,
    return
  }
  func.func @transform_0(%arg0: i32) -> (i32, i32, i32) {
    %c0_i32 = arith.constant 0 : i32
    %c0_i32_0 = arith.constant 0 : i32
    %c0_i32_1 = arith.constant 0 : i32
    return %arg0, %c0_i32, %c0_i32_0 : i32, i32, i32
  }
  func.func @transform_1(%arg0: i32) -> (i32, i32, i32) {
    %c0_i32 = arith.constant 0 : i32
    %c0_i32_0 = arith.constant 0 : i32
    %c0_i32_1 = arith.constant 0 : i32
    %c0_i32_2 = arith.constant 0 : i32
    return %c0_i32, %c0_i32_0, %c0_i32_1 : i32, i32, i32
  }
  func.func @transform_2(%arg0: i32) -> (i32, i32) {
    %c0_i32 = arith.constant 0 : i32
    %c0_i32_0 = arith.constant 0 : i32
    %c0_i32_1 = arith.constant 0 : i32
    return %c0_i32, %c0_i32_0 : i32, i32
  }
  func.func @transform_3(%arg0: i32) -> (i32, i32, i32) {
    %c0_i32 = arith.constant 0 : i32
    %c0_i32_0 = arith.constant 0 : i32
    %c0_i32_1 = arith.constant 0 : i32
    %c0_i32_2 = arith.constant 0 : i32
    return %c0_i32, %c0_i32_0, %c0_i32_1 : i32, i32, i32
  }
  func.func @transform_4(%arg0: i32) -> (i32, i32) {
    %c0_i32 = arith.constant 0 : i32
    %c0_i32_0 = arith.constant 0 : i32
    %c0_i32_1 = arith.constant 0 : i32
    return %c0_i32, %c0_i32_0 : i32, i32
  }
  func.func @transform_5(%arg0: i32) -> (i32, i32) {
    %c0_i32 = arith.constant 0 : i32
    %c0_i32_0 = arith.constant 0 : i32
    %c0_i32_1 = arith.constant 0 : i32
    return %c0_i32, %c0_i32_0 : i32, i32
  }
  func.func @transform_6(%arg0: i32) -> (i32, i32, i32) {
    %c0_i32 = arith.constant 0 : i32
    %c0_i32_0 = arith.constant 0 : i32
    %c0_i32_1 = arith.constant 0 : i32
    return %arg0, %c0_i32, %c0_i32_0 : i32, i32, i32
  }
}

</mosaic_0001>

<bundles_post_ra>
// kernel: triplet_net_forward.1
= control target key start
LH: loop header
LB: loop body
LE: loop exit
PB: predicated region body
PF: predicated region fallthrough
CT: control target
= control target key end

     0   :  { %s10875_s21 = smov 0   ;;  %s14609_s0 = inlined_call_operand.vmem [shape: f32[6,18,64], index: 0, kind: input, shape index: {}]   ;;  %s14610_s1 = inlined_call_operand.vmem [shape: bf16[3,64,512], index: 1, kind: input, shape index: {}]   ;;  %s14611_s2 = inlined_call_operand.vmem [shape: f32[1,512], index: 2, kind: input, shape index: {}]   ;;  %s14612_s3 = inlined_call_operand.vmem [shape: bf16[3,512,1024], index: 3, kind: input, shape index: {}]   ;;  %s14613_s4 = inlined_call_operand.vmem [shape: f32[1,1024], index: 4, kind: input, shape index: {}]   ;;  %s14614_s5 = inlined_call_operand.vmem [shape: f32[1024,64], index: 5, kind: input, shape index: {}]   ;;  %s14615_s6 = inlined_call_operand.vmem [shape: f32[6,1,64], index: 6, kind: output, shape index: {}]  }
   0x1 LB: > { %s8673_s22 = sadd.s32 4294967295, %s10837_s21   ;;  %p8677_p0 = scmp.ge.s32.totalorder %s10837_s21, 1  ;;  %s10837_s21 = sphi %s10875_s21, %s16_s21  }
   0x2   : > { %p214_p1 = scmp.lt.s32.totalorder %s10837_s21, 3 }
   0x4   : > { %p215_p2 = pnand %p8677_p0, %p214_p1 }
   0x5   : > { %v10751_v0 = vld [vmem:[%s14610_s1 + $0x84] ss:$16 sps:$4 sm:$0xff] (!%p215_p2)   ;;  %s244_s25 = smul.u32 (!%p215_p2), 3, %s8673_s22  ;;  %v10753_v1 = vld [vmem:[%s14610_s1 + $0x80] ss:$16 sps:$4 sm:$0xff] (!%p215_p2)   ;;  %v10839_v2 = vmov (!%p215_p2), 0  }
   0x6   : > { %218 = sbr.rel (%p215_p2) target bundleno = 1527 (0x5f7), region = 44  ;;  %464 = vmatprep.mubr.bf16.mxu0 (!%p215_p2), %v10839_v2  ;;  %527 = vmatprep.mubr.bf16.mxu1 (!%p215_p2), %v10839_v2  ;;  %v10754_v3 = vld [vmem:[%s14610_s1 + $0xa4] ss:$16 sps:$4 sm:$0xff] (!%p215_p2)   ;;  %v10756_v4 = vld [vmem:[%s14610_s1 + $0xa0] ss:$16 sps:$4 sm:$0xff] (!%p215_p2)   ;;  %vm422_vm1 = vcmask (!%p215_p2), 523264  }
   0x7   : > { %432 = vmatprep.subr.bf16.mxu0 (!%p215_p2), %v10751_v0  ;;  %p245_p3 = scmp.lt.s32.totalorder (!%p215_p2), %s244_s25, 5  ;;  %v10757_v5 = vld [vmem:[%s14610_s1 + $0xc4] ss:$16 sps:$4 sm:$0xff] (!%p215_p2)   ;;  %v10759_v6 = vld [vmem:[%s14610_s1 + $0x8c] ss:$16 sps:$4 sm:$0xff] (!%p215_p2)   ;;  %vm776_vm2 = vcmask (!%p215_p2), 1046528  }
   0x8   : > { %433 = vmatpush1.bf16.msra.mxu0 (!%p215_p2), %v10753_v1  ;;  %v10762_v7 = vld [vmem:[%s14610_s1 + $0x88] ss:$16 sps:$4 sm:$0xff] (!%p215_p2)   ;;  %495 = vmatprep.subr.bf16.mxu1 (!%p215_p2), %v10759_v6  ;;  %v10761_v8 = vld [vmem:[%s14610_s1 + $0xc0] ss:$16 sps:$4 sm:$0xff] (!%p215_p2)   ;;  %v10763_v9 = vld [vmem:[%s14610_s1 + $0xe4] ss:$16 sps:$4 sm:$0xff] (!%p215_p2)  }
   0x9   : > { %434 = vmatprep.subr.bf16.mxu0 (!%p215_p2), %v10754_v3  ;;  %496 = vmatpush1.bf16.msra.mxu1 (!%p215_p2), %v10762_v7  ;;  %v10765_v10 = vld [vmem:[%s14610_s1 + $0xac] ss:$16 sps:$4 sm:$0xff] (!%p215_p2)   ;;  %v10768_v11 = vld [vmem:[%s14610_s1 + $0xa8] ss:$16 sps:$4 sm:$0xff] (!%p215_p2)   ;;  %v10767_v16 = vld [vmem:[%s14610_s1 + $0xe0] ss:$16 sps:$4 sm:$0xff] (!%p215_p2)  }
   0xa   : > { %v10769_v12 = vld [vmem:[%s14610_s1 + $0xcc] ss:$16 sps:$4 sm:$0xff] (!%p215_p2)   ;;  %497 = vmatprep.subr.bf16.mxu1 (!%p215_p2), %v10765_v10  ;;  %v10773_v19 = vld [vmem:[%s14610_s1 + $0x4] ss:$16 sps:$4 sm:$0xff] (!%p215_p2)   ;;  %v10774_v20 = vld [vmem:[%s14610_s1 + $0xc8] ss:$16 sps:$4 sm:$0xff] (!%p215_p2)  }
   0xb   : > { %v10775_v24 = vld [vmem:[%s14610_s1 + $0xec] ss:$16 sps:$4 sm:$0xff] (!%p215_p2)   ;;  %v10777_v27 = vld [vmem:[%s14610_s1 + $0xe8] ss:$16 sps:$4 sm:$0xff] (!%p215_p2)   ;;  %vm288_vm0 = vsmask.f32 (!%p215_p2), 7424 }
   0xc   : > { %435 = vmatpush1.bf16.msra.mxu0 (!%p215_p2), %v10756_v4  ;;  %v10771_v32 = vld [vmem:[%s14610_s1] ss:$16 sps:$4 sm:$0xff] (!%p215_p2)   ;;  %v10780_v35 = vld [vmem:[%s14610_s1 + $0x24] ss:$16 sps:$4 sm:$0xff] (!%p215_p2)   ;;  %v10784_v44 = vld [vmem:[%s14610_s1 + $0x8] ss:$16 sps:$4 sm:$0xff] (!%p215_p2)  }
   0xd   : > { %s14644_s25 = smov (!%p245_p3, %s244_s25), 5  ;;  %436 = vmatprep.subr.bf16.mxu0 %v10757_v5  ;;  %498 = vmatpush1.bf16.msra.mxu1 %v10768_v11  ;;  %v10786_v45 = vld [vmem:[%s14610_s1 + $0xc] ss:$16 sps:$4 sm:$0xff]   ;;  %v10778_v46 = vld [vmem:[%s14610_s1 + $0x20] ss:$16 sps:$4 sm:$0xff]   ;;  %vm1124_vm3 = vcmask 1040384  }
   0xe   : > { %s10741_s16 = smul.u32 24, %s14644_s25  ;;  %499 = vmatprep.subr.bf16.mxu1 %v10769_v12  ;;  %v10783_v50 = vld [vmem:[%s14610_s1 + $0x44] ss:$16 sps:$4 sm:$0xff]   ;;  %v10781_v53 = vld [vmem:[%s14610_s1 + $0x40] ss:$16 sps:$4 sm:$0xff]   ;;  %vm1127_vm5 = vcmask 1044484   ;;  %s254_s30 = scalar_lea.vmem %s14615_s6, %s14644_s25 }
   0xf   : > { %v10792_v54 = vld [vmem:[%s14610_s1 + $0x2c] ss:$16 sps:$4 sm:$0xff]   ;;  %v10790_v55 = vld [vmem:[%s14610_s1 + $0x28] ss:$16 sps:$4 sm:$0xff]   ;;  %v10789_v60 = vld [vmem:[%s14610_s1 + $0x64] ss:$16 sps:$4 sm:$0xff]  }
  0x10   : > { %s10924_s27 = scalar_lea.vmem %s14609_s0, %s10741_s16  ;;  %437 = vmatpush1.bf16.msra.mxu0 %v10761_v8  ;;  %v10795_v61 = vld [vmem:[%s14610_s1 + $0x4c] ss:$16 sps:$4 sm:$0xff]   ;;  %v10787_v62 = vld [vmem:[%s14610_s1 + $0x60] ss:$16 sps:$4 sm:$0xff]   ;;  %v10793_v63 = vld [vmem:[%s14610_s1 + $0x48] ss:$16 sps:$4 sm:$0xff]  }
  0x11   : > { %v257_v13 = vld [vmem:[%s10924_s27] sm:$0xff]  ;;  %v258_v14 = vld [vmem:[%s10924_s27 + $0x8] sm:$0xff]  ;;  %v259_v15 = vld [vmem:[%s10924_s27 + $0x10] sm:$0x3]  ;;  %438 = vmatprep.subr.bf16.mxu0 %v10763_v9  ;;  %500 = vmatpush1.bf16.msra.mxu1 %v10774_v20  ;;  %vm1125_vm4 = vsmask.f32 256 }
  0x12   : > { %v10935_v17 = vpack.c.bf16 %v258_v14, %v257_v13  ;;  %v10937_v18 = vpack.c.bf16 %v259_v15, %v259_v15  ;;  %v260_v28 = vld [vmem:[%s10924_s27 + $0x18] sm:$0xff]  ;;  %v261_v29 = vld [vmem:[%s10924_s27 + $0x20] sm:$0xff]  ;;  %v262_v30 = vld [vmem:[%s10924_s27 + $0x28] sm:$0x3]  ;;  %501 = vmatprep.subr.bf16.mxu1 %v10775_v24  ;;  %vm1128_vm6 = vsmask.f32 4352 }
  0x13   : > { %v10960_v33 = vpack.c.bf16 %v261_v29, %v260_v28  ;;  %v10962_v34 = vpack.c.bf16 %v262_v30, %v262_v30  ;;  %v263_v36 = vld [vmem:[%s10924_s27 + $0x30] sm:$0xff]  ;;  %v264_v37 = vld [vmem:[%s10924_s27 + $0x38] sm:$0xff]  ;;  %v265_v42 = vld [vmem:[%s10924_s27 + $0x40] sm:$0x3]  ;;  %vm1149_vm9 = vsmask.f32 7938 }
  0x14   : > { %v290_v21 = vshrl.u32 %v10935_v17, 16  ;;  %v292_v22 = vshll.u32 %v10935_v17, 16  ;;  %v297_v23 = vshll.u32 %v10937_v18, 16  ;;  %439 = vmatpush1.bf16.msra.mxu0 %v10767_v16  ;;  %v10975_v43 = vpack.c.bf16 %v264_v37, %v263_v36  ;;  %v10801_v3 = vld [vmem:[%s14610_s1 + $0x6c] ss:$16 sps:$4 sm:$0xff]   ;;  %v8789_v20 = vld [vmem:[%s14612_s3 + $0x800] sm:$0xff]  ;;  %vm1126_vm7 = vmand %vm1124_vm3, %vm1125_vm4 }
  0x15   : > { %644 = vmatprep.subr.bf16.mxu0 %v10773_v19  ;;  %v302_v39 = vshrl.u32 %v10960_v33, 16  ;;  %v304_v40 = vshll.u32 %v10960_v33, 16  ;;  %v309_v41 = vshll.u32 %v10962_v34, 16  ;;  %502 = vmatpush1.bf16.msra.mxu1 %v10777_v27  ;;  %v10987_v49 = vpack.c.bf16 %v265_v42, %v265_v42  ;;  %v10798_v4 = vld [vmem:[%s14610_s1 + $0x104] ss:$16 sps:$4 sm:$0xff]   ;;  %v8794_v27 = vld [vmem:[%s14612_s3 + $0x828] sm:$0xff]  ;;  %vm1129_vm8 = vmand %vm1127_vm5, %vm1128_vm6 }
  0x16   : > { %v294_v25 = vrot.slane %v292_v22, 1  ;;  %v299_v26 = vrot.slane %v297_v23, 1  ;;  %v316_v51 = vshll.u32 %v10975_v43, 16  ;;  %707 = vmatprep.subr.bf16.mxu1 %v10786_v45  ;;  %v314_v57 = vshrl.u32 %v10975_v43, 16  ;;  %v10799_v5 = vld [vmem:[%s14610_s1 + $0x68] ss:$16 sps:$4 sm:$0xff]   ;;  %vm11242_vm11 = vmor %vm1129_vm8, %vm1126_vm7 }
  0x17   : > { %v306_v47 = vrot.slane %v304_v40, 1  ;;  %v311_v48 = vrot.slane %v309_v41, 1  ;;  %v321_v59 = vshll.u32 %v10987_v49, 16  ;;  %v10810_v7 = vld [vmem:[%s14610_s1 + $0x10c] ss:$16 sps:$4 sm:$0xff]   ;;  %v778_v30 = vrot.slane %v10937_v18, 1  ;;  %vm1150_vm12 = vmand %vm1124_vm3, %vm1149_vm9 }
  0x18   : > { %v295_v31 = vor.u32 %v294_v25, %v290_v21  ;;  %v318_v58 = vrot.slane %v316_v51, 1  ;;  %v10796_v8 = vld [vmem:[%s14610_s1 + $0x100] ss:$16 sps:$4 sm:$0xff]   ;;  %v10804_v9 = vld [vmem:[%s14610_s1 + $0x124] ss:$16 sps:$4 sm:$0xff]   ;;  %v780_v42 = vrot.slane %v10960_v33, 1 }
  0x19   : > { %v307_v52 = vor.u32 %v306_v47, %v302_v39  ;;  %v323_v1 = vrot.slane %v321_v59, 1  ;;  %v10808_v10 = vld [vmem:[%s14610_s1 + $0x108] ss:$16 sps:$4 sm:$0xff]   ;;  %v10802_v11 = vld [vmem:[%s14610_s1 + $0x120] ss:$16 sps:$4 sm:$0xff]   ;;  %vm1342_vm15 = vcmask 1043456  }
  0x1a   : > { %v300_v38 = vsel %vm288_vm0, %v295_v31, %v299_v26  ;;  %v319_v0 = vor.u32 %v318_v58, %v314_v57  ;;  %v10816_v12 = vld [vmem:[%s14610_s1 + $0x12c] ss:$16 sps:$4 sm:$0xff]   ;;  %v10807_v13 = vld [vmem:[%s14610_s1 + $0x144] ss:$16 sps:$4 sm:$0xff]   ;;  %v10814_v14 = vld [vmem:[%s14610_s1 + $0x128] ss:$16 sps:$4 sm:$0xff]  }
  0x1b   : > { %8711 = vmatmul.mubr.msk.bf16.vlgmr.msra.gmra.mrb[0].mxu0 %vm422_vm1, %v300_v38  ;;  %8714 = vmatmul.mubr.msk.bf16.vlgmr.msra.gmra.mrb[0].mxu1 %vm422_vm1, %v300_v38  ;;  %v312_v56 = vsel %vm288_vm0, %v307_v52, %v311_v48  ;;  %v10805_v15 = vld [vmem:[%s14610_s1 + $0x140] ss:$16 sps:$4 sm:$0xff]   ;;  %v10813_v16 = vld [vmem:[%s14610_s1 + $0x164] ss:$16 sps:$4 sm:$0xff]   ;;  %v10819_v19 = vld [vmem:[%s14610_s1 + $0x14c] ss:$16 sps:$4 sm:$0xff]  }
  0x1c   : > { %645 = vmatpush1.bf16.msra.mxu0 %v10771_v32  ;;  %474 = vmatprep.mubr.bf16.mxu0 %v10839_v2  ;;  %v324_v6 = vsel %vm288_vm0, %v319_v0, %v323_v1  ;;  %v8793_v21 = vld [vmem:[%s14612_s3 + $0x820] sm:$0xff]  ;;  %v10817_v22 = vld [vmem:[%s14610_s1 + $0x148] ss:$16 sps:$4 sm:$0xff]   ;;  %v10822_v24 = vld [vmem:[%s14610_s1 + $0x16c] ss:$16 sps:$4 sm:$0xff]   ;;  %v777_v31 = vrot.slane %v10935_v17, 1 }
  0x1d   : > { %646 = vmatprep.subr.bf16.mxu0 %v10780_v35  ;;  %537 = vmatprep.mubr.bf16.mxu1 %v10839_v2  ;;  %v10811_v23 = vld [vmem:[%s14610_s1 + $0x160] ss:$16 sps:$4 sm:$0xff]   ;;  %v9058_v25 = vcombine.high %v8789_v20, %v8793_v21  ;;  %v8790_v26 = vld [vmem:[%s14612_s3 + $0x808] sm:$0xff]  ;;  %v9057_v36 = vcombine.low %v8789_v20, %v8793_v21  ;;  %vm1151_vm10 = vsmask.f32 7954  ;;  %vm1344_vm0 = vcmask 1047556  }
  0x1e   : > { %708 = vmatpush1.bf16.msra.mxu1 %v10784_v44  ;;  %v10820_v28 = vld [vmem:[%s14610_s1 + $0x168] ss:$16 sps:$4 sm:$0xff]   ;;  %v9060_v29 = vcombine.high %v8790_v26, %v8794_v27  ;;  %v8797_v32 = vld [vmem:[%s14612_s3 + $0x840] sm:$0xff]  ;;  %v779_v18 = vsel %vm776_vm2, %v777_v31, %v778_v30  ;;  %v9059_v41 = vcombine.low %v8790_v26, %v8794_v27  ;;  %v781_v44 = vrot.slane %v10962_v34, 1  ;;  %vm1152_vm13 = vmand %vm1127_vm5, %vm1151_vm10 }
  0x1f   : > { %709 = vmatprep.subr.bf16.mxu1 %v10792_v54  ;;  %v8801_v35 = vld [vmem:[%s14612_s3 + $0x860] sm:$0xff]  ;;  %v8802_v38 = vld [vmem:[%s14612_s3 + $0x868] sm:$0xff]  ;;  %vm11258_vm14 = vmor %vm1152_vm13, %vm1150_vm12  ;;  %vm1220_vm6 = vsmask.f32 4368  ;;  %vm1664_vm8 = vsmask.f32 7440 }
  0x20   : > { %647 = vmatpush1.bf16.msra.mxu0 %v10778_v46  ;;  %v9066_v37 = vcombine.high %v8797_v32, %v8801_v35  ;;  %v8805_v39 = vld [vmem:[%s14612_s3 + $0x880] sm:$0xff]  ;;  %v9065_v45 = vcombine.low %v8797_v32, %v8801_v35  ;;  %v8806_v48 = vld [vmem:[%s14612_s3 + $0x888] sm:$0xff]  ;;  %v782_v52 = vsel %vm776_vm2, %v780_v42, %v781_v44  ;;  %vm1345_vm3 = vmand %vm1344_vm0, %vm1151_vm10  ;;  %vm5761_vm10 = vcmask 1042432  }
  0x21   : > { %648 = vmatprep.subr.bf16.mxu0 %v10783_v50  ;;  %v8809_v40 = vld [vmem:[%s14612_s3 + $0x8a0] sm:$0xff]  ;;  %v8810_v50 = vld [vmem:[%s14612_s3 + $0x8a8] sm:$0xff]  ;;  %vm11504_vm7 = vmor %vm1125_vm4, %vm1220_vm6  ;;  %vm1663_vm4 = vsmask.f32 3328  ;;  %vm8619_vm13 = vcmask 516096  }
  0x22   : > { %710 = vmatpush1.bf16.msra.mxu1 %v10790_v55  ;;  %v9074_v47 = vcombine.high %v8805_v39, %v8809_v40  ;;  %v8813_v34 = vld [vmem:[%s14612_s3 + $0x8c0] sm:$0xff]  ;;  %v9073_v54 = vcombine.low %v8805_v39, %v8809_v40  ;;  %v8814_v55 = vld [vmem:[%s14612_s3 + $0x8c8] sm:$0xff]  ;;  %v9075_v58 = vcombine.low %v8806_v48, %v8810_v50 }
  0x23   : > { %8712 = vmatmul.mubr.msk.bf16.gmra.mrb[4].mxu0 %vm422_vm1, %v312_v56  ;;  %711 = vmatprep.subr.bf16.mxu1 %v10795_v61  ;;  %v8817_v51 = vld [vmem:[%s14612_s3 + $0x8e0] sm:$0xff]  ;;  %v783_v61 = vrot.slane %v10975_v43, 1  ;;  %v8822_v1 = vld [vmem:[%s14612_s3 + $0x908] sm:$0xff] }
  0x24   : > { %649 = vmatpush1.bf16.msra.mxu0 %v10781_v53  ;;  %484 = vmatprep.mubr.bf16.mxu0 %v10839_v2  ;;  %v9076_v53 = vcombine.high %v8806_v48, %v8810_v50  ;;  %v9082_v57 = vcombine.high %v8813_v34, %v8817_v51  ;;  %v8821_v59 = vld [vmem:[%s14612_s3 + $0x900] sm:$0xff]  ;;  %v9081_v0 = vcombine.low %v8813_v34, %v8817_v51  ;;  %v8846_v27 = vld [vmem:[%s14612_s3 + $0x9c8] sm:$0xff] }
  0x25   : > { %650 = vmatprep.subr.bf16.mxu0 %v10789_v60  ;;  %8715 = vmatmul.mubr.msk.bf16.gmra.mrb[4].mxu1 %vm422_vm1, %v312_v56  ;;  %v8818_v56 = vld [vmem:[%s14612_s3 + $0x8e8] sm:$0xff]  ;;  %v8825_v60 = vld [vmem:[%s14612_s3 + $0x920] sm:$0xff] }
  0x26   : > { %547 = vmatprep.mubr.bf16.mxu1 %v10839_v2  ;;  %712 = vmatpush1.bf16.msra.mxu1 %v10793_v63  ;;  %v9084_v63 = vcombine.high %v8814_v55, %v8818_v56  ;;  %v8849_v26 = vld [vmem:[%s14612_s3 + $0x9e0] sm:$0xff]  ;;  %v8862_v44 = vld [vmem:[%s14612_s3 + $0xa48] sm:$0xff] }
  0x27   : > { %713 = vmatprep.subr.bf16.mxu1 %v10801_v3  ;;  %v8826_v3 = vld [vmem:[%s14612_s3 + $0x928] sm:$0xff]  ;;  %v8853_v35 = vld [vmem:[%s14612_s3 + $0xa00] sm:$0xff] }
  0x28   : > { %651 = vmatpush1.bf16.msra.mxu0 %v10787_v62  ;;  %v784_v62 = vrot.slane %v10987_v49, 1  ;;  %v8829_v49 = vld [vmem:[%s14612_s3 + $0x940] sm:$0xff] }
  0x29   : > { %892 = vmatprep.subr.bf16.mxu0 %v10798_v4  ;;  %v9090_v4 = vcombine.high %v8821_v59, %v8825_v60  ;;  %v8865_v42 = vld [vmem:[%s14612_s3 + $0xa60] sm:$0xff] }
  0x2a   : > { %714 = vmatpush1.bf16.msra.mxu1 %v10799_v5  ;;  %v8833_v5 = vld [vmem:[%s14612_s3 + $0x960] sm:$0xff] }
  0x2b   : > { %8713 = vmatmul.mubr.msk.bf16.gmra.mrb[8].mxu0 %vm422_vm1, %v324_v6  ;;  %955 = vmatprep.subr.bf16.mxu1 %v10810_v7  ;;  %v9092_v7 = vcombine.high %v8822_v1, %v8826_v3  ;;  %v1131_v48 = vld [vmem:[#allocation2] sm:$0x11] }
  0x2c   : > { %676 = vmatprep.mubr.bf16.mxu0 %v10839_v2  ;;  %v1132_v51 = vsel %vm11242_vm11, 0, %v1131_v48 }
  0x2d   : > { %8716 = vmatmul.mubr.msk.bf16.gmra.mrb[8].mxu1 %vm422_vm1, %v324_v6  ;;  %v785_v6 = vsel %vm776_vm2, %v783_v61, %v784_v62  ;;  %1133 = vst [vmem:[#allocation2] sm:$0x11] %v1132_v51  ;;  %vm1343_vm2 = vmand %vm1342_vm15, %vm1149_vm9  ;;  %v8909_v51 = vld [vmem:[%s14612_s3 + $0xbc0] sm:$0xff] }
  0x2e   : > { %739 = vmatprep.mubr.bf16.mxu1 %v10839_v2  ;;  %vm11287_vm5 = vmor %vm1345_vm3, %vm1343_vm2 }
  0x2f   : > { %vm11594_vm9 = vmor %vm1663_vm4, %vm1664_vm8 }
  0x33   : > { %8733 = vmatmul.mubr.msk.bf16.vlgmr.msra.gmra.mrb[0].mxu0 %vm422_vm1, %v10935_v17 }
  0x34   : > { %893 = vmatpush1.bf16.msra.mxu0 %v10796_v8  ;;  %686 = vmatprep.mubr.bf16.mxu0 %v10839_v2  ;;  %v9089_v8 = vcombine.low %v8821_v59, %v8825_v60  ;;  %v1134_v60 = vld [vmem:[#allocation2 + $0x8] sm:$0x11] }
  0x35   : > { %894 = vmatprep.subr.bf16.mxu0 %v10804_v9  ;;  %8736 = vmatmul.mubr.msk.bf16.vlgmr.msra.gmra.mrb[0].mxu1 %vm422_vm1, %v10935_v17  ;;  %v8798_v17 = vld [vmem:[%s14612_s3 + $0x848] sm:$0xff] }
  0x36   : > { %749 = vmatprep.mubr.bf16.mxu1 %v10839_v2  ;;  %956 = vmatpush1.bf16.msra.mxu1 %v10808_v10  ;;  %v9068_v46 = vcombine.high %v8798_v17, %v8802_v38  ;;  %v8834_v9 = vld [vmem:[%s14612_s3 + $0x968] sm:$0xff]  ;;  %v9098_v10 = vcombine.high %v8829_v49, %v8833_v5 }
  0x37   : > { %957 = vmatprep.subr.bf16.mxu1 %v10816_v12  ;;  %v8837_v12 = vld [vmem:[%s14612_s3 + $0x980] sm:$0xff] }
  0x38   : > { %895 = vmatpush1.bf16.msra.mxu0 %v10802_v11  ;;  %v9091_v11 = vcombine.low %v8822_v1, %v8826_v3  ;;  %v1157_v1 = vld [vmem:[#allocation2 + $0x28] sm:$0x11] }
  0x39   : > { %896 = vmatprep.subr.bf16.mxu0 %v10807_v13  ;;  %v8841_v13 = vld [vmem:[%s14612_s3 + $0x9a0] sm:$0xff]  ;;  %v1158_v3 = vsel %vm11258_vm14, 0, %v1157_v1 }
  0x3a   : > { %958 = vmatpush1.bf16.msra.mxu1 %v10814_v14  ;;  %v9106_v20 = vcombine.high %v8837_v12, %v8841_v13  ;;  %1159 = vst [vmem:[#allocation2 + $0x28] sm:$0x11] %v1158_v3  ;;  %v11378_v3 = vld [vmem:[%s14612_s3 + $0xc28] sm:$0xff] }
  0x3b   : > { %8734 = vmatmul.mubr.msk.bf16.gmra.mrb[4].mxu0 %vm422_vm1, %v10960_v33  ;;  %959 = vmatprep.subr.bf16.mxu1 %v10819_v19  ;;  %v8842_v19 = vld [vmem:[%s14612_s3 + $0x9a8] sm:$0xff] }
  0x3c   : > { %897 = vmatpush1.bf16.msra.mxu0 %v10805_v15  ;;  %696 = vmatprep.mubr.bf16.mxu0 %v10839_v2  ;;  %v9097_v15 = vcombine.low %v8829_v49, %v8833_v5  ;;  %v8881_v5 = vld [vmem:[%s14612_s3 + $0xae0] sm:$0xff] }
  0x3d   : > { %898 = vmatprep.subr.bf16.mxu0 %v10813_v16  ;;  %8737 = vmatmul.mubr.msk.bf16.gmra.mrb[4].mxu1 %vm422_vm1, %v10960_v33  ;;  %v9067_v33 = vcombine.low %v8798_v17, %v8802_v38  ;;  %v8838_v16 = vld [vmem:[%s14612_s3 + $0x988] sm:$0xff] }
  0x3e   : > { %759 = vmatprep.mubr.bf16.mxu1 %v10839_v2  ;;  %960 = vmatpush1.bf16.msra.mxu1 %v10817_v22  ;;  %v9108_v22 = vcombine.high %v8838_v16, %v8842_v19  ;;  %v8858_v17 = vld [vmem:[%s14612_s3 + $0xa28] sm:$0xff] }
  0x3f   : > { %961 = vmatprep.subr.bf16.mxu1 %v10822_v24  ;;  %v9107_v24 = vcombine.low %v8838_v16, %v8842_v19  ;;  %v8889_v16 = vld [vmem:[%s14612_s3 + $0xb20] sm:$0xff] }
  0x40   : > { %899 = vmatpush1.bf16.msra.mxu0 %v10811_v23  ;;  %v9105_v23 = vcombine.low %v8837_v12, %v8841_v13 }
  0x41   : > { %3395 = vmatprep.subr.bf16.mxu0 %v9058_v25  ;;  %v8845_v25 = vld [vmem:[%s14612_s3 + $0x9c0] sm:$0xff] }
  0x42   : > { %962 = vmatpush1.bf16.msra.mxu1 %v10820_v28  ;;  %v9114_v28 = vcombine.high %v8845_v25, %v8849_v26  ;;  %v9113_v30 = vcombine.low %v8845_v25, %v8849_v26  ;;  %v8890_v25 = vld [vmem:[%s14612_s3 + $0xb28] sm:$0xff]  ;;  %v1163_v26 = vld [vmem:[#allocation2 + $0x58] sm:$0x11] }
  0x43   : > { %8735 = vmatmul.mubr.msk.bf16.gmra.mrb[8].mxu0 %vm422_vm1, %v10975_v43  ;;  %3521 = vmatprep.subr.bf16.mxu1 %v9060_v29  ;;  %v8850_v29 = vld [vmem:[%s14612_s3 + $0x9e8] sm:$0xff] }
  0x44   : > { %924 = vmatprep.mubr.bf16.mxu0 %v10839_v2  ;;  %v9115_v31 = vcombine.low %v8846_v27, %v8850_v29  ;;  %v9116_v32 = vcombine.high %v8846_v27, %v8850_v29  ;;  %v1164_v29 = vsel %vm11258_vm14, 0, %v1163_v26 }
  0x45   : > { %8738 = vmatmul.mubr.msk.bf16.gmra.mrb[8].mxu1 %vm422_vm1, %v10975_v43  ;;  %v9083_v43 = vcombine.low %v8814_v55, %v8818_v56  ;;  %1165 = vst [vmem:[#allocation2 + $0x58] sm:$0x11] %v1164_v29 }
  0x46   : > { %987 = vmatprep.mubr.bf16.mxu1 %v10839_v2 }
  0x4b   : > { %8771 = vmatmul.mubr.msk.bf16.vlgmr.msra.gmra.mrb[0].mxu0 %vm422_vm1, %v779_v18 }
  0x4c   : > { %934 = vmatprep.mubr.bf16.mxu0 %v10839_v2  ;;  %3396 = vmatpush1.bf16.msra.mxu0 %v9057_v36  ;;  %v8854_v36 = vld [vmem:[%s14612_s3 + $0xa08] sm:$0xff] }
  0x4d   : > { %3397 = vmatprep.subr.bf16.mxu0 %v9066_v37  ;;  %8774 = vmatmul.mubr.msk.bf16.vlgmr.msra.gmra.mrb[0].mxu1 %vm422_vm1, %v779_v18  ;;  %v8857_v18 = vld [vmem:[%s14612_s3 + $0xa20] sm:$0xff]  ;;  %v9123_v39 = vcombine.low %v8854_v36, %v8858_v17  ;;  %v9124_v40 = vcombine.high %v8854_v36, %v8858_v17 }
  0x4e   : > { %997 = vmatprep.mubr.bf16.mxu1 %v10839_v2  ;;  %3522 = vmatpush1.bf16.msra.mxu1 %v9059_v41  ;;  %v9122_v37 = vcombine.high %v8853_v35, %v8857_v18  ;;  %v9121_v38 = vcombine.low %v8853_v35, %v8857_v18  ;;  %v8861_v41 = vld [vmem:[%s14612_s3 + $0xa40] sm:$0xff]  ;;  %v8898_v18 = vld [vmem:[%s14612_s3 + $0xb68] sm:$0xff] }
  0x4f   : > { %3523 = vmatprep.subr.bf16.mxu1 %v9068_v46  ;;  %v9130_v46 = vcombine.high %v8861_v41, %v8865_v42  ;;  %v1166_v36 = vld [vmem:[#allocation2 + $0x80] sm:$0x11] }
  0x50   : > { %3398 = vmatpush1.bf16.msra.mxu0 %v9065_v45  ;;  %v9129_v45 = vcombine.low %v8861_v41, %v8865_v42  ;;  %v8905_v41 = vld [vmem:[%s14612_s3 + $0xba0] sm:$0xff]  ;;  %v8902_v42 = vld [vmem:[%s14612_s3 + $0xb88] sm:$0xff] }
  0x51   : > { %3399 = vmatprep.subr.bf16.mxu0 %v9074_v47  ;;  %v8866_v47 = vld [vmem:[%s14612_s3 + $0xa68] sm:$0xff] }
  0x52   : > { %3524 = vmatpush1.bf16.msra.mxu1 %v9067_v33  ;;  %v9131_v50 = vcombine.low %v8862_v44, %v8866_v47  ;;  %v9132_v33 = vcombine.high %v8862_v44, %v8866_v47 }
  0x53   : > { %8772 = vmatmul.mubr.msk.bf16.gmra.mrb[4].mxu0 %vm422_vm1, %v782_v52  ;;  %3525 = vmatprep.subr.bf16.mxu1 %v9076_v53  ;;  %v8869_v53 = vld [vmem:[%s14612_s3 + $0xa80] sm:$0xff] }
  0x54   : > { %944 = vmatprep.mubr.bf16.mxu0 %v10839_v2  ;;  %3400 = vmatpush1.bf16.msra.mxu0 %v9073_v54  ;;  %v8873_v54 = vld [vmem:[%s14612_s3 + $0xaa0] sm:$0xff] }
  0x55   : > { %8775 = vmatmul.mubr.msk.bf16.gmra.mrb[4].mxu1 %vm422_vm1, %v782_v52  ;;  %3401 = vmatprep.subr.bf16.mxu0 %v9082_v57  ;;  %v1154_v52 = vld [vmem:[#allocation2 + $0x20] sm:$0x11]  ;;  %v9138_v56 = vcombine.high %v8869_v53, %v8873_v54  ;;  %v8870_v57 = vld [vmem:[%s14612_s3 + $0xa88] sm:$0xff]  ;;  %v9137_v61 = vcombine.low %v8869_v53, %v8873_v54 }
  0x56   : > { %1007 = vmatprep.mubr.bf16.mxu1 %v10839_v2  ;;  %3526 = vmatpush1.bf16.msra.mxu1 %v9075_v58  ;;  %v8830_v2 = vld [vmem:[%s14612_s3 + $0x948] sm:$0xff]  ;;  %v1155_v59 = vsel %vm11258_vm14, 0, %v1154_v52  ;;  %v8913_v54 = vld [vmem:[%s14612_s3 + $0xbe0] sm:$0xff] }
  0x57   : > { %3527 = vmatprep.subr.bf16.mxu1 %v9084_v63  ;;  %v9100_v14 = vcombine.high %v8830_v2, %v8834_v9  ;;  %v9099_v21 = vcombine.low %v8830_v2, %v8834_v9  ;;  %v8874_v58 = vld [vmem:[%s14612_s3 + $0xaa8] sm:$0xff]  ;;  %1156 = vst [vmem:[#allocation2 + $0x20] sm:$0x11] %v1155_v59 }
  0x58   : > { %3402 = vmatpush1.bf16.msra.mxu0 %v9081_v0  ;;  %v9139_v62 = vcombine.low %v8870_v57, %v8874_v58  ;;  %v9140_v63 = vcombine.high %v8870_v57, %v8874_v58  ;;  %v1135_v0 = vsel %vm11242_vm11, 0, %v1134_v60  ;;  %v8882_v9 = vld [vmem:[%s14612_s3 + $0xae8] sm:$0xff]  ;;  %v9177_v57 = vcombine.low %v8909_v51, %v8913_v54 }
  0x59   : > { %3403 = vmatprep.subr.bf16.mxu0 %v9090_v4  ;;  %1136 = vst [vmem:[#allocation2 + $0x8] sm:$0x11] %v1135_v0  ;;  %v1137_v4 = vld [vmem:[#allocation2 + $0x30] sm:$0x11]  ;;  %v9178_v58 = vcombine.high %v8909_v51, %v8913_v54  ;;  %v8914_v59 = vld [vmem:[%s14612_s3 + $0xbe8] sm:$0xff] }
  0x5a   : > { %3528 = vmatpush1.bf16.msra.mxu1 %v9083_v43  ;;  %v8877_v43 = vld [vmem:[%s14612_s3 + $0xac0] sm:$0xff]  ;;  %v1138_v49 = vsel %vm11242_vm11, 0, %v1137_v4 }
  0x5b   : > { %8773 = vmatmul.mubr.msk.bf16.gmra.mrb[8].mxu0 %vm422_vm1, %v785_v6  ;;  %3529 = vmatprep.subr.bf16.mxu1 %v9092_v7  ;;  %1139 = vst [vmem:[#allocation2 + $0x30] sm:$0x11] %v1138_v49  ;;  %v9146_v2 = vcombine.high %v8877_v43, %v8881_v5  ;;  %v1044_v49 = vlaneseq  ;;  %v8985_v7 = vld [vmem:[%s14612_s3 + $0xe20] sm:$0xff] }
  0x5c   : > { %3404 = vmatpush1.bf16.msra.mxu0 %v9089_v8  ;;  %v9145_v8 = vcombine.low %v8877_v43, %v8881_v5 }
  0x5d   : > { %8776 = vmatmul.mubr.msk.bf16.gmra.mrb[8].mxu1 %vm422_vm1, %v785_v6  ;;  %3405 = vmatprep.subr.bf16.mxu0 %v9098_v10  ;;  %v8878_v6 = vld [vmem:[%s14612_s3 + $0xac8] sm:$0xff]  ;;  %v1160_v10 = vld [vmem:[#allocation2 + $0x50] sm:$0x11]  ;;  %v11384_v5 = vshrl.u32 %v1044_v49, 7 }
  0x5e   : > { %3530 = vmatpush1.bf16.msra.mxu1 %v9091_v11  ;;  %v9147_v11 = vcombine.low %v8878_v6, %v8882_v9  ;;  %v9148_v12 = vcombine.high %v8878_v6, %v8882_v9  ;;  %v1161_v13 = vsel %vm11258_vm14, 0, %v1160_v10 }
  0x5f   : > { %3531 = vmatprep.subr.bf16.mxu1 %v9100_v14  ;;  %1162 = vst [vmem:[#allocation2 + $0x50] sm:$0x11] %v1161_v13  ;;  %v1143_v14 = vld [vmem:[#allocation2 + $0x60] sm:$0x11]  ;;  %v14619_v6 = vsub.s32 0, %v11384_v5  ;;  %v14618_v9 = vsub.s32 2, %v11384_v5 }
  0x60   : > { %3406 = vmatpush1.bf16.msra.mxu0 %v9097_v15  ;;  %v8885_v15 = vld [vmem:[%s14612_s3 + $0xb00] sm:$0xff]  ;;  %v1144_v19 = vsel %vm11242_vm11, 0, %v1143_v14 }
  0x61   : > { %3407 = vmatprep.subr.bf16.mxu0 %v9106_v20  ;;  %v1140_v20 = vld [vmem:[#allocation2 + $0x38] sm:$0x11]  ;;  %1145 = vst [vmem:[#allocation2 + $0x60] sm:$0x11] %v1144_v19  ;;  %v11404_v13 = vld [vmem:[%s14612_s3 + $0xc40] sm:$0xff] }
  0x62   : > { %3532 = vmatpush1.bf16.msra.mxu1 %v9099_v21  ;;  %v9154_v21 = vcombine.high %v8885_v15, %v8889_v16  ;;  %v11409_v14 = vld [vmem:[%s14612_s3 + $0xc60] sm:$0xff] }
  0x63   : > { %3533 = vmatprep.subr.bf16.mxu1 %v9108_v22  ;;  %v8886_v22 = vld [vmem:[%s14612_s3 + $0xb08] sm:$0xff]  ;;  %v9194_v29 = vcombine.high %v11404_v13, %v11409_v14 }
  0x64   : > { %3408 = vmatpush1.bf16.msra.mxu0 %v9105_v23  ;;  %v1141_v23 = vsel %vm11242_vm11, 0, %v1140_v20  ;;  %v9155_v27 = vcombine.low %v8886_v22, %v8890_v25 }
  0x65   : > { %3409 = vmatprep.subr.bf16.mxu0 %v9114_v28  ;;  %1142 = vst [vmem:[#allocation2 + $0x38] sm:$0x11] %v1141_v23  ;;  %v9156_v28 = vcombine.high %v8886_v22, %v8890_v25  ;;  %v11433_v22 = vld [vmem:[%s14612_s3 + $0xca0] sm:$0xff] }
  0x66   : > { %3534 = vmatpush1.bf16.msra.mxu1 %v9107_v24  ;;  %v9153_v24 = vcombine.low %v8885_v15, %v8889_v16  ;;  %v11414_v15 = vld [vmem:[%s14612_s3 + $0xc48] sm:$0xff] }
  0x67   : > { %3535 = vmatprep.subr.bf16.mxu1 %v9116_v32  ;;  %v8894_v32 = vld [vmem:[%s14612_s3 + $0xb48] sm:$0xff] }
  0x68   : > { %3410 = vmatpush1.bf16.msra.mxu0 %v9113_v30  ;;  %v8893_v30 = vld [vmem:[%s14612_s3 + $0xb40] sm:$0xff]  ;;  %v9163_v17 = vcombine.low %v8894_v32, %v8898_v18  ;;  %v11419_v16 = vld [vmem:[%s14612_s3 + $0xc68] sm:$0xff] }
  0x69   : > { %3411 = vmatprep.subr.bf16.mxu0 %v9122_v37 }
  0x6a   : > { %3536 = vmatpush1.bf16.msra.mxu1 %v9115_v31  ;;  %v8897_v31 = vld [vmem:[%s14612_s3 + $0xb60] sm:$0xff] }
  0x6b   : > { %3537 = vmatprep.subr.bf16.mxu1 %v9124_v40  ;;  %v9162_v35 = vcombine.high %v8893_v30, %v8897_v31  ;;  %v9161_v37 = vcombine.low %v8893_v30, %v8897_v31  ;;  %v8901_v40 = vld [vmem:[%s14612_s3 + $0xb80] sm:$0xff]  ;;  %v9195_v30 = vcombine.low %v11414_v15, %v11419_v16  ;;  %v11450_v31 = vld [vmem:[%s14612_s3 + $0xc88] sm:$0xff] }
  0x6c   : > { %3412 = vmatpush1.bf16.msra.mxu0 %v9121_v38  ;;  %v9164_v38 = vcombine.high %v8894_v32, %v8898_v18  ;;  %v9170_v44 = vcombine.high %v8901_v40, %v8905_v41  ;;  %v11455_v32 = vld [vmem:[%s14612_s3 + $0xca8] sm:$0xff] }
  0x6d   : > { %3413 = vmatprep.subr.bf16.mxu0 %v9130_v46  ;;  %v9169_v46 = vcombine.low %v8901_v40, %v8905_v41 }
  0x6e   : > { %3538 = vmatpush1.bf16.msra.mxu1 %v9123_v39  ;;  %v1167_v39 = vsel %vm11258_vm14, 0, %v1166_v36 }
  0x6f   : > { %3539 = vmatprep.subr.bf16.mxu1 %v9132_v33  ;;  %1168 = vst [vmem:[#allocation2 + $0x80] sm:$0x11] %v1167_v39  ;;  %v1169_v33 = vld [vmem:[#allocation2 + $0x88] sm:$0x11] }
  0x70   : > { %3414 = vmatpush1.bf16.msra.mxu0 %v9129_v45  ;;  %v8906_v45 = vld [vmem:[%s14612_s3 + $0xba8] sm:$0xff]  ;;  %v1170_v53 = vsel %vm11258_vm14, 0, %v1169_v33 }
  0x71   : > { %3415 = vmatprep.subr.bf16.mxu0 %v9138_v56  ;;  %v9171_v47 = vcombine.low %v8902_v42, %v8906_v45  ;;  %v9172_v48 = vcombine.high %v8902_v42, %v8906_v45  ;;  %v8910_v56 = vld [vmem:[%s14612_s3 + $0xbc8] sm:$0xff]  ;;  %1171 = vst [vmem:[#allocation2 + $0x88] sm:$0x11] %v1170_v53  ;;  %v11469_v45 = vld [vmem:[%s14612_s3 + $0xcc0] sm:$0xff] }
  0x72   : > { %3540 = vmatpush1.bf16.msra.mxu1 %v9131_v50  ;;  %v1146_v50 = vld [vmem:[#allocation2 + $0x68] sm:$0x11]  ;;  %v9179_v60 = vcombine.low %v8910_v56, %v8914_v59  ;;  %v9180_v55 = vcombine.high %v8910_v56, %v8914_v59 }
  0x73   : > { %3541 = vmatprep.subr.bf16.mxu1 %v9140_v63  ;;  %v1147_v52 = vsel %vm11242_vm11, 0, %v1146_v50  ;;  %v11369_v63 = vld [vmem:[%s14612_s3 + $0xc08] sm:$0xff] }
  0x74   : > { %3416 = vmatpush1.bf16.msra.mxu0 %v9137_v61  ;;  %1148 = vst [vmem:[#allocation2 + $0x68] sm:$0x11] %v1147_v52  ;;  %v11359_v61 = vld [vmem:[%s14612_s3 + $0xc00] sm:$0xff]  ;;  %v9187_v4 = vcombine.low %v11369_v63, %v11378_v3  ;;  %v9188_v43 = vcombine.high %v11369_v63, %v11378_v3  ;;  %v11484_v52 = vld [vmem:[%s14612_s3 + $0xcc8] sm:$0xff] }
  0x75   : > { %3417 = vmatprep.subr.bf16.mxu0 %v9146_v2  ;;  %v14617_v2 = vsub.s32 1, %v11384_v5  ;;  %v11489_v53 = vld [vmem:[%s14612_s3 + $0xce8] sm:$0xff] }
  0x76   : > { %3542 = vmatpush1.bf16.msra.mxu1 %v9139_v62  ;;  %v11364_v62 = vld [vmem:[%s14612_s3 + $0xc20] sm:$0xff] }
  0x77   : > { %3543 = vmatprep.subr.bf16.mxu1 %v9148_v12  ;;  %v9185_v0 = vcombine.low %v11359_v61, %v11364_v62  ;;  %v9186_v1 = vcombine.high %v11359_v61, %v11364_v62  ;;  %v9212_v62 = vcombine.high %v11484_v52, %v11489_v53 }
  0x78   : > { %3418 = vmatpush1.bf16.msra.mxu0 %v9145_v8  ;;  %v1042_v8 = vld [vmem:[%s14611_s2] sm:$0xf] }
  0x79   : > { %3419 = vmatprep.subr.bf16.mxu0 %v9154_v21  ;;  %v11394_v10 = vrot.slane %v1042_v8, %v14619_v6  ;;  %v11399_v12 = vrot.slane %v1042_v8, %v14617_v2  ;;  %v11423_v20 = vrot.slane %v1042_v8, %v14618_v9  ;;  %v11428_v21 = vld [vmem:[%s14612_s3 + $0xc80] sm:$0xff] }
  0x7a   : > { %3544 = vmatpush1.bf16.msra.mxu1 %v9147_v11  ;;  %v14616_v11 = vsub.s32 3, %v11384_v5 }
  0x7b   : > { %3545 = vmatprep.subr.bf16.mxu1 %v9156_v28  ;;  %v9193_v28 = vcombine.low %v11404_v13, %v11409_v14 }
  0x7c   : > { %3420 = vmatpush1.bf16.msra.mxu0 %v9153_v24  ;;  %v11438_v25 = vrot.slane %v1042_v8, %v14616_v11 }
  0x7d   : > { %3421 = vmatprep.subr.bf16.mxu0 %v9162_v35 }
  0x7e   : > { %3546 = vmatpush1.bf16.msra.mxu1 %v9155_v27 }
  0x7f   : > { %3547 = vmatprep.subr.bf16.mxu1 %v9164_v38 }
  0x80   : > { %3422 = vmatpush1.bf16.msra.mxu0 %v9161_v37 }
  0x81   : > { %3423 = vmatprep.subr.bf16.mxu0 %v9170_v44 }
  0x82   : > { %3548 = vmatpush1.bf16.msra.mxu1 %v9163_v17  ;;  %v9196_v17 = vcombine.high %v11414_v15, %v11419_v16 }
  0x83   : > { %3549 = vmatprep.subr.bf16.mxu1 %v9172_v48 }
  0x84   : > { %3424 = vmatpush1.bf16.msra.mxu0 %v9169_v46  ;;  %v11474_v46 = vld [vmem:[%s14612_s3 + $0xce0] sm:$0xff] }
  0x85   : > { %3425 = vmatprep.subr.bf16.mxu0 %v9178_v58 }
  0x86   : > { %3550 = vmatpush1.bf16.msra.mxu1 %v9171_v47 }
  0x87   : > { %3551 = vmatprep.subr.bf16.mxu1 %v9180_v55 }
  0x88   : > { %3426 = vmatpush1.bf16.msra.mxu0 %v9177_v57 }
  0x89   : > { %3458 = vmatprep.subr.bf16.mxu0 %v9186_v1 }
  0x8a   : > { %3552 = vmatpush1.bf16.msra.mxu1 %v9179_v60 }
  0x8b   : > { %3584 = vmatprep.subr.bf16.mxu1 %v9188_v43 }
 0x11e   : > { %v926_v19 = vpop.f32.mrb[0].mxu0 }
 0x11f   : > { %v1064_v23 = vadd.f32 %v11394_v10, %v926_v19  ;;  %v928_v24 = vpop.f32.mrb[1].mxu0 }
 0x120   : > { %v1065_v26 = vadd.f32 %v11399_v12, %v928_v24  ;;  %v930_v27 = vpop.f32.mrb[2].mxu0  ;;  %v989_v37 = vpop.f32.mrb[0].mxu1 }
 0x121   : > { %v1088_v35 = vmax.f32 %v1064_v23, 0.0  ;;  %v1068_v18 = vadd.f32 %v11394_v10, %v930_v27  ;;  %v932_v36 = vpop.f32.mrb[3].mxu0  ;;  %v1066_v41 = vadd.f32 %v11423_v20, %v989_v37  ;;  %v991_v42 = vpop.f32.mrb[1].mxu1 }
 0x122   : > { %v1089_v39 = vmax.f32 %v1065_v26, 0.0  ;;  %v1069_v40 = vadd.f32 %v11399_v12, %v932_v36  ;;  %v1067_v48 = vadd.f32 %v11438_v25, %v991_v42  ;;  %v993_v50 = vpop.f32.mrb[2].mxu1 }
 0x123   : > { %v1092_v47 = vmax.f32 %v1068_v18, 0.0  ;;  %v1090_v57 = vmax.f32 %v1066_v41, 0.0  ;;  %v1070_v58 = vadd.f32 %v11423_v20, %v993_v50  ;;  %v995_v59 = vpop.f32.mrb[3].mxu1 }
 0x124   : > { %v10113_v54 = vpack.c.bf16 %v1089_v39, %v1088_v35  ;;  %v1093_v56 = vmax.f32 %v1069_v40, 0.0  ;;  %v1091_v60 = vmax.f32 %v1067_v48, 0.0  ;;  %v1071_v55 = vadd.f32 %v11438_v25, %v995_v59  ;;  %v1347_v48 = vld [vmem:[#allocation2] sm:$0xff] }
 0x125   : > { %v1094_v18 = vmax.f32 %v1070_v58, 0.0 }
 0x126   : > { %v1223_v49 = vshrl.u32 %v10113_v54, 16  ;;  %v1226_v8 = vshll.u32 %v10113_v54, 16  ;;  %v10115_v19 = vpack.c.bf16 %v1093_v56, %v1092_v47  ;;  %v936_v23 = vpop.f32.mrb[4].mxu0  ;;  %v10114_v35 = vpack.c.bf16 %v1091_v60, %v1090_v57 }
 0x127   : > { %v1072_v26 = vadd.f32 %v11394_v10, %v936_v23  ;;  %v938_v27 = vpop.f32.mrb[5].mxu0  ;;  %v1095_v36 = vmax.f32 %v1071_v55, 0.0  ;;  %v1355_v55 = vld [vmem:[#allocation2 + $0x20] sm:$0x11] }
 0x128   : > { %v1225_v37 = vrot.slane %v1223_v49, 7  ;;  %v1238_v39 = vshrl.u32 %v10115_v19, 16  ;;  %v1241_v40 = vshll.u32 %v10115_v19, 16  ;;  %v1073_v41 = vadd.f32 %v11399_v12, %v938_v27  ;;  %v940_v42 = vpop.f32.mrb[6].mxu0  ;;  %v999_v11 = vpop.f32.mrb[4].mxu1 }
 0x129   : > { %v1096_v50 = vmax.f32 %v1072_v26, 0.0  ;;  %v1230_v54 = vshrl.u32 %v10114_v35, 16  ;;  %v1233_v47 = vshll.u32 %v10114_v35, 16  ;;  %v1076_v56 = vadd.f32 %v11394_v10, %v940_v42  ;;  %v942_v59 = vpop.f32.mrb[7].mxu0  ;;  %v1001_v58 = vpop.f32.mrb[5].mxu1  ;;  %v1350_v42 = vld [vmem:[#allocation2 + $0x8] sm:$0xff] }
 0x12a   : > { %v1228_v2 = vor.u32 %v1226_v8, %v1225_v37  ;;  %v1236_v23 = vrot.slane %v1225_v37, 4  ;;  %v1240_v9 = vrot.slane %v1238_v39, 7  ;;  %v1097_v57 = vmax.f32 %v1073_v41, 0.0  ;;  %v1003_v35 = vpop.f32.mrb[6].mxu1 }
 0x12b   : > { %v1232_v49 = vrot.slane %v1230_v54, 7  ;;  %v1100_v19 = vmax.f32 %v1076_v56, 0.0  ;;  %v1077_v26 = vadd.f32 %v11399_v12, %v942_v59  ;;  %v10116_v27 = vpack.c.bf16 %v1095_v36, %v1094_v18  ;;  %v1005_v6 = vpop.f32.mrb[7].mxu1 }
 0x12c   : > { %v11511_v8 = vsel %vm11287_vm5, %v1228_v2, %v1347_v48  ;;  %v1243_v37 = vor.u32 %v1241_v40, %v1240_v9  ;;  %v1254_v39 = vrot.slane %v1240_v9, 4  ;;  %v10117_v41 = vpack.c.bf16 %v1097_v57, %v1096_v50 }
 0x12d   : > { %1349 = vst [vmem:[#allocation2] sm:$0xff] %v11511_v8  ;;  %v1235_v24 = vor.u32 %v1233_v47, %v1232_v49  ;;  %v1245_v1 = vrot.slane %v1232_v49, 4  ;;  %v1101_v43 = vmax.f32 %v1077_v26, 0.0  ;;  %v1247_v54 = vshrl.u32 %v10116_v27, 16 }
 0x12e   : > { %v11516_v56 = vsel %vm11504_vm7, %v1236_v23, %v1243_v37  ;;  %v1356_v18 = vsel %vm11242_vm11, %v1254_v39, %v1355_v55  ;;  %v1257_v2 = vshrl.u32 %v10117_v41, 16  ;;  %v1260_v36 = vshll.u32 %v10117_v41, 16  ;;  %v946_v40 = vpop.f32.mrb[8].mxu0  ;;  %v1358_v23 = vld [vmem:[#allocation2 + $0x28] sm:$0x11]  ;;  %v1361_v39 = vld [vmem:[#allocation2 + $0x30] sm:$0xff] }
 0x12f   : > { %1353 = vst [vmem:[#allocation2 + $0x10] sm:$0xff] %v11516_v56  ;;  %1357 = vst [vmem:[#allocation2 + $0x20] sm:$0x11] %v1356_v18  ;;  %v11523_v9 = vsel %vm11287_vm5, %v1235_v24, %v1350_v42  ;;  %v10119_v48 = vpack.c.bf16 %v1101_v43, %v1100_v19  ;;  %v1249_v50 = vrot.slane %v1247_v54, 7  ;;  %v1250_v47 = vshll.u32 %v10116_v27, 16  ;;  %v948_v59 = vpop.f32.mrb[9].mxu0 }
 0x130   : > { %v1259_v57 = vrot.slane %v1257_v2, 7  ;;  %1352 = vst [vmem:[#allocation2 + $0x8] sm:$0xff] %v11523_v9  ;;  %v1080_v55 = vadd.f32 %v11394_v10, %v946_v40  ;;  %v1074_v49 = vadd.f32 %v11423_v20, %v999_v11  ;;  %v1081_v26 = vadd.f32 %v11399_v12, %v948_v59  ;;  %v950_v37 = vpop.f32.mrb[10].mxu0  ;;  %v1009_v19 = vpop.f32.mrb[8].mxu1 }
 0x131   : > { %v1272_v41 = vshrl.u32 %v10119_v48, 16  ;;  %v1275_v18 = vshll.u32 %v10119_v48, 16  ;;  %v1252_v24 = vor.u32 %v1250_v47, %v1249_v50  ;;  %v1255_v42 = vrot.slane %v1249_v50, 4  ;;  %v952_v43 = vpop.f32.mrb[11].mxu0  ;;  %v1011_v38 = vpop.f32.mrb[9].mxu1 }
 0x132   : > { %v1262_v27 = vor.u32 %v1260_v36, %v1259_v57  ;;  %v1270_v54 = vrot.slane %v1259_v57, 4  ;;  %v1104_v2 = vmax.f32 %v1080_v55, 0.0  ;;  %v1098_v33 = vmax.f32 %v1074_v49, 0.0  ;;  %v1013_v44 = vpop.f32.mrb[10].mxu1  ;;  %v1369_v50 = vld [vmem:[#allocation2 + $0x50] sm:$0x11] }
 0x133   : > { %v1274_v51 = vrot.slane %v1272_v41, 7  ;;  %v11531_v40 = vsel %vm11504_vm7, %v1245_v1, %v1252_v24  ;;  %v1359_v11 = vsel %vm11242_vm11, %v1255_v42, %v1358_v23  ;;  %v1105_v59 = vmax.f32 %v1081_v26, 0.0  ;;  %v1015_v57 = vpop.f32.mrb[11].mxu1 }
 0x134   : > { %v11537_v48 = vsel %vm11287_vm5, %v1262_v27, %v1361_v39  ;;  %1354 = vst [vmem:[#allocation2 + $0x18] sm:$0xff] %v11531_v40  ;;  %1360 = vst [vmem:[#allocation2 + $0x28] sm:$0x11] %v1359_v11  ;;  %v1075_v36 = vadd.f32 %v11438_v25, %v1001_v58  ;;  %v1084_v47 = vadd.f32 %v11394_v10, %v950_v37  ;;  %v1375_v11 = vld [vmem:[#allocation2 + $0x60] sm:$0xff] }
 0x135   : > { %v1078_v1 = vadd.f32 %v11423_v20, %v1003_v35  ;;  %1363 = vst [vmem:[#allocation2 + $0x30] sm:$0xff] %v11537_v48  ;;  %v1277_v23 = vor.u32 %v1275_v18, %v1274_v51  ;;  %v1288_v55 = vrot.slane %v1274_v51, 4  ;;  %v10121_v49 = vpack.c.bf16 %v1105_v59, %v1104_v2 }
 0x136   : > { %v1085_v26 = vadd.f32 %v11399_v12, %v952_v43  ;;  %v1099_v39 = vmax.f32 %v1075_v36, 0.0  ;;  %v1108_v41 = vmax.f32 %v1084_v47, 0.0  ;;  %v1079_v42 = vadd.f32 %v11438_v25, %v1005_v6 }
 0x137   : > { %v1102_v24 = vmax.f32 %v1078_v1, 0.0  ;;  %v11548_v58 = vsel %vm11504_vm7, %v1270_v54, %v1277_v23  ;;  %v1370_v10 = vsel %vm11242_vm11, %v1288_v55, %v1369_v50  ;;  %v1291_v35 = vshrl.u32 %v10121_v49, 16 }
 0x138   : > { %v1294_v37 = vshll.u32 %v10121_v49, 16  ;;  %1367 = vst [vmem:[#allocation2 + $0x40] sm:$0xff] %v11548_v58  ;;  %1371 = vst [vmem:[#allocation2 + $0x50] sm:$0x11] %v1370_v10  ;;  %v10118_v51 = vpack.c.bf16 %v1099_v39, %v1098_v33  ;;  %v1109_v18 = vmax.f32 %v1085_v26, 0.0  ;;  %v1103_v12 = vmax.f32 %v1079_v42, 0.0 }
 0x139   : > { %v1082_v43 = vadd.f32 %v11423_v20, %v1009_v19  ;;  %v1293_v27 = vrot.slane %v1291_v35, 7  ;;  %v1083_v6 = vadd.f32 %v11438_v25, %v1011_v38  ;;  %v1086_v2 = vadd.f32 %v11423_v20, %v1013_v44  ;;  %v1383_v35 = vld [vmem:[#allocation2 + $0x80] sm:$0x11] }
 0x13a   : > { %v1087_v54 = vadd.f32 %v11438_v25, %v1015_v57  ;;  %v1264_v59 = vshrl.u32 %v10118_v51, 16  ;;  %v1267_v50 = vshll.u32 %v10118_v51, 16  ;;  %v10123_v36 = vpack.c.bf16 %v1109_v18, %v1108_v41  ;;  %v1364_v25 = vld [vmem:[#allocation2 + $0x38] sm:$0xff] }
 0x13b   : > { %v10120_v47 = vpack.c.bf16 %v1103_v12, %v1102_v24  ;;  %v1296_v1 = vor.u32 %v1294_v37, %v1293_v27  ;;  %v1304_v23 = vrot.slane %v1293_v27, 4  ;;  %v1106_v55 = vmax.f32 %v1082_v43, 0.0  ;;  %v11650_v3 = vld [vmem:[#allocation2 + $0x28] sm:$0x11] }
 0x13c   : > { %v1107_v33 = vmax.f32 %v1083_v6, 0.0  ;;  %v1266_v49 = vrot.slane %v1264_v59, 7  ;;  %v1306_v26 = vshrl.u32 %v10123_v36, 16  ;;  %v1309_v39 = vshll.u32 %v10123_v36, 16 }
 0x13d   : > { %v1281_v19 = vshrl.u32 %v10120_v47, 16  ;;  %v11559_v20 = vsel %vm11287_vm5, %v1296_v1, %v1375_v11  ;;  %v1284_v38 = vshll.u32 %v10120_v47, 16  ;;  %v1110_v57 = vmax.f32 %v1086_v2, 0.0  ;;  %v1372_v2 = vld [vmem:[#allocation2 + $0x58] sm:$0x11] }
 0x13e   : > { %v10122_v44 = vpack.c.bf16 %v1107_v33, %v1106_v55  ;;  %1377 = vst [vmem:[#allocation2 + $0x60] sm:$0xff] %v11559_v20  ;;  %v1269_v41 = vor.u32 %v1267_v50, %v1266_v49  ;;  %v1279_v24 = vrot.slane %v1266_v49, 4  ;;  %v1308_v42 = vrot.slane %v1306_v26, 7  ;;  %v1378_v33 = vld [vmem:[#allocation2 + $0x68] sm:$0xff]  ;;  %v1657_v49 = vld [vmem:[#allocation2 + $0x20] sm:$0x11] }
 0x13f   : > { %v1283_v10 = vrot.slane %v1281_v19, 7  ;;  %v1111_v18 = vmax.f32 %v1087_v54, 0.0  ;;  %v1667_v12 = vshrl.u32 %v11511_v8, 16  ;;  %v1670_v26 = vshll.u32 %v11511_v8, 16  ;;  %v1386_v8 = vld [vmem:[#allocation2 + $0x88] sm:$0x11] }
 0x140   : > { %v1298_v37 = vshrl.u32 %v10122_v44, 16  ;;  %v1301_v51 = vshll.u32 %v10122_v44, 16  ;;  %v11565_v43 = vsel %vm11287_vm5, %v1269_v41, %v1364_v25  ;;  %v1311_v27 = vor.u32 %v1309_v39, %v1308_v42 }
 0x141   : > { %v1322_v6 = vrot.slane %v1308_v42, 4  ;;  %v1286_v11 = vor.u32 %v1284_v38, %v1283_v10  ;;  %1366 = vst [vmem:[#allocation2 + $0x38] sm:$0xff] %v11565_v43  ;;  %v1289_v59 = vrot.slane %v1283_v10, 4  ;;  %v10124_v36 = vpack.c.bf16 %v1111_v18, %v1110_v57 }
 0x142   : > { %v1300_v50 = vrot.slane %v1298_v37, 7  ;;  %v1669_v47 = vrot.slane %v1667_v12, 4  ;;  %v11570_v1 = vsel %vm11504_vm7, %v1304_v23, %v1311_v27  ;;  %v1672_v44 = vrot.slane %v1670_v26, 5  ;;  %v11589_v12 = vld [vmem:[#allocation2 + $0x50] sm:$0x11] }
 0x143   : > { %v1384_v54 = vsel %vm11242_vm11, %v1322_v6, %v1383_v35  ;;  %v11576_v55 = vsel %vm11504_vm7, %v1279_v24, %v1286_v11  ;;  %v1373_v39 = vsel %vm11242_vm11, %v1289_v59, %v1372_v2  ;;  %v1315_v38 = vshrl.u32 %v10124_v36, 16 }
 0x144   : > { %1385 = vst [vmem:[#allocation2 + $0x80] sm:$0x11] %v1384_v54  ;;  %v1303_v19 = vor.u32 %v1301_v51, %v1300_v50  ;;  %v1313_v25 = vrot.slane %v1300_v50, 4  ;;  %1374 = vst [vmem:[#allocation2 + $0x58] sm:$0x11] %v1373_v39  ;;  %v1318_v23 = vshll.u32 %v10124_v36, 16  ;;  %v1673_v37 = vor.u32 %v1672_v44, %v1669_v47 }
 0x145   : > { %v1676_v57 = vshll.u32 %v11516_v56, 16  ;;  %v1694_v41 = vshrl.u32 %v11516_v56, 16  ;;  %v1317_v42 = vrot.slane %v1315_v38, 7  ;;  %v1700_v10 = vshll.u32 %v1657_v49, 16 }
 0x146   : > { %v11585_v24 = vsel %vm11287_vm5, %v1303_v19, %v1378_v33  ;;  %v1715_v35 = vshrl.u32 %v11537_v48, 16  ;;  %v1718_v27 = vshll.u32 %v11537_v48, 16  ;;  %v1674_v59 = vrot.slane %v1673_v37, 4 }
 0x147   : > { %1380 = vst [vmem:[#allocation2 + $0x68] sm:$0xff] %v11585_v24  ;;  %v1678_v51 = vrot.slane %v1676_v57, 5  ;;  %v1696_v18 = vrot.slane %v1694_v41, 4  ;;  %v1320_v6 = vor.u32 %v1318_v23, %v1317_v42  ;;  %v1323_v56 = vrot.slane %v1317_v42, 4 }
 0x148   : > { %v1702_v11 = vrot.slane %v1700_v10, 5  ;;  %v1717_v2 = vrot.slane %v1715_v35, 4  ;;  %v1720_v36 = vrot.slane %v1718_v27, 5  ;;  %v1724_v47 = vshll.u32 %v11548_v58, 16 }
 0x149   : > { %v1697_v50 = vor.u32 %v1696_v18, %v1678_v51  ;;  %v11601_v54 = vsel %vm11504_vm7, %v1313_v25, %v1320_v6  ;;  %v1387_v48 = vsel %vm11242_vm11, %v1323_v56, %v1386_v8  ;;  %v1742_v33 = vshrl.u32 %v11548_v58, 16 }
 0x14a   : > { %v1748_v49 = vshll.u32 %v11589_v12, 16  ;;  %1388 = vst [vmem:[#allocation2 + $0x88] sm:$0x11] %v1387_v48  ;;  %v1679_v26 = vsel %vm11594_vm9, %v1674_v59, %v1678_v51  ;;  %v1721_v19 = vor.u32 %v1720_v36, %v1717_v2  ;;  %v1726_v38 = vrot.slane %v1724_v47, 5 }
 0x14b   : > { %v1698_v39 = vrot.slane %v1697_v50, 4  ;;  %v1744_v23 = vrot.slane %v1742_v33, 4  ;;  %v1763_v60 = vshrl.u32 %v11559_v20, 16  ;;  %v1766_v25 = vshll.u32 %v11559_v20, 16  ;;  %v11613_v41 = vld [vmem:[#allocation2 + $0x80] sm:$0x11] }
 0x14c   : > { %v1750_v44 = vrot.slane %v1748_v49, 5  ;;  %v1722_v57 = vrot.slane %v1721_v19, 4  ;;  %v1772_v42 = vshll.u32 %v11570_v1, 16  ;;  %v1790_v8 = vshrl.u32 %v11570_v1, 16  ;;  %v11657_v19 = vld [vmem:[%s14612_s3 + $0xd00] sm:$0xff] }
 0x14d   : > { %v1703_v34 = vsel %vm11594_vm9, %v1698_v39, %v1702_v11  ;;  %v1745_v37 = vor.u32 %v1744_v23, %v1726_v38  ;;  %v1765_v51 = vrot.slane %v1763_v60, 4  ;;  %v1768_v27 = vrot.slane %v1766_v25, 5  ;;  %v11670_v25 = vld [vmem:[#allocation2 + $0x58] sm:$0x11] }
 0x14e   : > { %v11617_v10 = vcombine.low %v1679_v26, %v1703_v34  ;;  %v11619_v35 = vcombine.high %v1679_v26, %v1703_v34  ;;  %v1727_v18 = vsel %vm11594_vm9, %v1722_v57, %v1726_v38  ;;  %v1774_v6 = vrot.slane %v1772_v42, 5 }
 0x14f   : > { %v1792_v56 = vrot.slane %v1790_v8, 4  ;;  %v1746_v11 = vrot.slane %v1745_v37, 4  ;;  %v1796_v2 = vshll.u32 %v11613_v41, 16  ;;  %v1681_v59 = vshrl.u32 %v11523_v9, 16 }
 0x150   : > { %3427 = vmatprep.mubr.bf16.mxu0 %v11619_v35  ;;  %3553 = vmatprep.mubr.bf16.mxu1 %v11619_v35  ;;  %v1684_v50 = vshll.u32 %v11523_v9, 16  ;;  %v1769_v36 = vor.u32 %v1768_v27, %v1765_v51  ;;  %v1690_v48 = vshll.u32 %v11531_v40, 16  ;;  %v1704_v33 = vshrl.u32 %v11531_v40, 16 }
 0x151   : > { %3428 = vmatmul.mubr.bf16.vlgmr.msra.gmra.mrb[12].mxu0 %v11617_v10  ;;  %3554 = vmatmul.mubr.bf16.vlgmr.msra.gmra.mrb[12].mxu1 %v11617_v10  ;;  %v1793_v47 = vor.u32 %v1792_v56, %v1774_v6  ;;  %v1751_v9 = vsel %vm11594_vm9, %v1746_v11, %v1750_v44  ;;  %v1798_v49 = vrot.slane %v1796_v2, 5  ;;  %v1683_v26 = vrot.slane %v1681_v59, 4 }
 0x152   : > { %3459 = vmatpush1.bf16.msra.mxu0 %v9185_v0  ;;  %3585 = vmatpush1.bf16.msra.mxu1 %v9187_v4  ;;  %v1686_v39 = vrot.slane %v1684_v50, 5  ;;  %v11646_v61 = vcombine.high %v1727_v18, %v1751_v9  ;;  %v1770_v63 = vrot.slane %v1769_v36, 4  ;;  %v11652_v4 = vcombine.low %v1727_v18, %v1751_v9 }
 0x153   : > { %3460 = vmatprep.subr.bf16.mxu0 %v9194_v29  ;;  %3586 = vmatprep.subr.bf16.mxu1 %v9196_v17  ;;  %v1794_v0 = vrot.slane %v1793_v47, 4  ;;  %v11662_v29 = vld [vmem:[%s14612_s3 + $0xd20] sm:$0xff]  ;;  %v1692_v38 = vrot.slane %v1690_v48, 5  ;;  %v1706_v23 = vrot.slane %v1704_v33, 4  ;;  %v1729_v34 = vshrl.u32 %v11565_v43, 16 }
 0x154   : > { %v1687_v17 = vor.u32 %v1686_v39, %v1683_v26  ;;  %3437 = vmatprep.mubr.bf16.mxu0 %v11646_v61  ;;  %3563 = vmatprep.mubr.bf16.mxu1 %v11646_v61  ;;  %v1775_v44 = vsel %vm11594_vm9, %v1770_v63, %v1774_v6  ;;  %v1732_v57 = vshll.u32 %v11565_v43, 16  ;;  %v1710_v51 = vshll.u32 %v11650_v3, 16  ;;  %v8954_v6 = vld [vmem:[%s14612_s3 + $0xd28] sm:$0xff] }
 0x155   : > { %v1799_v60 = vsel %vm11594_vm9, %v1794_v0, %v1798_v49  ;;  %v1707_v37 = vor.u32 %v1706_v23, %v1692_v38  ;;  %v14630_v18 = vcombine.high %v11428_v21, %v11433_v22  ;;  %v14631_v27 = vcombine.high %v11450_v31, %v11455_v32  ;;  %v11714_v39 = vld [vmem:[#allocation2 + $0x88] sm:$0x11]  ;;  %v8961_v23 = vld [vmem:[%s14612_s3 + $0xd60] sm:$0xff] }
 0x156   : > { %3461 = vmatpush1.bf16.msra.mxu0 %v9193_v28  ;;  %3587 = vmatpush1.bf16.msra.mxu1 %v9195_v30  ;;  %v11680_v42 = vcombine.high %v1775_v44, %v1799_v60  ;;  %v11682_v8 = vcombine.low %v1775_v44, %v1799_v60  ;;  %v9217_v13 = vcombine.low %v11657_v19, %v11662_v29  ;;  %v1731_v14 = vrot.slane %v1729_v34, 4  ;;  %v8950_v30 = vld [vmem:[%s14612_s3 + $0xd08] sm:$0xff] }
 0x157   : > { %3462 = vmatprep.subr.bf16.mxu0 %v14630_v18  ;;  %3588 = vmatprep.subr.bf16.mxu1 %v14631_v27  ;;  %v1734_v15 = vrot.slane %v1732_v57, 5  ;;  %v1738_v16 = vshll.u32 %v11576_v55, 16  ;;  %v9218_v28 = vcombine.high %v11657_v19, %v11662_v29  ;;  %v1688_v56 = vrot.slane %v1687_v17, 4  ;;  %v8962_v44 = vld [vmem:[%s14612_s3 + $0xd68] sm:$0xff]  ;;  %v8977_v19 = vld [vmem:[%s14612_s3 + $0xde0] sm:$0xff] }
 0x158   : > { %v1752_v11 = vshrl.u32 %v11576_v55, 16  ;;  %v1758_v2 = vshll.u32 %v11670_v25, 16  ;;  %v1777_v36 = vshrl.u32 %v11585_v24, 16  ;;  %v1780_v47 = vshll.u32 %v11585_v24, 16  ;;  %v8974_v29 = vld [vmem:[%s14612_s3 + $0xdc8] sm:$0xff] }
 0x159   : > { %3438 = vmatmul.mubr.bf16.gmra.mrb[16].mxu0 %v11652_v4  ;;  %3564 = vmatmul.mubr.bf16.gmra.mrb[16].mxu1 %v11652_v4  ;;  %v1735_v59 = vor.u32 %v1734_v15, %v1731_v14  ;;  %v1740_v50 = vrot.slane %v1738_v16, 5  ;;  %v14632_v48 = vcombine.low %v11428_v21, %v11433_v22  ;;  %v14633_v33 = vcombine.low %v11450_v31, %v11455_v32  ;;  %v8957_v21 = vld [vmem:[%s14612_s3 + $0xd40] sm:$0xff] }
 0x15a   : > { %v1708_v9 = vrot.slane %v1707_v37, 4  ;;  %v1712_v49 = vrot.slane %v1710_v51, 5  ;;  %v1754_v26 = vrot.slane %v1752_v11, 4  ;;  %v1786_v63 = vshll.u32 %v11601_v54, 16  ;;  %3447 = vmatprep.mubr.bf16.mxu0 %v11680_v42  ;;  %3573 = vmatprep.mubr.bf16.mxu1 %v11680_v42 }
 0x15b   : > { %3463 = vmatpush1.bf16.msra.mxu0 %v14632_v48  ;;  %3589 = vmatpush1.bf16.msra.mxu1 %v14633_v33  ;;  %v14634_v0 = vcombine.high %v11469_v45, %v11474_v46  ;;  %v9220_v17 = vcombine.high %v8950_v30, %v8954_v6  ;;  %v1736_v22 = vrot.slane %v1735_v59, 4  ;;  %v1760_v31 = vrot.slane %v1758_v2, 5 }
 0x15c   : > { %3590 = vmatprep.subr.bf16.mxu1 %v9212_v62  ;;  %v1779_v32 = vrot.slane %v1777_v36, 4  ;;  %v8958_v62 = vld [vmem:[%s14612_s3 + $0xd48] sm:$0xff]  ;;  %v1755_v60 = vor.u32 %v1754_v26, %v1740_v50  ;;  %v1782_v34 = vrot.slane %v1780_v47, 5  ;;  %v1788_v57 = vrot.slane %v1786_v63, 5 }
 0x15d   : > { %3464 = vmatprep.subr.bf16.mxu0 %v14634_v0  ;;  %v1800_v37 = vshrl.u32 %v11601_v54, 16  ;;  %v9219_v51 = vcombine.low %v8950_v30, %v8954_v6  ;;  %v11737_v18 = vsel %vm11594_vm9, %v1688_v56, %v1692_v38  ;;  %v1741_v27 = vsel %vm11594_vm9, %v1736_v22, %v1740_v50  ;;  %v8973_v22 = vld [vmem:[%s14612_s3 + $0xdc0] sm:$0xff] }
 0x15e   : > { %v1806_v14 = vshll.u32 %v11714_v39, 16  ;;  %v14635_v15 = vcombine.low %v11469_v45, %v11474_v46  ;;  %v14636_v16 = vcombine.low %v11484_v52, %v11489_v53  ;;  %v11750_v30 = vsel %vm11594_vm9, %v1708_v9, %v1712_v49  ;;  %v8965_v45 = vld [vmem:[%s14612_s3 + $0xd80] sm:$0xff]  ;;  %v8966_v52 = vld [vmem:[%s14612_s3 + $0xd88] sm:$0xff] }
 0x15f   : > { %v1756_v6 = vrot.slane %v1755_v60, 4  ;;  %v1783_v38 = vor.u32 %v1782_v34, %v1779_v32  ;;  %v1802_v56 = vrot.slane %v1800_v37, 4  ;;  %v9226_v11 = vcombine.high %v8957_v21, %v8961_v23  ;;  %v8969_v46 = vld [vmem:[%s14612_s3 + $0xda0] sm:$0xff]  ;;  %v8970_v53 = vld [vmem:[%s14612_s3 + $0xda8] sm:$0xff] }
 0x160   : > { %3465 = vmatpush1.bf16.msra.mxu0 %v14635_v15  ;;  %3591 = vmatpush1.bf16.msra.mxu1 %v14636_v16  ;;  %v9228_v2 = vcombine.high %v8958_v62, %v8962_v44  ;;  %v1808_v36 = vrot.slane %v1806_v14, 5  ;;  %v11770_v47 = vcombine.high %v11737_v18, %v11750_v30  ;;  %v9225_v9 = vcombine.low %v8957_v21, %v8961_v23  ;;  %v8981_v34 = vld [vmem:[%s14612_s3 + $0xe00] sm:$0xff]  ;;  %v8986_v37 = vld [vmem:[%s14612_s3 + $0xe28] sm:$0xff] }
 0x161   : > { %3466 = vmatprep.subr.bf16.mxu0 %v9218_v28  ;;  %3592 = vmatprep.subr.bf16.mxu1 %v9220_v17  ;;  %v1761_v28 = vsel %vm11594_vm9, %v1756_v6, %v1760_v31  ;;  %v1784_v59 = vrot.slane %v1783_v38, 4  ;;  %v1803_v50 = vor.u32 %v1802_v56, %v1788_v57  ;;  %v9227_v49 = vcombine.low %v8958_v62, %v8962_v44  ;;  %v8989_v16 = vld [vmem:[%s14612_s3 + $0xe40] sm:$0xff]  ;;  %v8990_v38 = vld [vmem:[%s14612_s3 + $0xe48] sm:$0xff] }
 0x162   : > { %3448 = vmatmul.mubr.bf16.gmra.mrb[20].mxu0 %v11682_v8  ;;  %3574 = vmatmul.mubr.bf16.gmra.mrb[20].mxu1 %v11682_v8  ;;  %v11772_v48 = vcombine.high %v1741_v27, %v1761_v28  ;;  %v11774_v33 = vcombine.low %v1741_v27, %v1761_v28  ;;  %v9234_v0 = vcombine.high %v8965_v45, %v8969_v46  ;;  %v8993_v6 = vld [vmem:[%s14612_s3 + $0xe60] sm:$0xff]  ;;  %v8994_v56 = vld [vmem:[%s14612_s3 + $0xe68] sm:$0xff]  ;;  %vm5762_vm11 = vcmask 1046532  }
 0x163   : > { %v1789_v26 = vsel %vm11594_vm9, %v1784_v59, %v1788_v57  ;;  %v1804_v63 = vrot.slane %v1803_v50, 4  ;;  %3490 = vmatprep.mubr.bf16.mxu0 %v11770_v47  ;;  %3616 = vmatprep.mubr.bf16.mxu1 %v11770_v47  ;;  %v9236_v17 = vcombine.high %v8966_v52, %v8970_v53  ;;  %v9233_v23 = vcombine.low %v8965_v45, %v8969_v46  ;;  %v8982_v57 = vld [vmem:[%s14612_s3 + $0xe08] sm:$0xff]  ;;  %vm11937_vm12 = vmor %vm5761_vm10, %vm5762_vm11 }
 0x164   : > { %3467 = vmatpush1.bf16.msra.mxu0 %v9217_v13  ;;  %3593 = vmatpush1.bf16.msra.mxu1 %v9219_v51  ;;  %v8978_v13 = vld [vmem:[%s14612_s3 + $0xde8] sm:$0xff]  ;;  %v9235_v62 = vcombine.low %v8966_v52, %v8970_v53  ;;  %v9242_v44 = vcombine.high %v8973_v22, %v8977_v19  ;;  %v9241_v51 = vcombine.low %v8973_v22, %v8977_v19  ;;  %v8997_v52 = vld [vmem:[%s14612_s3 + $0xe80] sm:$0xff] }
 0x165   : > { %3468 = vmatprep.subr.bf16.mxu0 %v9226_v11  ;;  %3594 = vmatprep.subr.bf16.mxu1 %v9228_v2  ;;  %v1809_v21 = vsel %vm11594_vm9, %v1804_v63, %v1808_v36  ;;  %v9244_v60 = vcombine.high %v8974_v29, %v8978_v13  ;;  %v9243_v27 = vcombine.low %v8974_v29, %v8978_v13  ;;  %v9001_v53 = vld [vmem:[%s14612_s3 + $0xea0] sm:$0xff]  ;;  %v8998_v28 = vld [vmem:[%s14612_s3 + $0xe88] sm:$0xff] }
 0x166   : > { %v11797_v31 = vcombine.high %v1789_v26, %v1809_v21  ;;  %v11799_v32 = vcombine.low %v1789_v26, %v1809_v21  ;;  %v9250_v14 = vcombine.high %v8981_v34, %v8985_v7  ;;  %v9252_v15 = vcombine.high %v8982_v57, %v8986_v37  ;;  %v9002_v59 = vld [vmem:[%s14612_s3 + $0xea8] sm:$0xff]  ;;  %v9005_v26 = vld [vmem:[%s14612_s3 + $0xec0] sm:$0xff] }
 0x167   : > { %v9249_v11 = vcombine.low %v8981_v34, %v8985_v7  ;;  %v9251_v2 = vcombine.low %v8982_v57, %v8986_v37  ;;  %v9258_v45 = vcombine.high %v8989_v16, %v8993_v6  ;;  %v9260_v46 = vcombine.high %v8990_v38, %v8994_v56  ;;  %v9009_v63 = vld [vmem:[%s14612_s3 + $0xee0] sm:$0xff]  ;;  %v11862_v21 = vld [vmem:[%s14612_s3 + $0xf08] sm:$0xff] }
 0x168   : > { %3469 = vmatpush1.bf16.msra.mxu0 %v9225_v9  ;;  %3595 = vmatpush1.bf16.msra.mxu1 %v9227_v49  ;;  %v9257_v50 = vcombine.low %v8989_v16, %v8993_v6  ;;  %v9259_v36 = vcombine.low %v8990_v38, %v8994_v56  ;;  %v9266_v9 = vcombine.high %v8997_v52, %v9001_v53  ;;  %v11852_v22 = vld [vmem:[%s14612_s3 + $0xf00] sm:$0xff] }
 0x169   : > { %3470 = vmatprep.subr.bf16.mxu0 %v9234_v0  ;;  %3596 = vmatprep.subr.bf16.mxu1 %v9236_v17  ;;  %v9268_v49 = vcombine.high %v8998_v28, %v9002_v59  ;;  %v9006_v0 = vld [vmem:[%s14612_s3 + $0xec8] sm:$0xff]  ;;  %v9265_v19 = vcombine.low %v8997_v52, %v9001_v53  ;;  %v9267_v29 = vcombine.low %v8998_v28, %v9002_v59  ;;  %v11857_v13 = vld [vmem:[%s14612_s3 + $0xf20] sm:$0xff] }
 0x16a   : > { %v9010_v17 = vld [vmem:[%s14612_s3 + $0xee8] sm:$0xff]  ;;  %v9273_v34 = vcombine.low %v9005_v26, %v9009_v63  ;;  %v5747_v57 = vld [vmem:[#allocation2 + $0x60] sm:$0xee]  ;;  %v9282_v37 = vcombine.high %v11852_v22, %v11857_v13  ;;  %v11890_v38 = vcombine.low %v11559_v20, %v11570_v1  ;;  %v11912_v52 = vcombine.low %v11565_v43, %v11576_v55 }
 0x16b   : > { %v9275_v7 = vcombine.low %v9006_v0, %v9010_v17  ;;  %v11881_v16 = vld [vmem:[%s14612_s3 + $0xf40] sm:$0xff]  ;;  %v11916_v53 = vcombine.high %v11585_v24, %v11601_v54  ;;  %v11920_v28 = vcombine.low %v11585_v24, %v11601_v54 }
 0x16c   : > { %3471 = vmatpush1.bf16.msra.mxu0 %v9233_v23  ;;  %3597 = vmatpush1.bf16.msra.mxu1 %v9235_v62  ;;  %v11867_v23 = vld [vmem:[%s14612_s3 + $0xf28] sm:$0xff]  ;;  %v9274_v62 = vcombine.high %v9005_v26, %v9009_v63  ;;  %v11886_v6 = vld [vmem:[%s14612_s3 + $0xf60] sm:$0xff] }
 0x16d   : > { %3472 = vmatprep.subr.bf16.mxu0 %v9242_v44  ;;  %3598 = vmatprep.subr.bf16.mxu1 %v9244_v60  ;;  %v9276_v44 = vcombine.high %v9006_v0, %v9010_v17  ;;  %v5745_v60 = vld [vmem:[#allocation2 + $0x30] sm:$0xee]  ;;  %v11933_v24 = vld [vmem:[%s14612_s3 + $0xf80] sm:$0xff]  ;;  %v5776_v0 = vrot.slane %v11650_v3, 5 }
 0x16e   : > { %v9583_v56 = vrot.slane %v5745_v60, 9  ;;  %v9033_v17 = vld [vmem:[%s14612_s3 + $0xfa0] sm:$0xff] }
 0x170   : > { %3473 = vmatpush1.bf16.msra.mxu0 %v9241_v51  ;;  %3599 = vmatpush1.bf16.msra.mxu1 %v9243_v27  ;;  %v9284_v51 = vcombine.high %v11862_v21, %v11867_v23  ;;  %v11875_v27 = vcombine.high %v11559_v20, %v11570_v1  ;;  %v11906_v20 = vcombine.high %v11565_v43, %v11576_v55 }
 0x171   : > { %3474 = vmatprep.subr.bf16.mxu0 %v9250_v14  ;;  %3600 = vmatprep.subr.bf16.mxu1 %v9252_v15  ;;  %v5780_v14 = vrot.slane %v11548_v58, 5  ;;  %v5744_v15 = vld [vmem:[#allocation2 + $0x8] sm:$0xee]  ;;  %v5794_v58 = vrot.slane %v11570_v1, 5  ;;  %v5787_v1 = vrot.slane %v11589_v12, 5  ;;  %v9281_v12 = vcombine.low %v11852_v22, %v11857_v13 }
 0x172   : > { %v9582_v59 = vrot.slane %v5744_v15, 9  ;;  %v9290_v43 = vcombine.high %v11881_v16, %v11886_v6  ;;  %v9030_v22 = vld [vmem:[%s14612_s3 + $0xf88] sm:$0xff] }
 0x173   : > { %v5800_v26 = vrot.slane %v5794_v58, 4 }
 0x174   : > { %3475 = vmatpush1.bf16.msra.mxu0 %v9249_v11  ;;  %3601 = vmatpush1.bf16.msra.mxu1 %v9251_v2  ;;  %v5770_v11 = vrot.slane %v11531_v40, 5  ;;  %v11897_v2 = vld [vmem:[%s14612_s3 + $0xf48] sm:$0xff]  ;;  %v5801_v40 = vrot.slane %v11613_v41, 5  ;;  %v9283_v41 = vcombine.low %v11862_v21, %v11867_v23 }
 0x175   : > { %3476 = vmatprep.subr.bf16.mxu0 %v9258_v45  ;;  %3602 = vmatprep.subr.bf16.mxu1 %v9260_v46  ;;  %v11902_v45 = vld [vmem:[%s14612_s3 + $0xf68] sm:$0xff]  ;;  %v9585_v46 = vrot.slane %v5747_v57, 9 }
 0x176   : > { %v5775_v63 = vrot.slane %v5770_v11, 4  ;;  %v5771_v60 = vsel %vm11937_vm12, %v9582_v59, %v5770_v11  ;;  %v9291_v57 = vcombine.low %v11897_v2, %v11902_v45  ;;  %v9038_v11 = vld [vmem:[%s14612_s3 + $0xfc8] sm:$0xff] }
 0x177   : > { %v5795_v13 = vsel %vm11937_vm12, %v9585_v46, %v5794_v58 }
 0x178   : > { %3477 = vmatpush1.bf16.msra.mxu0 %v9257_v50  ;;  %3603 = vmatpush1.bf16.msra.mxu1 %v9259_v36  ;;  %v5746_v50 = vld [vmem:[#allocation2 + $0x38] sm:$0xee]  ;;  %v5786_v36 = vrot.slane %v5780_v14, 4  ;;  %v5777_v58 = vsel %vm11937_vm12, %v5775_v63, %v5776_v0  ;;  %v8791_v63 = vld [vmem:[%s14612_s3 + $0x810] sm:$0xff] }
 0x179   : > { %3478 = vmatprep.subr.bf16.mxu0 %v9266_v9  ;;  %3604 = vmatprep.subr.bf16.mxu1 %v9268_v49  ;;  %v9292_v9 = vcombine.high %v11897_v2, %v11902_v45  ;;  %v9584_v21 = vrot.slane %v5746_v50, 9  ;;  %v9042_v2 = vld [vmem:[%s14612_s3 + $0xfe8] sm:$0xff]  ;;  %v11989_v45 = vcombine.low %v5771_v60, %v5777_v58  ;;  %v5798_v50 = vrot.slane %v11601_v54, 5  ;;  %v8795_v0 = vld [vmem:[%s14612_s3 + $0x830] sm:$0xff]  ;;  %v9639_v49 = vld [vmem:[%s14612_s3 + $0x11a0] sm:$0xff] }
 0x17a   : > { %v5788_v3 = vsel %vm11937_vm12, %v5786_v36, %v5787_v1  ;;  %v11991_v1 = vcombine.high %v5771_v60, %v5777_v58 }
 0x17c   : > { %3479 = vmatpush1.bf16.msra.mxu0 %v9265_v19  ;;  %3605 = vmatpush1.bf16.msra.mxu1 %v9267_v29  ;;  %v9034_v19 = vld [vmem:[%s14612_s3 + $0xfa8] sm:$0xff]  ;;  %v5781_v29 = vsel %vm11937_vm12, %v9583_v56, %v5780_v14  ;;  %v9298_v14 = vcombine.high %v11933_v24, %v9033_v17  ;;  %v9037_v56 = vld [vmem:[%s14612_s3 + $0xfc0] sm:$0xff] }
 0x17d   : > { %3480 = vmatprep.subr.bf16.mxu0 %v9274_v62  ;;  %3606 = vmatprep.subr.bf16.mxu1 %v9276_v44  ;;  %v11957_v23 = vcombine.high %v5781_v29, %v5788_v3  ;;  %v11959_v62 = vcombine.low %v5781_v29, %v5788_v3  ;;  %v5802_v44 = vsel %vm11937_vm12, %v5800_v26, %v5801_v40 }
 0x17e   : > { %v9300_v15 = vcombine.high %v9030_v22, %v9034_v19 }
 0x180   : > { %3481 = vmatpush1.bf16.msra.mxu0 %v9273_v34  ;;  %3607 = vmatpush1.bf16.msra.mxu1 %v9275_v7  ;;  %v5748_v34 = vld [vmem:[#allocation2 + $0x68] sm:$0xee]  ;;  %v9289_v7 = vcombine.low %v11881_v16, %v11886_v6  ;;  %v5784_v16 = vrot.slane %v11576_v55, 5  ;;  %v9041_v6 = vld [vmem:[%s14612_s3 + $0xfe0] sm:$0xff]  ;;  %v5790_v55 = vrot.slane %v11670_v25, 5  ;;  %v5803_v25 = vrot.slane %v5798_v50, 4 }
 0x181   : > { %3482 = vmatprep.subr.bf16.mxu0 %v9282_v37  ;;  %3608 = vmatprep.subr.bf16.mxu1 %v9284_v51  ;;  %v11969_v37 = vcombine.high %v5795_v13, %v5802_v44  ;;  %v11971_v51 = vcombine.low %v5795_v13, %v5802_v44  ;;  %v9586_v46 = vrot.slane %v5748_v34, 9  ;;  %v9306_v36 = vcombine.high %v9037_v56, %v9041_v6  ;;  %v8799_v34 = vld [vmem:[%s14612_s3 + $0x850] sm:$0xff] }
 0x182   : > { %v5785_v40 = vsel %vm11937_vm12, %v9584_v21, %v5784_v16  ;;  %v5789_v59 = vrot.slane %v5784_v16, 4  ;;  %v9305_v13 = vcombine.low %v9037_v56, %v9041_v6  ;;  %v9307_v21 = vcombine.low %v9038_v11, %v9042_v2 }
 0x183   : > { %v9062_v44 = vcombine.high %v8791_v63, %v8795_v0  ;;  %v9061_v56 = vcombine.low %v8791_v63, %v8795_v0  ;;  %v8823_v63 = vld [vmem:[%s14612_s3 + $0x910] sm:$0xff]  ;;  %v8824_v0 = vld [vmem:[%s14612_s3 + $0x918] sm:$0xff] }
 0x184   : > { %3483 = vmatpush1.bf16.msra.mxu0 %v9281_v12  ;;  %3609 = vmatpush1.bf16.msra.mxu1 %v9283_v41  ;;  %v5804_v12 = vrot.slane %v11714_v39, 5  ;;  %v9297_v41 = vcombine.low %v11933_v24, %v9033_v17  ;;  %v5791_v26 = vsel %vm11937_vm12, %v5789_v59, %v5790_v55  ;;  %v5799_v24 = vsel %vm11937_vm12, %v9586_v46, %v5798_v50  ;;  %v8792_v17 = vld [vmem:[%s14612_s3 + $0x818] sm:$0xff]  ;;  %v8815_v50 = vld [vmem:[%s14612_s3 + $0x8d0] sm:$0xff] }
 0x185   : > { %3484 = vmatprep.subr.bf16.mxu0 %v9290_v43  ;;  %3610 = vmatprep.subr.bf16.mxu1 %v9292_v9  ;;  %v9299_v43 = vcombine.low %v9030_v22, %v9034_v19  ;;  %v9308_v9 = vcombine.high %v9038_v11, %v9042_v2  ;;  %v12004_v54 = vcombine.high %v5785_v40, %v5791_v26  ;;  %v8796_v22 = vld [vmem:[%s14612_s3 + $0x838] sm:$0xff]  ;;  %v8807_v11 = vld [vmem:[%s14612_s3 + $0x890] sm:$0xff] }
 0x186   : > { %v12006_v39 = vcombine.low %v5785_v40, %v5791_v26  ;;  %v5805_v19 = vsel %vm11937_vm12, %v5803_v25, %v5804_v12  ;;  %v9064_v60 = vcombine.high %v8792_v17, %v8796_v22  ;;  %v9063_v58 = vcombine.low %v8792_v17, %v8796_v22  ;;  %v8811_v2 = vld [vmem:[%s14612_s3 + $0x8b0] sm:$0xff]  ;;  %v8828_v17 = vld [vmem:[%s14612_s3 + $0x938] sm:$0xff] }
 0x187   : > { %v12021_v29 = vcombine.high %v5799_v24, %v5805_v19  ;;  %v12023_v3 = vcombine.low %v5799_v24, %v5805_v19  ;;  %v9078_v40 = vcombine.high %v8807_v11, %v8811_v2  ;;  %v8819_v12 = vld [vmem:[%s14612_s3 + $0x8f0] sm:$0xff] }
 0x188   : > { %3485 = vmatpush1.bf16.msra.mxu0 %v9289_v7  ;;  %3611 = vmatpush1.bf16.msra.mxu1 %v9291_v57  ;;  %v8803_v7 = vld [vmem:[%s14612_s3 + $0x870] sm:$0xff]  ;;  %v8800_v57 = vld [vmem:[%s14612_s3 + $0x858] sm:$0xff]  ;;  %v9086_v26 = vcombine.high %v8815_v50, %v8819_v12  ;;  %v9085_v22 = vcombine.low %v8815_v50, %v8819_v12 }
 0x189   : > { %3486 = vmatprep.subr.bf16.mxu0 %v9298_v14  ;;  %3612 = vmatprep.subr.bf16.mxu1 %v9300_v15  ;;  %v8804_v14 = vld [vmem:[%s14612_s3 + $0x878] sm:$0xff]  ;;  %v12039_v15 = vcombine.low %v11737_v18, %v11750_v30  ;;  %v9070_v16 = vcombine.high %v8799_v34, %v8803_v7  ;;  %v9069_v55 = vcombine.low %v8799_v34, %v8803_v7  ;;  %v8827_v24 = vld [vmem:[%s14612_s3 + $0x930] sm:$0xff] }
 0x18a   : > { %v9072_v6 = vcombine.high %v8800_v57, %v8804_v14  ;;  %v8808_v18 = vld [vmem:[%s14612_s3 + $0x898] sm:$0xff]  ;;  %v9071_v46 = vcombine.low %v8800_v57, %v8804_v14  ;;  %v9093_v57 = vcombine.low %v8823_v63, %v8827_v24  ;;  %v9095_v14 = vcombine.low %v8824_v0, %v8828_v17 }
 0x18b   : > { %v8812_v30 = vld [vmem:[%s14612_s3 + $0x8b8] sm:$0xff] }
 0x18c   : > { %3487 = vmatpush1.bf16.msra.mxu0 %v9297_v41  ;;  %3613 = vmatpush1.bf16.msra.mxu1 %v9299_v43  ;;  %v9080_v59 = vcombine.high %v8808_v18, %v8812_v30  ;;  %v8816_v41 = vld [vmem:[%s14612_s3 + $0x8d8] sm:$0xff] }
 0x18d   : > { %3488 = vmatprep.subr.bf16.mxu0 %v9306_v36  ;;  %3614 = vmatprep.subr.bf16.mxu1 %v9308_v9  ;;  %v8820_v43 = vld [vmem:[%s14612_s3 + $0x8f8] sm:$0xff]  ;;  %v9077_v36 = vcombine.low %v8807_v11, %v8811_v2  ;;  %v9079_v9 = vcombine.low %v8808_v18, %v8812_v30 }
 0x18e   : > { %v9088_v25 = vcombine.high %v8816_v41, %v8820_v43  ;;  %v9087_v19 = vcombine.low %v8816_v41, %v8820_v43  ;;  %v8832_v34 = vld [vmem:[%s14612_s3 + $0x958] sm:$0xff] }
 0x18f   : > { %v8836_v7 = vld [vmem:[%s14612_s3 + $0x978] sm:$0xff] }
 0x190   : > { %3489 = vmatpush1.bf16.msra.mxu0 %v9305_v13  ;;  %3615 = vmatpush1.bf16.msra.mxu1 %v9307_v21  ;;  %v9094_v13 = vcombine.high %v8823_v63, %v8827_v24  ;;  %v9096_v21 = vcombine.high %v8824_v0, %v8828_v17  ;;  %v8840_v11 = vld [vmem:[%s14612_s3 + $0x998] sm:$0xff]  ;;  %v9103_v30 = vcombine.low %v8832_v34, %v8836_v7 }
 0x191   : > { %3647 = vmatprep.subr.bf16.mxu0 %v9062_v44  ;;  %3773 = vmatprep.subr.bf16.mxu1 %v9064_v60  ;;  %v8831_v44 = vld [vmem:[%s14612_s3 + $0x950] sm:$0xff]  ;;  %v8844_v2 = vld [vmem:[%s14612_s3 + $0x9b8] sm:$0xff] }
 0x192   : > { %v8835_v60 = vld [vmem:[%s14612_s3 + $0x970] sm:$0xff]  ;;  %v8852_v50 = vld [vmem:[%s14612_s3 + $0x9f8] sm:$0xff]  ;;  %v9111_v41 = vcombine.low %v8840_v11, %v8844_v2 }
 0x193   : > { %3491 = vmatmul.mubr.bf16.vlgmr.msra.gmra.mrb[12].mxu0 %v12039_v15  ;;  %3617 = vmatmul.mubr.bf16.vlgmr.msra.gmra.mrb[12].mxu1 %v12039_v15  ;;  %v9101_v18 = vcombine.low %v8831_v44, %v8835_v60  ;;  %v8860_v63 = vld [vmem:[%s14612_s3 + $0xa38] sm:$0xff] }
 0x194   : > { %3500 = vmatprep.mubr.bf16.mxu0 %v11772_v48  ;;  %3626 = vmatprep.mubr.bf16.mxu1 %v11772_v48 }
 0x195   : > { %3648 = vmatpush1.bf16.msra.mxu0 %v9061_v56  ;;  %3774 = vmatpush1.bf16.msra.mxu1 %v9063_v58  ;;  %v9102_v56 = vcombine.high %v8831_v44, %v8835_v60  ;;  %v9104_v58 = vcombine.high %v8832_v34, %v8836_v7  ;;  %v8868_v44 = vld [vmem:[%s14612_s3 + $0xa78] sm:$0xff] }
 0x196   : > { %3649 = vmatprep.subr.bf16.mxu0 %v9070_v16  ;;  %3775 = vmatprep.subr.bf16.mxu1 %v9072_v6  ;;  %v8839_v16 = vld [vmem:[%s14612_s3 + $0x990] sm:$0xff] }
 0x197   : > { %v8843_v6 = vld [vmem:[%s14612_s3 + $0x9b0] sm:$0xff] }
 0x198   : > { %v9109_v12 = vcombine.low %v8839_v16, %v8843_v6 }
 0x199   : > { %3650 = vmatpush1.bf16.msra.mxu0 %v9069_v55  ;;  %3776 = vmatpush1.bf16.msra.mxu1 %v9071_v46  ;;  %v9110_v55 = vcombine.high %v8839_v16, %v8843_v6  ;;  %v9112_v46 = vcombine.high %v8840_v11, %v8844_v2  ;;  %v8876_v16 = vld [vmem:[%s14612_s3 + $0xab8] sm:$0xff] }
 0x19a   : > { %3651 = vmatprep.subr.bf16.mxu0 %v9078_v40  ;;  %3777 = vmatprep.subr.bf16.mxu1 %v9080_v59  ;;  %v8847_v40 = vld [vmem:[%s14612_s3 + $0x9d0] sm:$0xff] }
 0x19b   : > { %3501 = vmatmul.mubr.bf16.gmra.mrb[16].mxu0 %v11774_v33  ;;  %3627 = vmatmul.mubr.bf16.gmra.mrb[16].mxu1 %v11774_v33  ;;  %v8851_v59 = vld [vmem:[%s14612_s3 + $0x9f0] sm:$0xff] }
 0x19c   : > { %3510 = vmatprep.mubr.bf16.mxu0 %v11797_v31  ;;  %3636 = vmatprep.mubr.bf16.mxu1 %v11797_v31  ;;  %v9118_v43 = vcombine.high %v8847_v40, %v8851_v59  ;;  %v9117_v24 = vcombine.low %v8847_v40, %v8851_v59  ;;  %v8884_v40 = vld [vmem:[%s14612_s3 + $0xaf8] sm:$0xff] }
 0x19d   : > { %3652 = vmatpush1.bf16.msra.mxu0 %v9077_v36  ;;  %3778 = vmatpush1.bf16.msra.mxu1 %v9079_v9  ;;  %v8855_v9 = vld [vmem:[%s14612_s3 + $0xa10] sm:$0xff] }
 0x19e   : > { %3653 = vmatprep.subr.bf16.mxu0 %v9086_v26  ;;  %3779 = vmatprep.subr.bf16.mxu1 %v9088_v25  ;;  %v8859_v26 = vld [vmem:[%s14612_s3 + $0xa30] sm:$0xff]  ;;  %v8856_v25 = vld [vmem:[%s14612_s3 + $0xa18] sm:$0xff] }
 0x19f   : > { %v9126_v17 = vcombine.high %v8855_v9, %v8859_v26  ;;  %v9125_v60 = vcombine.low %v8855_v9, %v8859_v26  ;;  %v9127_v34 = vcombine.low %v8856_v25, %v8860_v63  ;;  %v8892_v9 = vld [vmem:[%s14612_s3 + $0xb38] sm:$0xff] }
 0x1a1   : > { %3654 = vmatpush1.bf16.msra.mxu0 %v9085_v22  ;;  %3780 = vmatpush1.bf16.msra.mxu1 %v9087_v19  ;;  %v9128_v22 = vcombine.high %v8856_v25, %v8860_v63  ;;  %v8863_v19 = vld [vmem:[%s14612_s3 + $0xa50] sm:$0xff] }
 0x1a2   : > { %3655 = vmatprep.subr.bf16.mxu0 %v9094_v13  ;;  %3781 = vmatprep.subr.bf16.mxu1 %v9096_v21  ;;  %v8867_v13 = vld [vmem:[%s14612_s3 + $0xa70] sm:$0xff]  ;;  %v8864_v21 = vld [vmem:[%s14612_s3 + $0xa58] sm:$0xff] }
 0x1a3   : > { %3511 = vmatmul.mubr.bf16.gmra.mrb[20].mxu0 %v11799_v32  ;;  %3637 = vmatmul.mubr.bf16.gmra.mrb[20].mxu1 %v11799_v32  ;;  %v9134_v7 = vcombine.high %v8863_v19, %v8867_v13  ;;  %v9133_v6 = vcombine.low %v8863_v19, %v8867_v13  ;;  %v9135_v11 = vcombine.low %v8864_v21, %v8868_v44  ;;  %v8900_v19 = vld [vmem:[%s14612_s3 + $0xb78] sm:$0xff] }
 0x1a4   : > { %3679 = vmatprep.mubr.bf16.mxu0 %v11619_v35  ;;  %3805 = vmatprep.mubr.bf16.mxu1 %v11619_v35  ;;  %v8848_v35 = vld [vmem:[%s14612_s3 + $0x9d8] sm:$0xff] }
 0x1a5   : > { %3656 = vmatpush1.bf16.msra.mxu0 %v9093_v57  ;;  %3782 = vmatpush1.bf16.msra.mxu1 %v9095_v14  ;;  %v9120_v36 = vcombine.high %v8848_v35, %v8852_v50  ;;  %v9119_v0 = vcombine.low %v8848_v35, %v8852_v50  ;;  %v9136_v57 = vcombine.high %v8864_v21, %v8868_v44  ;;  %v8871_v14 = vld [vmem:[%s14612_s3 + $0xa90] sm:$0xff] }
 0x1a6   : > { %3657 = vmatprep.subr.bf16.mxu0 %v9102_v56  ;;  %3783 = vmatprep.subr.bf16.mxu1 %v9104_v58  ;;  %v8875_v56 = vld [vmem:[%s14612_s3 + $0xab0] sm:$0xff]  ;;  %v8872_v58 = vld [vmem:[%s14612_s3 + $0xa98] sm:$0xff] }
 0x1a7   : > { %v9142_v2 = vcombine.high %v8871_v14, %v8875_v56  ;;  %v9141_v59 = vcombine.low %v8871_v14, %v8875_v56  ;;  %v9143_v35 = vcombine.low %v8872_v58, %v8876_v16  ;;  %v8908_v14 = vld [vmem:[%s14612_s3 + $0xbb8] sm:$0xff] }
 0x1a9   : > { %3658 = vmatpush1.bf16.msra.mxu0 %v9101_v18  ;;  %3784 = vmatpush1.bf16.msra.mxu1 %v9103_v30  ;;  %v9144_v18 = vcombine.high %v8872_v58, %v8876_v16  ;;  %v8879_v30 = vld [vmem:[%s14612_s3 + $0xad0] sm:$0xff] }
 0x1aa   : > { %3659 = vmatprep.subr.bf16.mxu0 %v9110_v55  ;;  %3785 = vmatprep.subr.bf16.mxu1 %v9112_v46  ;;  %v8883_v55 = vld [vmem:[%s14612_s3 + $0xaf0] sm:$0xff]  ;;  %v8880_v46 = vld [vmem:[%s14612_s3 + $0xad8] sm:$0xff] }
 0x1ab   : > { %v9150_v50 = vcombine.high %v8879_v30, %v8883_v55  ;;  %v9149_v26 = vcombine.low %v8879_v30, %v8883_v55  ;;  %v9151_v25 = vcombine.low %v8880_v46, %v8884_v40  ;;  %v8916_v30 = vld [vmem:[%s14612_s3 + $0xbf8] sm:$0xff] }
 0x1ad   : > { %3660 = vmatpush1.bf16.msra.mxu0 %v9109_v12  ;;  %3786 = vmatpush1.bf16.msra.mxu1 %v9111_v41  ;;  %v9152_v12 = vcombine.high %v8880_v46, %v8884_v40  ;;  %v8887_v41 = vld [vmem:[%s14612_s3 + $0xb10] sm:$0xff] }
 0x1ae   : > { %3661 = vmatprep.subr.bf16.mxu0 %v9118_v43  ;;  %3787 = vmatprep.subr.bf16.mxu1 %v9120_v36  ;;  %v8891_v43 = vld [vmem:[%s14612_s3 + $0xb30] sm:$0xff]  ;;  %v8888_v36 = vld [vmem:[%s14612_s3 + $0xb18] sm:$0xff] }
 0x1af   : > { %v9158_v63 = vcombine.high %v8887_v41, %v8891_v43  ;;  %v9157_v13 = vcombine.low %v8887_v41, %v8891_v43  ;;  %v9159_v21 = vcombine.low %v8888_v36, %v8892_v9  ;;  %v8924_v41 = vld [vmem:[%s14612_s3 + $0xc38] sm:$0xff] }
 0x1b1   : > { %3662 = vmatpush1.bf16.msra.mxu0 %v9117_v24  ;;  %3788 = vmatpush1.bf16.msra.mxu1 %v9119_v0  ;;  %v9160_v24 = vcombine.high %v8888_v36, %v8892_v9  ;;  %v8895_v0 = vld [vmem:[%s14612_s3 + $0xb50] sm:$0xff] }
 0x1b2   : > { %3663 = vmatprep.subr.bf16.mxu0 %v9126_v17  ;;  %3789 = vmatprep.subr.bf16.mxu1 %v9128_v22  ;;  %v8899_v17 = vld [vmem:[%s14612_s3 + $0xb70] sm:$0xff]  ;;  %v8896_v22 = vld [vmem:[%s14612_s3 + $0xb58] sm:$0xff] }
 0x1b3   : > { %v9166_v44 = vcombine.high %v8895_v0, %v8899_v17  ;;  %v9165_v56 = vcombine.low %v8895_v0, %v8899_v17  ;;  %v9167_v58 = vcombine.low %v8896_v22, %v8900_v19  ;;  %v8932_v0 = vld [vmem:[%s14612_s3 + $0xc78] sm:$0xff] }
 0x1b5   : > { %3664 = vmatpush1.bf16.msra.mxu0 %v9125_v60  ;;  %3790 = vmatpush1.bf16.msra.mxu1 %v9127_v34  ;;  %v9168_v60 = vcombine.high %v8896_v22, %v8900_v19  ;;  %v8903_v34 = vld [vmem:[%s14612_s3 + $0xb90] sm:$0xff] }
 0x1b6   : > { %3665 = vmatprep.subr.bf16.mxu0 %v9134_v7  ;;  %3791 = vmatprep.subr.bf16.mxu1 %v9136_v57  ;;  %v8907_v7 = vld [vmem:[%s14612_s3 + $0xbb0] sm:$0xff]  ;;  %v8904_v57 = vld [vmem:[%s14612_s3 + $0xb98] sm:$0xff] }
 0x1b7   : > { %v9174_v16 = vcombine.high %v8903_v34, %v8907_v7  ;;  %v9173_v55 = vcombine.low %v8903_v34, %v8907_v7  ;;  %v9175_v46 = vcombine.low %v8904_v57, %v8908_v14  ;;  %v8940_v34 = vld [vmem:[%s14612_s3 + $0xcb8] sm:$0xff] }
 0x1b9   : > { %3666 = vmatpush1.bf16.msra.mxu0 %v9133_v6  ;;  %3792 = vmatpush1.bf16.msra.mxu1 %v9135_v11  ;;  %v9176_v6 = vcombine.high %v8904_v57, %v8908_v14  ;;  %v8911_v11 = vld [vmem:[%s14612_s3 + $0xbd0] sm:$0xff] }
 0x1ba   : > { %3667 = vmatprep.subr.bf16.mxu0 %v9142_v2  ;;  %3793 = vmatprep.subr.bf16.mxu1 %v9144_v18  ;;  %v8915_v2 = vld [vmem:[%s14612_s3 + $0xbf0] sm:$0xff]  ;;  %v8912_v18 = vld [vmem:[%s14612_s3 + $0xbd8] sm:$0xff] }
 0x1bb   : > { %v9182_v40 = vcombine.high %v8911_v11, %v8915_v2  ;;  %v9181_v43 = vcombine.low %v8911_v11, %v8915_v2  ;;  %v9183_v36 = vcombine.low %v8912_v18, %v8916_v30 }
 0x1bd   : > { %3668 = vmatpush1.bf16.msra.mxu0 %v9141_v59  ;;  %3794 = vmatpush1.bf16.msra.mxu1 %v9143_v35  ;;  %v9184_v59 = vcombine.high %v8912_v18, %v8916_v30  ;;  %v8919_v35 = vld [vmem:[%s14612_s3 + $0xc10] sm:$0xff] }
 0x1be   : > { %3669 = vmatprep.subr.bf16.mxu0 %v9150_v50  ;;  %3795 = vmatprep.subr.bf16.mxu1 %v9152_v12  ;;  %v8923_v50 = vld [vmem:[%s14612_s3 + $0xc30] sm:$0xff]  ;;  %v8920_v12 = vld [vmem:[%s14612_s3 + $0xc18] sm:$0xff] }
 0x1bf   : > { %v9190_v9 = vcombine.high %v8919_v35, %v8923_v50  ;;  %v9189_v17 = vcombine.low %v8919_v35, %v8923_v50  ;;  %v9191_v22 = vcombine.low %v8920_v12, %v8924_v41  ;;  %v8951_v30 = vld [vmem:[%s14612_s3 + $0xd10] sm:$0xff] }
 0x1c1   : > { %3670 = vmatpush1.bf16.msra.mxu0 %v9149_v26  ;;  %3796 = vmatpush1.bf16.msra.mxu1 %v9151_v25  ;;  %v9192_v26 = vcombine.high %v8920_v12, %v8924_v41  ;;  %v8927_v25 = vld [vmem:[%s14612_s3 + $0xc50] sm:$0xff] }
 0x1c2   : > { %3671 = vmatprep.subr.bf16.mxu0 %v9158_v63  ;;  %3797 = vmatprep.subr.bf16.mxu1 %v9160_v24  ;;  %v8931_v63 = vld [vmem:[%s14612_s3 + $0xc70] sm:$0xff]  ;;  %v8928_v24 = vld [vmem:[%s14612_s3 + $0xc58] sm:$0xff] }
 0x1c3   : > { %v9198_v19 = vcombine.high %v8927_v25, %v8931_v63  ;;  %v9197_v7 = vcombine.low %v8927_v25, %v8931_v63  ;;  %v9199_v57 = vcombine.low %v8928_v24, %v8932_v0  ;;  %v8959_v12 = vld [vmem:[%s14612_s3 + $0xd50] sm:$0xff] }
 0x1c4   : > { %v8963_v41 = vld [vmem:[%s14612_s3 + $0xd70] sm:$0xff] }
 0x1c5   : > { %3672 = vmatpush1.bf16.msra.mxu0 %v9157_v13  ;;  %3798 = vmatpush1.bf16.msra.mxu1 %v9159_v21  ;;  %v9200_v13 = vcombine.high %v8928_v24, %v8932_v0  ;;  %v8935_v21 = vld [vmem:[%s14612_s3 + $0xc90] sm:$0xff]  ;;  %v8968_v0 = vld [vmem:[%s14612_s3 + $0xd98] sm:$0xff] }
 0x1c6   : > { %3673 = vmatprep.subr.bf16.mxu0 %v9166_v44  ;;  %3799 = vmatprep.subr.bf16.mxu1 %v9168_v60  ;;  %v8939_v44 = vld [vmem:[%s14612_s3 + $0xcb0] sm:$0xff]  ;;  %v8936_v60 = vld [vmem:[%s14612_s3 + $0xc98] sm:$0xff] }
 0x1c7   : > { %v9206_v14 = vcombine.high %v8935_v21, %v8939_v44  ;;  %v9207_v11 = vcombine.low %v8936_v60, %v8940_v34  ;;  %v8967_v63 = vld [vmem:[%s14612_s3 + $0xd90] sm:$0xff] }
 0x1c8   : > { %v8971_v24 = vld [vmem:[%s14612_s3 + $0xdb0] sm:$0xff] }
 0x1c9   : > { %3674 = vmatpush1.bf16.msra.mxu0 %v9165_v56  ;;  %3800 = vmatpush1.bf16.msra.mxu1 %v9167_v58  ;;  %v8943_v56 = vld [vmem:[%s14612_s3 + $0xcd0] sm:$0xff] }
 0x1ca   : > { %3675 = vmatprep.subr.bf16.mxu0 %v9174_v16  ;;  %3801 = vmatprep.subr.bf16.mxu1 %v9176_v6  ;;  %v8947_v58 = vld [vmem:[%s14612_s3 + $0xcf0] sm:$0xff]  ;;  %v8944_v16 = vld [vmem:[%s14612_s3 + $0xcd8] sm:$0xff]  ;;  %v9205_v6 = vcombine.low %v8935_v21, %v8939_v44 }
 0x1cb   : > { %v9214_v2 = vcombine.high %v8943_v56, %v8947_v58  ;;  %v8975_v21 = vld [vmem:[%s14612_s3 + $0xdd0] sm:$0xff] }
 0x1cc   : > { %v8979_v44 = vld [vmem:[%s14612_s3 + $0xdf0] sm:$0xff] }
 0x1cd   : > { %3676 = vmatpush1.bf16.msra.mxu0 %v9173_v55  ;;  %3802 = vmatpush1.bf16.msra.mxu1 %v9175_v46  ;;  %v8955_v55 = vld [vmem:[%s14612_s3 + $0xd30] sm:$0xff]  ;;  %v8952_v46 = vld [vmem:[%s14612_s3 + $0xd18] sm:$0xff] }
 0x1ce   : > { %3677 = vmatprep.subr.bf16.mxu0 %v9182_v40  ;;  %3803 = vmatprep.subr.bf16.mxu1 %v9184_v59  ;;  %v8956_v40 = vld [vmem:[%s14612_s3 + $0xd38] sm:$0xff]  ;;  %v9213_v59 = vcombine.low %v8943_v56, %v8947_v58  ;;  %v9222_v50 = vcombine.high %v8951_v30, %v8955_v55  ;;  %v8987_v56 = vld [vmem:[%s14612_s3 + $0xe30] sm:$0xff] }
 0x1cf   : > { %v8984_v58 = vld [vmem:[%s14612_s3 + $0xe18] sm:$0xff] }
 0x1d1   : > { %3678 = vmatpush1.bf16.msra.mxu0 %v9181_v43  ;;  %3804 = vmatpush1.bf16.msra.mxu1 %v9183_v36  ;;  %v8960_v43 = vld [vmem:[%s14612_s3 + $0xd58] sm:$0xff]  ;;  %v9221_v36 = vcombine.low %v8951_v30, %v8955_v55  ;;  %v8995_v30 = vld [vmem:[%s14612_s3 + $0xe70] sm:$0xff] }
 0x1d2   : > { %3710 = vmatprep.subr.bf16.mxu0 %v9190_v9  ;;  %3836 = vmatprep.subr.bf16.mxu1 %v9192_v26  ;;  %v9223_v9 = vcombine.low %v8952_v46, %v8956_v40  ;;  %v9230_v26 = vcombine.high %v8959_v12, %v8963_v41  ;;  %v8992_v55 = vld [vmem:[%s14612_s3 + $0xe58] sm:$0xff] }
 0x1d4   : > { %3680 = vmatmul.mubr.bf16.vlgmr.msra.gmra.mrb[24].mxu0 %v11617_v10  ;;  %3806 = vmatmul.mubr.bf16.vlgmr.msra.gmra.mrb[24].mxu1 %v11617_v10  ;;  %v9208_v10 = vcombine.high %v8936_v60, %v8940_v34  ;;  %v8976_v60 = vld [vmem:[%s14612_s3 + $0xdd8] sm:$0xff]  ;;  %v9237_v34 = vcombine.low %v8967_v63, %v8971_v24 }
 0x1d5   : > { %3689 = vmatprep.mubr.bf16.mxu0 %v11646_v61  ;;  %3711 = vmatpush1.bf16.msra.mxu0 %v9189_v17  ;;  %v8972_v17 = vld [vmem:[%s14612_s3 + $0xdb8] sm:$0xff] }
 0x1d6   : > { %3815 = vmatprep.mubr.bf16.mxu1 %v11646_v61  ;;  %3837 = vmatpush1.bf16.msra.mxu1 %v9191_v22  ;;  %v8948_v61 = vld [vmem:[%s14612_s3 + $0xcf8] sm:$0xff]  ;;  %v9229_v22 = vcombine.low %v8959_v12, %v8963_v41  ;;  %v9003_v12 = vld [vmem:[%s14612_s3 + $0xeb0] sm:$0xff] }
 0x1d7   : > { %3712 = vmatprep.subr.bf16.mxu0 %v9198_v19  ;;  %3838 = vmatprep.subr.bf16.mxu1 %v9200_v13  ;;  %v9216_v18 = vcombine.high %v8944_v16, %v8948_v61  ;;  %v9215_v35 = vcombine.low %v8944_v16, %v8948_v61  ;;  %v9238_v13 = vcombine.high %v8967_v63, %v8971_v24  ;;  %v8988_v16 = vld [vmem:[%s14612_s3 + $0xe38] sm:$0xff]  ;;  %v9011_v63 = vld [vmem:[%s14612_s3 + $0xef0] sm:$0xff] }
 0x1d8   : > { %v9245_v61 = vcombine.low %v8975_v21, %v8979_v44  ;;  %v9000_v41 = vld [vmem:[%s14612_s3 + $0xe98] sm:$0xff] }
 0x1d9   : > { %3713 = vmatpush1.bf16.msra.mxu0 %v9197_v7  ;;  %v9239_v7 = vcombine.low %v8968_v0, %v8972_v17  ;;  %v9008_v24 = vld [vmem:[%s14612_s3 + $0xed8] sm:$0xff] }
 0x1da   : > { %3839 = vmatpush1.bf16.msra.mxu1 %v9199_v57  ;;  %3714 = vmatprep.subr.bf16.mxu0 %v9206_v14  ;;  %v9246_v57 = vcombine.high %v8975_v21, %v8979_v44  ;;  %v9019_v21 = vld [vmem:[%s14612_s3 + $0xf30] sm:$0xff]  ;;  %v9016_v44 = vld [vmem:[%s14612_s3 + $0xf18] sm:$0xff] }
 0x1db   : > { %3840 = vmatprep.subr.bf16.mxu1 %v9208_v10  ;;  %v8983_v10 = vld [vmem:[%s14612_s3 + $0xe10] sm:$0xff] }
 0x1dc   : > { %3690 = vmatmul.mubr.bf16.gmra.mrb[28].mxu0 %v11652_v4  ;;  %3816 = vmatmul.mubr.bf16.gmra.mrb[28].mxu1 %v11652_v4  ;;  %v9224_v4 = vcombine.high %v8952_v46, %v8956_v40  ;;  %v8996_v46 = vld [vmem:[%s14612_s3 + $0xe78] sm:$0xff]  ;;  %v9253_v40 = vcombine.low %v8983_v10, %v8987_v56 }
 0x1dd   : > { %3699 = vmatprep.mubr.bf16.mxu0 %v11680_v42  ;;  %3715 = vmatpush1.bf16.msra.mxu0 %v9205_v6 }
 0x1de   : > { %3825 = vmatprep.mubr.bf16.mxu1 %v11680_v42  ;;  %3841 = vmatpush1.bf16.msra.mxu1 %v9207_v11  ;;  %v8964_v42 = vld [vmem:[%s14612_s3 + $0xd78] sm:$0xff]  ;;  %v9254_v11 = vcombine.high %v8983_v10, %v8987_v56  ;;  %v9027_v10 = vld [vmem:[%s14612_s3 + $0xf70] sm:$0xff] }
 0x1df   : > { %3716 = vmatprep.subr.bf16.mxu0 %v9214_v2  ;;  %3842 = vmatprep.subr.bf16.mxu1 %v9216_v18  ;;  %v9232_v25 = vcombine.high %v8960_v43, %v8964_v42  ;;  %v9231_v19 = vcombine.low %v8960_v43, %v8964_v42  ;;  %v9256_v2 = vcombine.high %v8984_v58, %v8988_v16  ;;  %v8991_v18 = vld [vmem:[%s14612_s3 + $0xe50] sm:$0xff]  ;;  %v9004_v43 = vld [vmem:[%s14612_s3 + $0xeb8] sm:$0xff] }
 0x1e0   : > { %v9261_v42 = vcombine.low %v8991_v18, %v8995_v30  ;;  %v9024_v56 = vld [vmem:[%s14612_s3 + $0xf58] sm:$0xff] }
 0x1e1   : > { %3717 = vmatpush1.bf16.msra.mxu0 %v9213_v59  ;;  %v9255_v59 = vcombine.low %v8984_v58, %v8988_v16  ;;  %v9028_v58 = vld [vmem:[%s14612_s3 + $0xf78] sm:$0xff] }
 0x1e2   : > { %3843 = vmatpush1.bf16.msra.mxu1 %v9215_v35  ;;  %3718 = vmatprep.subr.bf16.mxu0 %v9222_v50  ;;  %v9262_v35 = vcombine.high %v8991_v18, %v8995_v30  ;;  %v9264_v50 = vcombine.high %v8992_v55, %v8996_v46  ;;  %v9035_v18 = vld [vmem:[%s14612_s3 + $0xfb0] sm:$0xff]  ;;  %v9032_v30 = vld [vmem:[%s14612_s3 + $0xf98] sm:$0xff] }
 0x1e3   : > { %3844 = vmatprep.subr.bf16.mxu1 %v9224_v4  ;;  %v8999_v4 = vld [vmem:[%s14612_s3 + $0xe90] sm:$0xff] }
 0x1e4   : > { %3700 = vmatmul.mubr.bf16.gmra.mrb[32].mxu0 %v11682_v8  ;;  %3826 = vmatmul.mubr.bf16.gmra.mrb[32].mxu1 %v11682_v8  ;;  %v9240_v8 = vcombine.high %v8968_v0, %v8972_v17  ;;  %v9012_v0 = vld [vmem:[%s14612_s3 + $0xef8] sm:$0xff]  ;;  %v9269_v17 = vcombine.low %v8999_v4, %v9003_v12 }
 0x1e5   : > { %3719 = vmatpush1.bf16.msra.mxu0 %v9221_v36  ;;  %3742 = vmatprep.mubr.bf16.mxu0 %v11770_v47  ;;  %v9263_v36 = vcombine.low %v8992_v55, %v8996_v46  ;;  %v9036_v55 = vld [vmem:[%s14612_s3 + $0xfb8] sm:$0xff] }
 0x1e6   : > { %3845 = vmatpush1.bf16.msra.mxu1 %v9223_v9  ;;  %3868 = vmatprep.mubr.bf16.mxu1 %v11770_v47  ;;  %v8980_v47 = vld [vmem:[%s14612_s3 + $0xdf8] sm:$0xff]  ;;  %v9270_v9 = vcombine.high %v8999_v4, %v9003_v12  ;;  %v9043_v4 = vld [vmem:[%s14612_s3 + $0xff0] sm:$0xff] }
 0x1e7   : > { %3720 = vmatprep.subr.bf16.mxu0 %v9230_v26  ;;  %3846 = vmatprep.subr.bf16.mxu1 %v9232_v25  ;;  %v9248_v14 = vcombine.high %v8976_v60, %v8980_v47  ;;  %v9247_v6 = vcombine.low %v8976_v60, %v8980_v47  ;;  %v9272_v26 = vcombine.high %v9000_v41, %v9004_v43  ;;  %v9007_v25 = vld [vmem:[%s14612_s3 + $0xed0] sm:$0xff]  ;;  %v9020_v60 = vld [vmem:[%s14612_s3 + $0xf38] sm:$0xff] }
 0x1e8   : > { %v9277_v47 = vcombine.low %v9007_v25, %v9011_v63  ;;  %v9040_v12 = vld [vmem:[%s14612_s3 + $0xfd8] sm:$0xff] }
 0x1e9   : > { %3721 = vmatpush1.bf16.msra.mxu0 %v9229_v22  ;;  %v9271_v22 = vcombine.low %v9000_v41, %v9004_v43  ;;  %v9044_v41 = vld [vmem:[%s14612_s3 + $0xff8] sm:$0xff] }
 0x1ea   : > { %3847 = vmatpush1.bf16.msra.mxu1 %v9231_v19  ;;  %3722 = vmatprep.subr.bf16.mxu0 %v9238_v13  ;;  %v9278_v19 = vcombine.high %v9007_v25, %v9011_v63  ;;  %v9280_v13 = vcombine.high %v9008_v24, %v9012_v0  ;;  %v1405_v25 = vld [vmem:[%s14612_s3 + $0x20] sm:$0xff]  ;;  %v1402_v63 = vld [vmem:[%s14612_s3 + $0x8] sm:$0xff] }
 0x1eb   : > { %3848 = vmatprep.subr.bf16.mxu1 %v9240_v8  ;;  %v9015_v8 = vld [vmem:[%s14612_s3 + $0xf10] sm:$0xff] }
 0x1ec   : > { %v9285_v16 = vcombine.low %v9015_v8, %v9019_v21 }
 0x1ed   : > { %3723 = vmatpush1.bf16.msra.mxu0 %v9237_v34  ;;  %v9279_v34 = vcombine.low %v9008_v24, %v9012_v0  ;;  %v1406_v24 = vld [vmem:[%s14612_s3 + $0x28] sm:$0xff] }
 0x1ee   : > { %3849 = vmatpush1.bf16.msra.mxu1 %v9239_v7  ;;  %3724 = vmatprep.subr.bf16.mxu0 %v9246_v57  ;;  %v9286_v7 = vcombine.high %v9015_v8, %v9019_v21  ;;  %v9288_v57 = vcombine.high %v9016_v44, %v9020_v60  ;;  %v1413_v8 = vld [vmem:[%s14612_s3 + $0x60] sm:$0xff]  ;;  %v1410_v21 = vld [vmem:[%s14612_s3 + $0x48] sm:$0xff] }
 0x1ef   : > { %3850 = vmatprep.subr.bf16.mxu1 %v9248_v14  ;;  %v9023_v14 = vld [vmem:[%s14612_s3 + $0xf50] sm:$0xff] }
 0x1f0   : > { %v9293_v46 = vcombine.low %v9023_v14, %v9027_v10 }
 0x1f1   : > { %3725 = vmatpush1.bf16.msra.mxu0 %v9245_v61  ;;  %v9287_v61 = vcombine.low %v9016_v44, %v9020_v60  ;;  %v1414_v44 = vld [vmem:[%s14612_s3 + $0x68] sm:$0xff] }
 0x1f2   : > { %3851 = vmatpush1.bf16.msra.mxu1 %v9247_v6  ;;  %3726 = vmatprep.subr.bf16.mxu0 %v9254_v11  ;;  %v9294_v6 = vcombine.high %v9023_v14, %v9027_v10  ;;  %v9296_v11 = vcombine.high %v9024_v56, %v9028_v58  ;;  %v1421_v14 = vld [vmem:[%s14612_s3 + $0xa0] sm:$0xff]  ;;  %v1418_v10 = vld [vmem:[%s14612_s3 + $0x88] sm:$0xff] }
 0x1f3   : > { %3852 = vmatprep.subr.bf16.mxu1 %v9256_v2  ;;  %v9031_v2 = vld [vmem:[%s14612_s3 + $0xf90] sm:$0xff] }
 0x1f4   : > { %v9301_v43 = vcombine.low %v9031_v2, %v9035_v18 }
 0x1f5   : > { %3727 = vmatpush1.bf16.msra.mxu0 %v9253_v40  ;;  %v9295_v40 = vcombine.low %v9024_v56, %v9028_v58  ;;  %v1422_v56 = vld [vmem:[%s14612_s3 + $0xa8] sm:$0xff] }
 0x1f6   : > { %3853 = vmatpush1.bf16.msra.mxu1 %v9255_v59  ;;  %3728 = vmatprep.subr.bf16.mxu0 %v9262_v35  ;;  %v9302_v59 = vcombine.high %v9031_v2, %v9035_v18  ;;  %v9304_v35 = vcombine.high %v9032_v30, %v9036_v55  ;;  %v1430_v2 = vld [vmem:[%s14612_s3 + $0xe8] sm:$0xff] }
 0x1f7   : > { %3854 = vmatprep.subr.bf16.mxu1 %v9264_v50  ;;  %v9039_v50 = vld [vmem:[%s14612_s3 + $0xfd0] sm:$0xff] }
 0x1f8   : > { %v9309_v0 = vcombine.low %v9039_v50, %v9043_v4 }
 0x1f9   : > { %3729 = vmatpush1.bf16.msra.mxu0 %v9261_v42  ;;  %v9303_v42 = vcombine.low %v9032_v30, %v9036_v55  ;;  %v9343_v30 = vcombine.low %v1418_v10, %v1422_v56 }
 0x1fa   : > { %3855 = vmatpush1.bf16.msra.mxu1 %v9263_v36  ;;  %3730 = vmatprep.subr.bf16.mxu0 %v9270_v9  ;;  %v9310_v36 = vcombine.high %v9039_v50, %v9043_v4  ;;  %v9312_v9 = vcombine.high %v9040_v12, %v9044_v41  ;;  %v1438_v50 = vld [vmem:[%s14612_s3 + $0x128] sm:$0xff] }
 0x1fb   : > { %3856 = vmatprep.subr.bf16.mxu1 %v9272_v26  ;;  %v1401_v26 = vld [vmem:[%s14612_s3] sm:$0xff] }
 0x1fc   : > { %v9325_v60 = vcombine.low %v1401_v26, %v1405_v25 }
 0x1fd   : > { %3731 = vmatpush1.bf16.msra.mxu0 %v9269_v17  ;;  %v9311_v17 = vcombine.low %v9040_v12, %v9044_v41 }
 0x1fe   : > { %3857 = vmatpush1.bf16.msra.mxu1 %v9271_v22  ;;  %3732 = vmatprep.subr.bf16.mxu0 %v9278_v19  ;;  %v9326_v22 = vcombine.high %v1401_v26, %v1405_v25  ;;  %v9328_v19 = vcombine.high %v1402_v63, %v1406_v24  ;;  %v12505_v25 = vld [vmem:[#allocation2] sm:$0xff] }
 0x1ff   : > { %3858 = vmatprep.subr.bf16.mxu1 %v9280_v13  ;;  %v1409_v13 = vld [vmem:[%s14612_s3 + $0x40] sm:$0xff] }
 0x200   : > { %v9333_v58 = vcombine.low %v1409_v13, %v1413_v8 }
 0x201   : > { %3733 = vmatpush1.bf16.msra.mxu0 %v9277_v47  ;;  %v9327_v47 = vcombine.low %v1402_v63, %v1406_v24  ;;  %v12507_v63 = vld [vmem:[#allocation2 + $0x10] sm:$0xff] }
 0x202   : > { %3859 = vmatpush1.bf16.msra.mxu1 %v9279_v34  ;;  %3734 = vmatprep.subr.bf16.mxu0 %v9286_v7  ;;  %v9334_v34 = vcombine.high %v1409_v13, %v1413_v8  ;;  %v9336_v7 = vcombine.high %v1410_v21, %v1414_v44  ;;  %v12511_v24 = vcombine.high %v12505_v25, %v12507_v63  ;;  %v1450_v13 = vld [vmem:[%s14612_s3 + $0x188] sm:$0xff] }
 0x203   : > { %3860 = vmatprep.subr.bf16.mxu1 %v9288_v57  ;;  %v1417_v57 = vld [vmem:[%s14612_s3 + $0x80] sm:$0xff]  ;;  %v1454_v8 = vld [vmem:[%s14612_s3 + $0x1a8] sm:$0xff] }
 0x204   : > { %v9341_v18 = vcombine.low %v1417_v57, %v1421_v14 }
 0x205   : > { %3735 = vmatpush1.bf16.msra.mxu0 %v9285_v16  ;;  %v9335_v16 = vcombine.low %v1410_v21, %v1414_v44 }
 0x206   : > { %3861 = vmatpush1.bf16.msra.mxu1 %v9287_v61  ;;  %3736 = vmatprep.subr.bf16.mxu0 %v9294_v6  ;;  %v9342_v61 = vcombine.high %v1417_v57, %v1421_v14  ;;  %v1425_v6 = vld [vmem:[%s14612_s3 + $0xc0] sm:$0xff]  ;;  %v1462_v57 = vld [vmem:[%s14612_s3 + $0x1e8] sm:$0xff] }
 0x207   : > { %3862 = vmatprep.subr.bf16.mxu1 %v9296_v11  ;;  %v1429_v11 = vld [vmem:[%s14612_s3 + $0xe0] sm:$0xff] }
 0x208   : > { %v9350_v55 = vcombine.high %v1425_v6, %v1429_v11  ;;  %v9349_v4 = vcombine.low %v1425_v6, %v1429_v11  ;;  %v1470_v6 = vld [vmem:[%s14612_s3 + $0x228] sm:$0xff] }
 0x209   : > { %3737 = vmatpush1.bf16.msra.mxu0 %v9293_v46 }
 0x20a   : > { %3863 = vmatpush1.bf16.msra.mxu1 %v9295_v40  ;;  %3738 = vmatprep.subr.bf16.mxu0 %v9302_v59  ;;  %v1433_v40 = vld [vmem:[%s14612_s3 + $0x100] sm:$0xff] }
 0x20b   : > { %3864 = vmatprep.subr.bf16.mxu1 %v9304_v35  ;;  %v1437_v59 = vld [vmem:[%s14612_s3 + $0x120] sm:$0xff]  ;;  %v1434_v35 = vld [vmem:[%s14612_s3 + $0x108] sm:$0xff] }
 0x20c   : > { %v9358_v41 = vcombine.high %v1433_v40, %v1437_v59  ;;  %v9359_v26 = vcombine.low %v1434_v35, %v1438_v50 }
 0x20d   : > { %3739 = vmatpush1.bf16.msra.mxu0 %v9301_v43  ;;  %v1441_v43 = vld [vmem:[%s14612_s3 + $0x140] sm:$0xff] }
 0x20e   : > { %3865 = vmatpush1.bf16.msra.mxu1 %v9303_v42  ;;  %3740 = vmatprep.subr.bf16.mxu0 %v9310_v36  ;;  %v1445_v42 = vld [vmem:[%s14612_s3 + $0x160] sm:$0xff]  ;;  %v1446_v36 = vld [vmem:[%s14612_s3 + $0x168] sm:$0xff] }
 0x20f   : > { %3866 = vmatprep.subr.bf16.mxu1 %v9312_v9  ;;  %v9357_v9 = vcombine.low %v1433_v40, %v1437_v59  ;;  %v9365_v21 = vcombine.low %v1441_v43, %v1445_v42  ;;  %v1478_v40 = vld [vmem:[%s14612_s3 + $0x268] sm:$0xff] }
 0x211   : > { %3741 = vmatpush1.bf16.msra.mxu0 %v9309_v0  ;;  %v9366_v0 = vcombine.high %v1441_v43, %v1445_v42  ;;  %v1486_v43 = vld [vmem:[%s14612_s3 + $0x2a8] sm:$0xff] }
 0x212   : > { %3867 = vmatpush1.bf16.msra.mxu1 %v9311_v17  ;;  %5239 = vmatprep.subr.bf16.mxu0 %v9326_v22  ;;  %v1449_v22 = vld [vmem:[%s14612_s3 + $0x180] sm:$0xff] }
 0x213   : > { %5365 = vmatprep.subr.bf16.mxu1 %v9328_v19  ;;  %v1453_v19 = vld [vmem:[%s14612_s3 + $0x1a0] sm:$0xff] }
 0x214   : > { %3743 = vmatmul.mubr.bf16.vlgmr.msra.gmra.mrb[24].mxu0 %v12039_v15  ;;  %v9373_v14 = vcombine.low %v1449_v22, %v1453_v19 }
 0x215   : > { %3869 = vmatmul.mubr.bf16.vlgmr.msra.gmra.mrb[24].mxu1 %v12039_v15  ;;  %3752 = vmatprep.mubr.bf16.mxu0 %v11772_v48  ;;  %v9344_v15 = vcombine.high %v1418_v10, %v1422_v56  ;;  %v9375_v10 = vcombine.low %v1450_v13, %v1454_v8 }
 0x216   : > { %3878 = vmatprep.mubr.bf16.mxu1 %v11772_v48  ;;  %5240 = vmatpush1.bf16.msra.mxu0 %v9325_v60  ;;  %v1426_v48 = vld [vmem:[%s14612_s3 + $0xc8] sm:$0xff]  ;;  %v9374_v60 = vcombine.high %v1449_v22, %v1453_v19 }
 0x217   : > { %5366 = vmatpush1.bf16.msra.mxu1 %v9327_v47  ;;  %5241 = vmatprep.subr.bf16.mxu0 %v9334_v34  ;;  %v9352_v46 = vcombine.high %v1426_v48, %v1430_v2  ;;  %v9351_v12 = vcombine.low %v1426_v48, %v1430_v2  ;;  %v1457_v47 = vld [vmem:[%s14612_s3 + $0x1c0] sm:$0xff]  ;;  %v1494_v22 = vld [vmem:[%s14612_s3 + $0x2e8] sm:$0xff] }
 0x218   : > { %5367 = vmatprep.subr.bf16.mxu1 %v9336_v7  ;;  %v1461_v34 = vld [vmem:[%s14612_s3 + $0x1e0] sm:$0xff]  ;;  %v1458_v7 = vld [vmem:[%s14612_s3 + $0x1c8] sm:$0xff] }
 0x219   : > { %v9382_v56 = vcombine.high %v1457_v47, %v1461_v34  ;;  %v9381_v11 = vcombine.low %v1457_v47, %v1461_v34  ;;  %v9383_v48 = vcombine.low %v1458_v7, %v1462_v57  ;;  %v1502_v47 = vld [vmem:[%s14612_s3 + $0x328] sm:$0xff] }
 0x21a   : > { %5242 = vmatpush1.bf16.msra.mxu0 %v9333_v58  ;;  %v9384_v58 = vcombine.high %v1458_v7, %v1462_v57 }
 0x21b   : > { %5368 = vmatpush1.bf16.msra.mxu1 %v9335_v16  ;;  %5243 = vmatprep.subr.bf16.mxu0 %v9342_v61  ;;  %v1465_v16 = vld [vmem:[%s14612_s3 + $0x200] sm:$0xff] }
 0x21c   : > { %3753 = vmatmul.mubr.bf16.gmra.mrb[28].mxu0 %v11774_v33  ;;  %5369 = vmatprep.subr.bf16.mxu1 %v9344_v15  ;;  %v1469_v61 = vld [vmem:[%s14612_s3 + $0x220] sm:$0xff]  ;;  %v1466_v15 = vld [vmem:[%s14612_s3 + $0x208] sm:$0xff] }
 0x21d   : > { %3879 = vmatmul.mubr.bf16.gmra.mrb[28].mxu1 %v11774_v33  ;;  %3762 = vmatprep.mubr.bf16.mxu0 %v11797_v31  ;;  %v9360_v33 = vcombine.high %v1434_v35, %v1438_v50  ;;  %v9390_v2 = vcombine.high %v1465_v16, %v1469_v61  ;;  %v9389_v59 = vcombine.low %v1465_v16, %v1469_v61  ;;  %v1510_v16 = vld [vmem:[%s14612_s3 + $0x368] sm:$0xff] }
 0x21e   : > { %3888 = vmatprep.mubr.bf16.mxu1 %v11797_v31  ;;  %5244 = vmatpush1.bf16.msra.mxu0 %v9341_v18  ;;  %v1442_v31 = vld [vmem:[%s14612_s3 + $0x148] sm:$0xff]  ;;  %v9392_v18 = vcombine.high %v1466_v15, %v1470_v6  ;;  %v9391_v35 = vcombine.low %v1466_v15, %v1470_v6 }
 0x21f   : > { %5370 = vmatpush1.bf16.msra.mxu1 %v9343_v30  ;;  %5245 = vmatprep.subr.bf16.mxu0 %v9350_v55  ;;  %v9368_v17 = vcombine.high %v1442_v31, %v1446_v36  ;;  %v9367_v44 = vcombine.low %v1442_v31, %v1446_v36  ;;  %v1473_v30 = vld [vmem:[%s14612_s3 + $0x240] sm:$0xff] }
 0x220   : > { %5371 = vmatprep.subr.bf16.mxu1 %v9352_v46  ;;  %v1477_v55 = vld [vmem:[%s14612_s3 + $0x260] sm:$0xff]  ;;  %v1474_v46 = vld [vmem:[%s14612_s3 + $0x248] sm:$0xff] }
 0x221   : > { %v9398_v50 = vcombine.high %v1473_v30, %v1477_v55  ;;  %v9397_v42 = vcombine.low %v1473_v30, %v1477_v55  ;;  %v9399_v31 = vcombine.low %v1474_v46, %v1478_v40  ;;  %v1518_v30 = vld [vmem:[%s14612_s3 + $0x3a8] sm:$0xff] }
 0x222   : > { %5246 = vmatpush1.bf16.msra.mxu0 %v9349_v4  ;;  %v9400_v4 = vcombine.high %v1474_v46, %v1478_v40 }
 0x223   : > { %5372 = vmatpush1.bf16.msra.mxu1 %v9351_v12  ;;  %5247 = vmatprep.subr.bf16.mxu0 %v9358_v41  ;;  %v1481_v12 = vld [vmem:[%s14612_s3 + $0x280] sm:$0xff] }
 0x224   : > { %3763 = vmatmul.mubr.bf16.gmra.mrb[32].mxu0 %v11799_v32  ;;  %5373 = vmatprep.subr.bf16.mxu1 %v9360_v33  ;;  %v1485_v41 = vld [vmem:[%s14612_s3 + $0x2a0] sm:$0xff]  ;;  %v1482_v33 = vld [vmem:[%s14612_s3 + $0x288] sm:$0xff] }
 0x225   : > { %3889 = vmatmul.mubr.bf16.gmra.mrb[32].mxu1 %v11799_v32  ;;  %5271 = vmatprep.mubr.bf16.mxu0 %v12511_v24  ;;  %v9376_v32 = vcombine.high %v1450_v13, %v1454_v8  ;;  %v9406_v36 = vcombine.high %v1481_v12, %v1485_v41  ;;  %v9405_v19 = vcombine.low %v1481_v12, %v1485_v41  ;;  %v1526_v12 = vld [vmem:[%s14612_s3 + $0x3e8] sm:$0xff] }
 0x226   : > { %5248 = vmatpush1.bf16.msra.mxu0 %v9357_v9  ;;  %5397 = vmatprep.mubr.bf16.mxu1 %v12511_v24  ;;  %v9408_v9 = vcombine.high %v1482_v33, %v1486_v43  ;;  %v9407_v13 = vcombine.low %v1482_v33, %v1486_v43 }
 0x227   : > { %5374 = vmatpush1.bf16.msra.mxu1 %v9359_v26  ;;  %5249 = vmatprep.subr.bf16.mxu0 %v9366_v0  ;;  %v1489_v26 = vld [vmem:[%s14612_s3 + $0x2c0] sm:$0xff] }
 0x228   : > { %5375 = vmatprep.subr.bf16.mxu1 %v9368_v17  ;;  %v1493_v0 = vld [vmem:[%s14612_s3 + $0x2e0] sm:$0xff]  ;;  %v1490_v17 = vld [vmem:[%s14612_s3 + $0x2c8] sm:$0xff] }
 0x229   : > { %v9414_v8 = vcombine.high %v1489_v26, %v1493_v0  ;;  %v9413_v34 = vcombine.low %v1489_v26, %v1493_v0  ;;  %v9415_v7 = vcombine.low %v1490_v17, %v1494_v22  ;;  %v1534_v26 = vld [vmem:[%s14612_s3 + $0x428] sm:$0xff] }
 0x22a   : > { %5250 = vmatpush1.bf16.msra.mxu0 %v9365_v21  ;;  %v9416_v21 = vcombine.high %v1490_v17, %v1494_v22 }
 0x22b   : > { %5376 = vmatpush1.bf16.msra.mxu1 %v9367_v44  ;;  %5251 = vmatprep.subr.bf16.mxu0 %v9374_v60  ;;  %v1497_v44 = vld [vmem:[%s14612_s3 + $0x300] sm:$0xff] }
 0x22c   : > { %5377 = vmatprep.subr.bf16.mxu1 %v9376_v32  ;;  %v1501_v60 = vld [vmem:[%s14612_s3 + $0x320] sm:$0xff]  ;;  %v1498_v32 = vld [vmem:[%s14612_s3 + $0x308] sm:$0xff] }
 0x22d   : > { %v9422_v57 = vcombine.high %v1497_v44, %v1501_v60  ;;  %v9421_v61 = vcombine.low %v1497_v44, %v1501_v60  ;;  %v9423_v15 = vcombine.low %v1498_v32, %v1502_v47  ;;  %v1542_v44 = vld [vmem:[%s14612_s3 + $0x468] sm:$0xff]  ;;  %v12663_v60 = vcombine.low %v12505_v25, %v12507_v63  ;;  %v1549_v25 = vld [vmem:[%s14612_s3 + $0x4a0] sm:$0xff] }
 0x22e   : > { %5252 = vmatpush1.bf16.msra.mxu0 %v9373_v14  ;;  %v9424_v14 = vcombine.high %v1498_v32, %v1502_v47  ;;  %v1546_v63 = vld [vmem:[%s14612_s3 + $0x488] sm:$0xff] }
 0x22f   : > { %5378 = vmatpush1.bf16.msra.mxu1 %v9375_v10  ;;  %5253 = vmatprep.subr.bf16.mxu0 %v9382_v56  ;;  %v1505_v10 = vld [vmem:[%s14612_s3 + $0x340] sm:$0xff] }
 0x230   : > { %5379 = vmatprep.subr.bf16.mxu1 %v9384_v58  ;;  %v1509_v56 = vld [vmem:[%s14612_s3 + $0x360] sm:$0xff]  ;;  %v1506_v58 = vld [vmem:[%s14612_s3 + $0x348] sm:$0xff] }
 0x231   : > { %v9430_v6 = vcombine.high %v1505_v10, %v1509_v56  ;;  %v9429_v55 = vcombine.low %v1505_v10, %v1509_v56  ;;  %v9431_v46 = vcombine.low %v1506_v58, %v1510_v16  ;;  %v1545_v56 = vld [vmem:[%s14612_s3 + $0x480] sm:$0xff] }
 0x232   : > { %5254 = vmatpush1.bf16.msra.mxu0 %v9381_v11  ;;  %v9432_v11 = vcombine.high %v1506_v58, %v1510_v16  ;;  %v1550_v58 = vld [vmem:[%s14612_s3 + $0x4a8] sm:$0xff] }
 0x233   : > { %5380 = vmatpush1.bf16.msra.mxu1 %v9383_v48  ;;  %5255 = vmatprep.subr.bf16.mxu0 %v9390_v2  ;;  %v1513_v48 = vld [vmem:[%s14612_s3 + $0x380] sm:$0xff] }
 0x234   : > { %5381 = vmatprep.subr.bf16.mxu1 %v9392_v18  ;;  %v1517_v2 = vld [vmem:[%s14612_s3 + $0x3a0] sm:$0xff]  ;;  %v1514_v18 = vld [vmem:[%s14612_s3 + $0x388] sm:$0xff] }
 0x235   : > { %v9438_v40 = vcombine.high %v1513_v48, %v1517_v2  ;;  %v9437_v41 = vcombine.low %v1513_v48, %v1517_v2  ;;  %v9439_v33 = vcombine.low %v1514_v18, %v1518_v30  ;;  %v1557_v48 = vld [vmem:[%s14612_s3 + $0x4e0] sm:$0xff]  ;;  %v1554_v2 = vld [vmem:[%s14612_s3 + $0x4c8] sm:$0xff] }
 0x236   : > { %5256 = vmatpush1.bf16.msra.mxu0 %v9389_v59  ;;  %v9440_v59 = vcombine.high %v1514_v18, %v1518_v30  ;;  %v1558_v18 = vld [vmem:[%s14612_s3 + $0x4e8] sm:$0xff] }
 0x237   : > { %5382 = vmatpush1.bf16.msra.mxu1 %v9391_v35  ;;  %5257 = vmatprep.subr.bf16.mxu0 %v9398_v50  ;;  %v1521_v35 = vld [vmem:[%s14612_s3 + $0x3c0] sm:$0xff] }
 0x238   : > { %5383 = vmatprep.subr.bf16.mxu1 %v9400_v4  ;;  %v1525_v50 = vld [vmem:[%s14612_s3 + $0x3e0] sm:$0xff]  ;;  %v1522_v4 = vld [vmem:[%s14612_s3 + $0x3c8] sm:$0xff] }
 0x239   : > { %v9446_v43 = vcombine.high %v1521_v35, %v1525_v50  ;;  %v9445_v0 = vcombine.low %v1521_v35, %v1525_v50  ;;  %v9447_v17 = vcombine.low %v1522_v4, %v1526_v12  ;;  %v1561_v35 = vld [vmem:[%s14612_s3 + $0x500] sm:$0xff] }
 0x23a   : > { %5258 = vmatpush1.bf16.msra.mxu0 %v9397_v42  ;;  %v9448_v42 = vcombine.high %v1522_v4, %v1526_v12  ;;  %v1565_v50 = vld [vmem:[%s14612_s3 + $0x520] sm:$0xff]  ;;  %v1562_v4 = vld [vmem:[%s14612_s3 + $0x508] sm:$0xff] }
 0x23b   : > { %5384 = vmatpush1.bf16.msra.mxu1 %v9399_v31  ;;  %5259 = vmatprep.subr.bf16.mxu0 %v9406_v36  ;;  %v1529_v31 = vld [vmem:[%s14612_s3 + $0x400] sm:$0xff]  ;;  %v1566_v12 = vld [vmem:[%s14612_s3 + $0x528] sm:$0xff] }
 0x23c   : > { %5385 = vmatprep.subr.bf16.mxu1 %v9408_v9  ;;  %v1533_v36 = vld [vmem:[%s14612_s3 + $0x420] sm:$0xff]  ;;  %v1530_v9 = vld [vmem:[%s14612_s3 + $0x408] sm:$0xff] }
 0x23d   : > { %v9454_v22 = vcombine.high %v1529_v31, %v1533_v36  ;;  %v9453_v32 = vcombine.low %v1529_v31, %v1533_v36  ;;  %v9455_v47 = vcombine.low %v1530_v9, %v1534_v26  ;;  %v1569_v31 = vld [vmem:[%s14612_s3 + $0x540] sm:$0xff] }
 0x23e   : > { %5260 = vmatpush1.bf16.msra.mxu0 %v9405_v19  ;;  %v9456_v19 = vcombine.high %v1530_v9, %v1534_v26  ;;  %v1573_v36 = vld [vmem:[%s14612_s3 + $0x560] sm:$0xff]  ;;  %v1570_v9 = vld [vmem:[%s14612_s3 + $0x548] sm:$0xff] }
 0x23f   : > { %5386 = vmatpush1.bf16.msra.mxu1 %v9407_v13  ;;  %5261 = vmatprep.subr.bf16.mxu0 %v9414_v8  ;;  %v1537_v13 = vld [vmem:[%s14612_s3 + $0x440] sm:$0xff]  ;;  %v1574_v26 = vld [vmem:[%s14612_s3 + $0x568] sm:$0xff] }
 0x240   : > { %5387 = vmatprep.subr.bf16.mxu1 %v9416_v21  ;;  %v1541_v8 = vld [vmem:[%s14612_s3 + $0x460] sm:$0xff]  ;;  %v1538_v21 = vld [vmem:[%s14612_s3 + $0x448] sm:$0xff] }
 0x241   : > { %v9464_v10 = vcombine.high %v1538_v21, %v1542_v44  ;;  %v9461_v16 = vcombine.low %v1537_v13, %v1541_v8 }
 0x242   : > { %5262 = vmatpush1.bf16.msra.mxu0 %v9413_v34  ;;  %v10825_v34 = vld [vmem:[#allocation2 + $0x30] sm:$0xff] }
 0x243   : > { %5388 = vmatpush1.bf16.msra.mxu1 %v9415_v7  ;;  %5263 = vmatprep.subr.bf16.mxu0 %v9422_v57  ;;  %v10826_v7 = vld [vmem:[#allocation2 + $0x40] sm:$0xff] }
 0x244   : > { %5389 = vmatprep.subr.bf16.mxu1 %v9424_v14  ;;  %v12665_v57 = vcombine.high %v10825_v34, %v10826_v7  ;;  %v9462_v14 = vcombine.high %v1537_v13, %v1541_v8  ;;  %v12695_v30 = vcombine.low %v10825_v34, %v10826_v7  ;;  %v9494_v8 = vcombine.high %v1569_v31, %v1573_v36  ;;  %v1582_v34 = vld [vmem:[%s14612_s3 + $0x5a8] sm:$0xff] }
 0x245   : > { %v9493_v7 = vcombine.low %v1569_v31, %v1573_v36  ;;  %v1609_v36 = vld [vmem:[%s14612_s3 + $0x680] sm:$0xff] }
 0x246   : > { %5264 = vmatpush1.bf16.msra.mxu0 %v9421_v61  ;;  %v9463_v61 = vcombine.low %v1538_v21, %v1542_v44  ;;  %v9496_v21 = vcombine.high %v1570_v9, %v1574_v26  ;;  %v1577_v44 = vld [vmem:[%s14612_s3 + $0x580] sm:$0xff] }
 0x247   : > { %5390 = vmatpush1.bf16.msra.mxu1 %v9423_v15  ;;  %5265 = vmatprep.subr.bf16.mxu0 %v9430_v6  ;;  %v9470_v15 = vcombine.high %v1545_v56, %v1549_v25  ;;  %v9472_v6 = vcombine.high %v1546_v63, %v1550_v58 }
 0x248   : > { %5391 = vmatprep.subr.bf16.mxu1 %v9432_v11  ;;  %v1553_v11 = vld [vmem:[%s14612_s3 + $0x4c0] sm:$0xff] }
 0x24a   : > { %5266 = vmatpush1.bf16.msra.mxu0 %v9429_v55  ;;  %v9469_v55 = vcombine.low %v1545_v56, %v1549_v25  ;;  %v1585_v25 = vld [vmem:[%s14612_s3 + $0x5c0] sm:$0xff] }
 0x24b   : > { %5392 = vmatpush1.bf16.msra.mxu1 %v9431_v46  ;;  %5267 = vmatprep.subr.bf16.mxu0 %v9438_v40  ;;  %v9471_v46 = vcombine.low %v1546_v63, %v1550_v58  ;;  %v9478_v40 = vcombine.high %v1553_v11, %v1557_v48  ;;  %v1589_v63 = vld [vmem:[%s14612_s3 + $0x5e0] sm:$0xff]  ;;  %v1586_v58 = vld [vmem:[%s14612_s3 + $0x5c8] sm:$0xff] }
 0x24c   : > { %5393 = vmatprep.subr.bf16.mxu1 %v9440_v59  ;;  %v9480_v59 = vcombine.high %v1554_v2, %v1558_v18 }
 0x24e   : > { %5268 = vmatpush1.bf16.msra.mxu0 %v9437_v41  ;;  %v9477_v41 = vcombine.low %v1553_v11, %v1557_v48  ;;  %v1593_v48 = vld [vmem:[%s14612_s3 + $0x600] sm:$0xff] }
 0x24f   : > { %5394 = vmatpush1.bf16.msra.mxu1 %v9439_v33  ;;  %5269 = vmatprep.subr.bf16.mxu0 %v9446_v43  ;;  %v9479_v33 = vcombine.low %v1554_v2, %v1558_v18  ;;  %v9486_v43 = vcombine.high %v1561_v35, %v1565_v50  ;;  %v1597_v2 = vld [vmem:[%s14612_s3 + $0x620] sm:$0xff]  ;;  %v1594_v18 = vld [vmem:[%s14612_s3 + $0x608] sm:$0xff] }
 0x250   : > { %5395 = vmatprep.subr.bf16.mxu1 %v9448_v42  ;;  %v9488_v42 = vcombine.high %v1562_v4, %v1566_v12 }
 0x252   : > { %5270 = vmatpush1.bf16.msra.mxu0 %v9445_v0  ;;  %v9485_v0 = vcombine.low %v1561_v35, %v1565_v50  ;;  %v1601_v50 = vld [vmem:[%s14612_s3 + $0x640] sm:$0xff] }
 0x253   : > { %5396 = vmatpush1.bf16.msra.mxu1 %v9447_v17  ;;  %5302 = vmatprep.subr.bf16.mxu0 %v9454_v22  ;;  %v9487_v17 = vcombine.low %v1562_v4, %v1566_v12  ;;  %v12725_v22 = vld [vmem:[#allocation2 + $0x8] sm:$0xff]  ;;  %v1605_v4 = vld [vmem:[%s14612_s3 + $0x660] sm:$0xff] }
 0x254   : > { %5428 = vmatprep.subr.bf16.mxu1 %v9456_v19  ;;  %v12727_v19 = vld [vmem:[#allocation2 + $0x18] sm:$0xff]  ;;  %v1602_v12 = vld [vmem:[%s14612_s3 + $0x648] sm:$0xff] }
 0x255   : > { %5272 = vmatmul.mubr.bf16.vlgmr.msra.gmra.mrb[12].mxu0 %v12663_v60  ;;  %v12731_v13 = vcombine.high %v12725_v22, %v12727_v19 }
 0x256   : > { %5398 = vmatmul.mubr.bf16.vlgmr.msra.gmra.mrb[12].mxu1 %v12663_v60  ;;  %5281 = vmatprep.mubr.bf16.mxu0 %v12665_v57 }
 0x257   : > { %5303 = vmatpush1.bf16.msra.mxu0 %v9453_v32  ;;  %5407 = vmatprep.mubr.bf16.mxu1 %v12665_v57  ;;  %v1581_v32 = vld [vmem:[%s14612_s3 + $0x5a0] sm:$0xff] }
 0x258   : > { %5429 = vmatpush1.bf16.msra.mxu1 %v9455_v47  ;;  %5304 = vmatprep.subr.bf16.mxu0 %v9462_v14  ;;  %v1578_v47 = vld [vmem:[%s14612_s3 + $0x588] sm:$0xff]  ;;  %v9495_v14 = vcombine.low %v1570_v9, %v1574_v26  ;;  %v1613_v9 = vld [vmem:[%s14612_s3 + $0x6a0] sm:$0xff] }
 0x259   : > { %5430 = vmatprep.subr.bf16.mxu1 %v9464_v10  ;;  %v9502_v10 = vcombine.high %v1577_v44, %v1581_v32  ;;  %v9504_v56 = vcombine.high %v1578_v47, %v1582_v34  ;;  %v1610_v26 = vld [vmem:[%s14612_s3 + $0x688] sm:$0xff] }
 0x25b   : > { %5305 = vmatpush1.bf16.msra.mxu0 %v9461_v16  ;;  %v1590_v16 = vld [vmem:[%s14612_s3 + $0x5e8] sm:$0xff] }
 0x25c   : > { %5431 = vmatpush1.bf16.msra.mxu1 %v9463_v61  ;;  %5306 = vmatprep.subr.bf16.mxu0 %v9470_v15  ;;  %v9501_v61 = vcombine.low %v1577_v44, %v1581_v32  ;;  %v9503_v15 = vcombine.low %v1578_v47, %v1582_v34  ;;  %v9512_v11 = vcombine.high %v1586_v58, %v1590_v16  ;;  %v1617_v32 = vld [vmem:[%s14612_s3 + $0x6c0] sm:$0xff]  ;;  %v1618_v34 = vld [vmem:[%s14612_s3 + $0x6c8] sm:$0xff] }
 0x25d   : > { %5282 = vmatmul.mubr.bf16.gmra.mrb[16].mxu0 %v12695_v30  ;;  %5432 = vmatprep.subr.bf16.mxu1 %v9472_v6  ;;  %v9510_v6 = vcombine.high %v1585_v25, %v1589_v63  ;;  %v1621_v47 = vld [vmem:[%s14612_s3 + $0x6e0] sm:$0xff] }
 0x25e   : > { %5408 = vmatmul.mubr.bf16.gmra.mrb[16].mxu1 %v12695_v30  ;;  %5291 = vmatprep.mubr.bf16.mxu0 %v11875_v27 }
 0x25f   : > { %5307 = vmatpush1.bf16.msra.mxu0 %v9469_v55  ;;  %5417 = vmatprep.mubr.bf16.mxu1 %v11875_v27  ;;  %v1598_v55 = vld [vmem:[%s14612_s3 + $0x628] sm:$0xff] }
 0x260   : > { %5433 = vmatpush1.bf16.msra.mxu1 %v9471_v46  ;;  %5308 = vmatprep.subr.bf16.mxu0 %v9478_v40  ;;  %v9509_v46 = vcombine.low %v1585_v25, %v1589_v63  ;;  %v9511_v40 = vcombine.low %v1586_v58, %v1590_v16  ;;  %v9520_v35 = vcombine.high %v1594_v18, %v1598_v55  ;;  %v1625_v63 = vld [vmem:[%s14612_s3 + $0x700] sm:$0xff]  ;;  %v1626_v16 = vld [vmem:[%s14612_s3 + $0x708] sm:$0xff] }
 0x261   : > { %5434 = vmatprep.subr.bf16.mxu1 %v9480_v59  ;;  %v9518_v59 = vcombine.high %v1593_v48, %v1597_v2  ;;  %v1629_v58 = vld [vmem:[%s14612_s3 + $0x720] sm:$0xff] }
 0x263   : > { %5309 = vmatpush1.bf16.msra.mxu0 %v9477_v41  ;;  %v1606_v41 = vld [vmem:[%s14612_s3 + $0x668] sm:$0xff] }
 0x264   : > { %5435 = vmatpush1.bf16.msra.mxu1 %v9479_v33  ;;  %5310 = vmatprep.subr.bf16.mxu0 %v9486_v43  ;;  %v9517_v33 = vcombine.low %v1593_v48, %v1597_v2  ;;  %v9519_v43 = vcombine.low %v1594_v18, %v1598_v55  ;;  %v9528_v31 = vcombine.high %v1602_v12, %v1606_v41  ;;  %v1633_v2 = vld [vmem:[%s14612_s3 + $0x740] sm:$0xff]  ;;  %v1634_v55 = vld [vmem:[%s14612_s3 + $0x748] sm:$0xff] }
 0x265   : > { %5292 = vmatmul.mubr.bf16.gmra.mrb[20].mxu0 %v11890_v38  ;;  %5436 = vmatprep.subr.bf16.mxu1 %v9488_v42  ;;  %v9526_v42 = vcombine.high %v1601_v50, %v1605_v4  ;;  %v1637_v18 = vld [vmem:[%s14612_s3 + $0x760] sm:$0xff] }
 0x266   : > { %5418 = vmatmul.mubr.bf16.gmra.mrb[20].mxu1 %v11890_v38  ;;  %5334 = vmatprep.mubr.bf16.mxu0 %v12731_v13 }
 0x267   : > { %5311 = vmatpush1.bf16.msra.mxu0 %v9485_v0  ;;  %5460 = vmatprep.mubr.bf16.mxu1 %v12731_v13  ;;  %v1614_v0 = vld [vmem:[%s14612_s3 + $0x6a8] sm:$0xff] }
 0x268   : > { %5437 = vmatpush1.bf16.msra.mxu1 %v9487_v17  ;;  %5312 = vmatprep.subr.bf16.mxu0 %v9494_v8  ;;  %v9525_v17 = vcombine.low %v1601_v50, %v1605_v4  ;;  %v9527_v8 = vcombine.low %v1602_v12, %v1606_v41  ;;  %v9536_v44 = vcombine.high %v1610_v26, %v1614_v0  ;;  %v1641_v4 = vld [vmem:[%s14612_s3 + $0x780] sm:$0xff]  ;;  %v1642_v41 = vld [vmem:[%s14612_s3 + $0x788] sm:$0xff] }
 0x269   : > { %5438 = vmatprep.subr.bf16.mxu1 %v9496_v21  ;;  %v9534_v21 = vcombine.high %v1609_v36, %v1613_v9  ;;  %v1645_v12 = vld [vmem:[%s14612_s3 + $0x7a0] sm:$0xff] }
 0x26b   : > { %5313 = vmatpush1.bf16.msra.mxu0 %v9493_v7  ;;  %v1622_v7 = vld [vmem:[%s14612_s3 + $0x6e8] sm:$0xff] }
 0x26c   : > { %5439 = vmatpush1.bf16.msra.mxu1 %v9495_v14  ;;  %5314 = vmatprep.subr.bf16.mxu0 %v9502_v10  ;;  %v9533_v14 = vcombine.low %v1609_v36, %v1613_v9  ;;  %v9535_v10 = vcombine.low %v1610_v26, %v1614_v0  ;;  %v9544_v25 = vcombine.high %v1618_v34, %v1622_v7  ;;  %v1649_v9 = vld [vmem:[%s14612_s3 + $0x7c0] sm:$0xff]  ;;  %v1650_v0 = vld [vmem:[%s14612_s3 + $0x7c8] sm:$0xff] }
 0x26d   : > { %5440 = vmatprep.subr.bf16.mxu1 %v9504_v56  ;;  %v9542_v56 = vcombine.high %v1617_v32, %v1621_v47  ;;  %v1653_v26 = vld [vmem:[%s14612_s3 + $0x7e0] sm:$0xff] }
 0x26f   : > { %5315 = vmatpush1.bf16.msra.mxu0 %v9501_v61  ;;  %v1630_v61 = vld [vmem:[%s14612_s3 + $0x728] sm:$0xff] }
 0x270   : > { %5441 = vmatpush1.bf16.msra.mxu1 %v9503_v15  ;;  %5316 = vmatprep.subr.bf16.mxu0 %v9510_v6  ;;  %v9541_v15 = vcombine.low %v1617_v32, %v1621_v47  ;;  %v9543_v6 = vcombine.low %v1618_v34, %v1622_v7  ;;  %v9552_v48 = vcombine.high %v1626_v16, %v1630_v61  ;;  %v1403_v47 = vld [vmem:[%s14612_s3 + $0x10] sm:$0xff]  ;;  %v1404_v7 = vld [vmem:[%s14612_s3 + $0x18] sm:$0xff] }
 0x271   : > { %5442 = vmatprep.subr.bf16.mxu1 %v9512_v11  ;;  %v9550_v11 = vcombine.high %v1625_v63, %v1629_v58  ;;  %v1407_v34 = vld [vmem:[%s14612_s3 + $0x30] sm:$0xff] }
 0x273   : > { %5317 = vmatpush1.bf16.msra.mxu0 %v9509_v46  ;;  %v1638_v46 = vld [vmem:[%s14612_s3 + $0x768] sm:$0xff] }
 0x274   : > { %5443 = vmatpush1.bf16.msra.mxu1 %v9511_v40  ;;  %5318 = vmatprep.subr.bf16.mxu0 %v9518_v59  ;;  %v9549_v40 = vcombine.low %v1625_v63, %v1629_v58  ;;  %v9551_v59 = vcombine.low %v1626_v16, %v1630_v61  ;;  %v9560_v50 = vcombine.high %v1634_v55, %v1638_v46  ;;  %v1411_v58 = vld [vmem:[%s14612_s3 + $0x50] sm:$0xff]  ;;  %v1412_v61 = vld [vmem:[%s14612_s3 + $0x58] sm:$0xff] }
 0x275   : > { %5444 = vmatprep.subr.bf16.mxu1 %v9520_v35  ;;  %v9558_v35 = vcombine.high %v1633_v2, %v1637_v18  ;;  %v1415_v16 = vld [vmem:[%s14612_s3 + $0x70] sm:$0xff] }
 0x277   : > { %5319 = vmatpush1.bf16.msra.mxu0 %v9517_v33  ;;  %v1646_v33 = vld [vmem:[%s14612_s3 + $0x7a8] sm:$0xff] }
 0x278   : > { %5445 = vmatpush1.bf16.msra.mxu1 %v9519_v43  ;;  %5320 = vmatprep.subr.bf16.mxu0 %v9526_v42  ;;  %v9557_v43 = vcombine.low %v1633_v2, %v1637_v18  ;;  %v9559_v42 = vcombine.low %v1634_v55, %v1638_v46  ;;  %v9568_v36 = vcombine.high %v1642_v41, %v1646_v33  ;;  %v1419_v55 = vld [vmem:[%s14612_s3 + $0x90] sm:$0xff] }
 0x279   : > { %5446 = vmatprep.subr.bf16.mxu1 %v9528_v31  ;;  %v9566_v31 = vcombine.high %v1641_v4, %v1645_v12  ;;  %v9338_v2 = vcombine.high %v1411_v58, %v1415_v16  ;;  %v1423_v46 = vld [vmem:[%s14612_s3 + $0xb0] sm:$0xff] }
 0x27b   : > { %5321 = vmatpush1.bf16.msra.mxu0 %v9525_v17  ;;  %v1654_v17 = vld [vmem:[%s14612_s3 + $0x7e8] sm:$0xff] }
 0x27c   : > { %5447 = vmatpush1.bf16.msra.mxu1 %v9527_v8  ;;  %5322 = vmatprep.subr.bf16.mxu0 %v9534_v21  ;;  %v9565_v8 = vcombine.low %v1641_v4, %v1645_v12  ;;  %v9567_v21 = vcombine.low %v1642_v41, %v1646_v33  ;;  %v9576_v32 = vcombine.high %v1650_v0, %v1654_v17  ;;  %v1427_v4 = vld [vmem:[%s14612_s3 + $0xd0] sm:$0xff]  ;;  %v1428_v41 = vld [vmem:[%s14612_s3 + $0xd8] sm:$0xff] }
 0x27d   : > { %5448 = vmatprep.subr.bf16.mxu1 %v9536_v44  ;;  %v9574_v44 = vcombine.high %v1649_v9, %v1653_v26  ;;  %v1431_v12 = vld [vmem:[%s14612_s3 + $0xf0] sm:$0xff]  ;;  %v1432_v33 = vld [vmem:[%s14612_s3 + $0xf8] sm:$0xff] }
 0x27f   : > { %5323 = vmatpush1.bf16.msra.mxu0 %v9533_v14  ;;  %v1408_v14 = vld [vmem:[%s14612_s3 + $0x38] sm:$0xff] }
 0x280   : > { %5449 = vmatpush1.bf16.msra.mxu1 %v9535_v10  ;;  %5324 = vmatprep.subr.bf16.mxu0 %v9542_v56  ;;  %v9573_v10 = vcombine.low %v1649_v9, %v1653_v26  ;;  %v9575_v56 = vcombine.low %v1650_v0, %v1654_v17  ;;  %v9332_v63 = vcombine.high %v1404_v7, %v1408_v14  ;;  %v1435_v9 = vld [vmem:[%s14612_s3 + $0x110] sm:$0xff]  ;;  %v1436_v0 = vld [vmem:[%s14612_s3 + $0x118] sm:$0xff] }
 0x281   : > { %5450 = vmatprep.subr.bf16.mxu1 %v9544_v25  ;;  %v9330_v25 = vcombine.high %v1403_v47, %v1407_v34  ;;  %v1439_v26 = vld [vmem:[%s14612_s3 + $0x130] sm:$0xff]  ;;  %v1440_v17 = vld [vmem:[%s14612_s3 + $0x138] sm:$0xff] }
 0x283   : > { %5325 = vmatpush1.bf16.msra.mxu0 %v9541_v15  ;;  %v1416_v15 = vld [vmem:[%s14612_s3 + $0x78] sm:$0xff] }
 0x284   : > { %5451 = vmatpush1.bf16.msra.mxu1 %v9543_v6  ;;  %5326 = vmatprep.subr.bf16.mxu0 %v9550_v11  ;;  %v12883_v6 = vcombine.low %v12725_v22, %v12727_v19  ;;  %v9329_v11 = vcombine.low %v1403_v47, %v1407_v34  ;;  %v9340_v18 = vcombine.high %v1412_v61, %v1416_v15  ;;  %v1420_v22 = vld [vmem:[%s14612_s3 + $0x98] sm:$0xff]  ;;  %v1443_v47 = vld [vmem:[%s14612_s3 + $0x150] sm:$0xff] }
 0x285   : > { %5452 = vmatprep.subr.bf16.mxu1 %v9552_v48  ;;  %v9331_v48 = vcombine.low %v1404_v7, %v1408_v14  ;;  %v1424_v19 = vld [vmem:[%s14612_s3 + $0xb8] sm:$0xff]  ;;  %v1447_v34 = vld [vmem:[%s14612_s3 + $0x170] sm:$0xff] }
 0x286   : > { %v1444_v7 = vld [vmem:[%s14612_s3 + $0x158] sm:$0xff] }
 0x287   : > { %5327 = vmatpush1.bf16.msra.mxu0 %v9549_v40  ;;  %v9337_v40 = vcombine.low %v1411_v58, %v1415_v16  ;;  %v1448_v14 = vld [vmem:[%s14612_s3 + $0x178] sm:$0xff]  ;;  %v1451_v58 = vld [vmem:[%s14612_s3 + $0x190] sm:$0xff] }
 0x288   : > { %5453 = vmatpush1.bf16.msra.mxu1 %v9551_v59  ;;  %5328 = vmatprep.subr.bf16.mxu0 %v9558_v35  ;;  %v9339_v59 = vcombine.low %v1412_v61, %v1416_v15  ;;  %v9346_v35 = vcombine.high %v1419_v55, %v1423_v46  ;;  %v1455_v16 = vld [vmem:[%s14612_s3 + $0x1b0] sm:$0xff]  ;;  %v1452_v61 = vld [vmem:[%s14612_s3 + $0x198] sm:$0xff] }
 0x289   : > { %5454 = vmatprep.subr.bf16.mxu1 %v9560_v50  ;;  %v9348_v50 = vcombine.high %v1420_v22, %v1424_v19  ;;  %v1456_v15 = vld [vmem:[%s14612_s3 + $0x1b8] sm:$0xff] }
 0x28b   : > { %5329 = vmatpush1.bf16.msra.mxu0 %v9557_v43  ;;  %v9345_v43 = vcombine.low %v1419_v55, %v1423_v46  ;;  %v1459_v55 = vld [vmem:[%s14612_s3 + $0x1d0] sm:$0xff] }
 0x28c   : > { %5455 = vmatpush1.bf16.msra.mxu1 %v9559_v42  ;;  %5330 = vmatprep.subr.bf16.mxu0 %v9566_v31  ;;  %v9347_v42 = vcombine.low %v1420_v22, %v1424_v19  ;;  %v9354_v31 = vcombine.high %v1427_v4, %v1431_v12  ;;  %v1463_v46 = vld [vmem:[%s14612_s3 + $0x1f0] sm:$0xff]  ;;  %v1460_v22 = vld [vmem:[%s14612_s3 + $0x1d8] sm:$0xff]  ;;  %v9377_v19 = vcombine.low %v1451_v58, %v1455_v16 }
 0x28d   : > { %5456 = vmatprep.subr.bf16.mxu1 %v9568_v36  ;;  %v9356_v36 = vcombine.high %v1428_v41, %v1432_v33 }
 0x28f   : > { %5331 = vmatpush1.bf16.msra.mxu0 %v9565_v8  ;;  %v9353_v8 = vcombine.low %v1427_v4, %v1431_v12  ;;  %v1471_v4 = vld [vmem:[%s14612_s3 + $0x230] sm:$0xff]  ;;  %v1468_v12 = vld [vmem:[%s14612_s3 + $0x218] sm:$0xff] }
 0x290   : > { %5457 = vmatpush1.bf16.msra.mxu1 %v9567_v21  ;;  %5332 = vmatprep.subr.bf16.mxu0 %v9574_v44  ;;  %v9355_v21 = vcombine.low %v1428_v41, %v1432_v33  ;;  %v9362_v44 = vcombine.high %v1435_v9, %v1439_v26  ;;  %v1472_v41 = vld [vmem:[%s14612_s3 + $0x238] sm:$0xff]  ;;  %v9385_v33 = vcombine.low %v1459_v55, %v1463_v46 }
 0x291   : > { %5458 = vmatprep.subr.bf16.mxu1 %v9576_v32  ;;  %v9364_v32 = vcombine.high %v1436_v0, %v1440_v17 }
 0x293   : > { %5333 = vmatpush1.bf16.msra.mxu0 %v9573_v10  ;;  %v9361_v10 = vcombine.low %v1435_v9, %v1439_v26  ;;  %v1479_v9 = vld [vmem:[%s14612_s3 + $0x270] sm:$0xff]  ;;  %v1476_v26 = vld [vmem:[%s14612_s3 + $0x258] sm:$0xff] }
 0x294   : > { %5459 = vmatpush1.bf16.msra.mxu1 %v9575_v56  ;;  %5491 = vmatprep.subr.bf16.mxu0 %v9330_v25  ;;  %v9363_v56 = vcombine.low %v1436_v0, %v1440_v17  ;;  %v9370_v25 = vcombine.high %v1443_v47, %v1447_v34  ;;  %v1480_v0 = vld [vmem:[%s14612_s3 + $0x278] sm:$0xff] }
 0x295   : > { %5617 = vmatprep.subr.bf16.mxu1 %v9332_v63  ;;  %v9372_v63 = vcombine.high %v1444_v7, %v1448_v14 }
 0x296   : > { %5335 = vmatmul.mubr.bf16.vlgmr.msra.gmra.mrb[12].mxu0 %v12883_v6 }
 0x297   : > { %5461 = vmatmul.mubr.bf16.vlgmr.msra.gmra.mrb[12].mxu1 %v12883_v6  ;;  %5344 = vmatprep.mubr.bf16.mxu0 %v11906_v20 }
 0x298   : > { %5470 = vmatprep.mubr.bf16.mxu1 %v11906_v20  ;;  %5492 = vmatpush1.bf16.msra.mxu0 %v9329_v11  ;;  %v9369_v11 = vcombine.low %v1443_v47, %v1447_v34  ;;  %v1487_v47 = vld [vmem:[%s14612_s3 + $0x2b0] sm:$0xff]  ;;  %v1484_v34 = vld [vmem:[%s14612_s3 + $0x298] sm:$0xff] }
 0x299   : > { %5618 = vmatpush1.bf16.msra.mxu1 %v9331_v48  ;;  %5493 = vmatprep.subr.bf16.mxu0 %v9338_v2  ;;  %v9371_v48 = vcombine.low %v1444_v7, %v1448_v14  ;;  %v9378_v2 = vcombine.high %v1451_v58, %v1455_v16  ;;  %v1488_v7 = vld [vmem:[%s14612_s3 + $0x2b8] sm:$0xff]  ;;  %v1495_v58 = vld [vmem:[%s14612_s3 + $0x2f0] sm:$0xff] }
 0x29a   : > { %5619 = vmatprep.subr.bf16.mxu1 %v9340_v18  ;;  %v9380_v18 = vcombine.high %v1452_v61, %v1456_v15  ;;  %v1492_v16 = vld [vmem:[%s14612_s3 + $0x2d8] sm:$0xff] }
 0x29c   : > { %5494 = vmatpush1.bf16.msra.mxu0 %v9337_v40  ;;  %v9379_v40 = vcombine.low %v1452_v61, %v1456_v15  ;;  %v1496_v61 = vld [vmem:[%s14612_s3 + $0x2f8] sm:$0xff] }
 0x29d   : > { %5620 = vmatpush1.bf16.msra.mxu1 %v9339_v59  ;;  %5495 = vmatprep.subr.bf16.mxu0 %v9346_v35  ;;  %v9386_v59 = vcombine.high %v1459_v55, %v1463_v46  ;;  %v1503_v55 = vld [vmem:[%s14612_s3 + $0x330] sm:$0xff]  ;;  %v1500_v46 = vld [vmem:[%s14612_s3 + $0x318] sm:$0xff] }
 0x29e   : > { %5345 = vmatmul.mubr.bf16.gmra.mrb[16].mxu0 %v11912_v52  ;;  %5621 = vmatprep.subr.bf16.mxu1 %v9348_v50  ;;  %v1467_v50 = vld [vmem:[%s14612_s3 + $0x210] sm:$0xff] }
 0x29f   : > { %5471 = vmatmul.mubr.bf16.gmra.mrb[16].mxu1 %v11912_v52  ;;  %5354 = vmatprep.mubr.bf16.mxu0 %v11916_v53  ;;  %v9393_v17 = vcombine.low %v1467_v50, %v1471_v4 }
 0x2a0   : > { %5480 = vmatprep.mubr.bf16.mxu1 %v11916_v53  ;;  %5496 = vmatpush1.bf16.msra.mxu0 %v9345_v43 }
 0x2a1   : > { %5622 = vmatpush1.bf16.msra.mxu1 %v9347_v42  ;;  %5497 = vmatprep.subr.bf16.mxu0 %v9354_v31  ;;  %v9394_v42 = vcombine.high %v1467_v50, %v1471_v4  ;;  %v9396_v31 = vcombine.high %v1468_v12, %v1472_v41  ;;  %v1511_v50 = vld [vmem:[%s14612_s3 + $0x370] sm:$0xff]  ;;  %v1508_v4 = vld [vmem:[%s14612_s3 + $0x358] sm:$0xff] }
 0x2a2   : > { %5623 = vmatprep.subr.bf16.mxu1 %v9356_v36  ;;  %v1475_v36 = vld [vmem:[%s14612_s3 + $0x250] sm:$0xff] }
 0x2a3   : > { %v9401_v14 = vcombine.low %v1475_v36, %v1479_v9 }
 0x2a4   : > { %5498 = vmatpush1.bf16.msra.mxu0 %v9353_v8  ;;  %v9395_v8 = vcombine.low %v1468_v12, %v1472_v41  ;;  %v1512_v12 = vld [vmem:[%s14612_s3 + $0x378] sm:$0xff] }
 0x2a5   : > { %5624 = vmatpush1.bf16.msra.mxu1 %v9355_v21  ;;  %5499 = vmatprep.subr.bf16.mxu0 %v9362_v44  ;;  %v9402_v21 = vcombine.high %v1475_v36, %v1479_v9  ;;  %v9404_v44 = vcombine.high %v1476_v26, %v1480_v0  ;;  %v1519_v36 = vld [vmem:[%s14612_s3 + $0x3b0] sm:$0xff]  ;;  %v1516_v9 = vld [vmem:[%s14612_s3 + $0x398] sm:$0xff] }
 0x2a6   : > { %5355 = vmatmul.mubr.bf16.gmra.mrb[20].mxu0 %v11920_v28  ;;  %5625 = vmatprep.subr.bf16.mxu1 %v9364_v32  ;;  %v1483_v32 = vld [vmem:[%s14612_s3 + $0x290] sm:$0xff] }
 0x2a7   : > { %5481 = vmatmul.mubr.bf16.gmra.mrb[20].mxu1 %v11920_v28  ;;  %5523 = vmatprep.mubr.bf16.mxu0 %v12511_v24  ;;  %v9409_v15 = vcombine.low %v1483_v32, %v1487_v47 }
 0x2a8   : > { %5500 = vmatpush1.bf16.msra.mxu0 %v9361_v10  ;;  %5649 = vmatprep.mubr.bf16.mxu1 %v12511_v24  ;;  %v1464_v24 = vld [vmem:[%s14612_s3 + $0x1f8] sm:$0xff]  ;;  %v9403_v10 = vcombine.low %v1476_v26, %v1480_v0 }
 0x2a9   : > { %5626 = vmatpush1.bf16.msra.mxu1 %v9363_v56  ;;  %5501 = vmatprep.subr.bf16.mxu0 %v9370_v25  ;;  %v9388_v35 = vcombine.high %v1460_v22, %v1464_v24  ;;  %v9387_v43 = vcombine.low %v1460_v22, %v1464_v24  ;;  %v9410_v56 = vcombine.high %v1483_v32, %v1487_v47  ;;  %v1504_v22 = vld [vmem:[%s14612_s3 + $0x338] sm:$0xff]  ;;  %v1527_v32 = vld [vmem:[%s14612_s3 + $0x3f0] sm:$0xff] }
 0x2aa   : > { %5627 = vmatprep.subr.bf16.mxu1 %v9372_v63  ;;  %v9412_v25 = vcombine.high %v1484_v34, %v1488_v7  ;;  %v1491_v63 = vld [vmem:[%s14612_s3 + $0x2d0] sm:$0xff]  ;;  %v1520_v26 = vld [vmem:[%s14612_s3 + $0x3b8] sm:$0xff] }
 0x2ab   : > { %v9417_v24 = vcombine.low %v1491_v63, %v1495_v58  ;;  %v1524_v47 = vld [vmem:[%s14612_s3 + $0x3d8] sm:$0xff] }
 0x2ac   : > { %5502 = vmatpush1.bf16.msra.mxu0 %v9369_v11  ;;  %v9411_v11 = vcombine.low %v1484_v34, %v1488_v7  ;;  %v1528_v34 = vld [vmem:[%s14612_s3 + $0x3f8] sm:$0xff] }
 0x2ad   : > { %5628 = vmatpush1.bf16.msra.mxu1 %v9371_v48  ;;  %5503 = vmatprep.subr.bf16.mxu0 %v9378_v2  ;;  %v9418_v48 = vcombine.high %v1491_v63, %v1495_v58  ;;  %v9420_v2 = vcombine.high %v1492_v16, %v1496_v61  ;;  %v1535_v63 = vld [vmem:[%s14612_s3 + $0x430] sm:$0xff]  ;;  %v1532_v58 = vld [vmem:[%s14612_s3 + $0x418] sm:$0xff] }
 0x2ae   : > { %5629 = vmatprep.subr.bf16.mxu1 %v9380_v18  ;;  %v1499_v18 = vld [vmem:[%s14612_s3 + $0x310] sm:$0xff] }
 0x2af   : > { %v9425_v41 = vcombine.low %v1499_v18, %v1503_v55 }
 0x2b0   : > { %5504 = vmatpush1.bf16.msra.mxu0 %v9377_v19  ;;  %v9419_v19 = vcombine.low %v1492_v16, %v1496_v61  ;;  %v1536_v16 = vld [vmem:[%s14612_s3 + $0x438] sm:$0xff] }
 0x2b1   : > { %5630 = vmatpush1.bf16.msra.mxu1 %v9379_v40  ;;  %5505 = vmatprep.subr.bf16.mxu0 %v9386_v59  ;;  %v9426_v40 = vcombine.high %v1499_v18, %v1503_v55  ;;  %v9428_v59 = vcombine.high %v1500_v46, %v1504_v22  ;;  %v1543_v18 = vld [vmem:[%s14612_s3 + $0x470] sm:$0xff]  ;;  %v1540_v55 = vld [vmem:[%s14612_s3 + $0x458] sm:$0xff] }
 0x2b2   : > { %5631 = vmatprep.subr.bf16.mxu1 %v9388_v35  ;;  %v1507_v35 = vld [vmem:[%s14612_s3 + $0x350] sm:$0xff] }
 0x2b3   : > { %v9433_v0 = vcombine.low %v1507_v35, %v1511_v50 }
 0x2b4   : > { %5506 = vmatpush1.bf16.msra.mxu0 %v9385_v33  ;;  %v9427_v33 = vcombine.low %v1500_v46, %v1504_v22  ;;  %v1544_v46 = vld [vmem:[%s14612_s3 + $0x478] sm:$0xff] }
 0x2b5   : > { %5632 = vmatpush1.bf16.msra.mxu1 %v9387_v43  ;;  %5507 = vmatprep.subr.bf16.mxu0 %v9394_v42  ;;  %v9434_v43 = vcombine.high %v1507_v35, %v1511_v50  ;;  %v9436_v42 = vcombine.high %v1508_v4, %v1512_v12  ;;  %v1551_v35 = vld [vmem:[%s14612_s3 + $0x4b0] sm:$0xff]  ;;  %v1548_v50 = vld [vmem:[%s14612_s3 + $0x498] sm:$0xff] }
 0x2b6   : > { %5633 = vmatprep.subr.bf16.mxu1 %v9396_v31  ;;  %v1515_v31 = vld [vmem:[%s14612_s3 + $0x390] sm:$0xff] }
 0x2b7   : > { %v9441_v7 = vcombine.low %v1515_v31, %v1519_v36 }
 0x2b8   : > { %5508 = vmatpush1.bf16.msra.mxu0 %v9393_v17  ;;  %v9435_v17 = vcombine.low %v1508_v4, %v1512_v12  ;;  %v1552_v4 = vld [vmem:[%s14612_s3 + $0x4b8] sm:$0xff] }
 0x2b9   : > { %5634 = vmatpush1.bf16.msra.mxu1 %v9395_v8  ;;  %5509 = vmatprep.subr.bf16.mxu0 %v9402_v21  ;;  %v9442_v8 = vcombine.high %v1515_v31, %v1519_v36  ;;  %v9444_v21 = vcombine.high %v1516_v9, %v1520_v26  ;;  %v1556_v31 = vld [vmem:[%s14612_s3 + $0x4d8] sm:$0xff] }
 0x2ba   : > { %5635 = vmatprep.subr.bf16.mxu1 %v9404_v44  ;;  %v1523_v44 = vld [vmem:[%s14612_s3 + $0x3d0] sm:$0xff] }
 0x2bb   : > { %v9449_v61 = vcombine.low %v1523_v44, %v1527_v32 }
 0x2bc   : > { %5510 = vmatpush1.bf16.msra.mxu0 %v9401_v14  ;;  %v9443_v14 = vcombine.low %v1516_v9, %v1520_v26  ;;  %v9475_v9 = vcombine.low %v1548_v50, %v1552_v4 }
 0x2bd   : > { %5636 = vmatpush1.bf16.msra.mxu1 %v9403_v10  ;;  %5511 = vmatprep.subr.bf16.mxu0 %v9410_v56  ;;  %v9450_v10 = vcombine.high %v1523_v44, %v1527_v32  ;;  %v9452_v56 = vcombine.high %v1524_v47, %v1528_v34  ;;  %v1568_v44 = vld [vmem:[%s14612_s3 + $0x538] sm:$0xff] }
 0x2be   : > { %5637 = vmatprep.subr.bf16.mxu1 %v9412_v25  ;;  %v1531_v25 = vld [vmem:[%s14612_s3 + $0x410] sm:$0xff] }
 0x2bf   : > { %v9457_v22 = vcombine.low %v1531_v25, %v1535_v63 }
 0x2c0   : > { %5512 = vmatpush1.bf16.msra.mxu0 %v9409_v15  ;;  %v9451_v15 = vcombine.low %v1524_v47, %v1528_v34 }
 0x2c1   : > { %5638 = vmatpush1.bf16.msra.mxu1 %v9411_v11  ;;  %5513 = vmatprep.subr.bf16.mxu0 %v9418_v48  ;;  %v9458_v11 = vcombine.high %v1531_v25, %v1535_v63  ;;  %v9460_v48 = vcombine.high %v1532_v58, %v1536_v16 }
 0x2c2   : > { %5639 = vmatprep.subr.bf16.mxu1 %v9420_v2  ;;  %v1539_v2 = vld [vmem:[%s14612_s3 + $0x450] sm:$0xff] }
 0x2c3   : > { %v9465_v12 = vcombine.low %v1539_v2, %v1543_v18 }
 0x2c4   : > { %5514 = vmatpush1.bf16.msra.mxu0 %v9417_v24  ;;  %v9459_v24 = vcombine.low %v1532_v58, %v1536_v16  ;;  %v1579_v16 = vld [vmem:[%s14612_s3 + $0x590] sm:$0xff] }
 0x2c5   : > { %5640 = vmatpush1.bf16.msra.mxu1 %v9419_v19  ;;  %5515 = vmatprep.subr.bf16.mxu0 %v9426_v40  ;;  %v9466_v19 = vcombine.high %v1539_v2, %v1543_v18  ;;  %v9468_v40 = vcombine.high %v1540_v55, %v1544_v46 }
 0x2c6   : > { %5641 = vmatprep.subr.bf16.mxu1 %v9428_v59  ;;  %v1547_v59 = vld [vmem:[%s14612_s3 + $0x490] sm:$0xff] }
 0x2c7   : > { %v9473_v36 = vcombine.low %v1547_v59, %v1551_v35 }
 0x2c8   : > { %5516 = vmatpush1.bf16.msra.mxu0 %v9425_v41  ;;  %v9467_v41 = vcombine.low %v1540_v55, %v1544_v46  ;;  %v1587_v55 = vld [vmem:[%s14612_s3 + $0x5d0] sm:$0xff] }
 0x2c9   : > { %5642 = vmatpush1.bf16.msra.mxu1 %v9427_v33  ;;  %5517 = vmatprep.subr.bf16.mxu0 %v9434_v43  ;;  %v9474_v33 = vcombine.high %v1547_v59, %v1551_v35  ;;  %v1555_v43 = vld [vmem:[%s14612_s3 + $0x4d0] sm:$0xff] }
 0x2ca   : > { %5643 = vmatprep.subr.bf16.mxu1 %v9436_v42  ;;  %v1559_v42 = vld [vmem:[%s14612_s3 + $0x4f0] sm:$0xff] }
 0x2cb   : > { %v9482_v26 = vcombine.high %v1555_v43, %v1559_v42  ;;  %v9481_v32 = vcombine.low %v1555_v43, %v1559_v42  ;;  %v1591_v46 = vld [vmem:[%s14612_s3 + $0x5f0] sm:$0xff] }
 0x2cc   : > { %5518 = vmatpush1.bf16.msra.mxu0 %v9433_v0  ;;  %v1595_v35 = vld [vmem:[%s14612_s3 + $0x610] sm:$0xff] }
 0x2cd   : > { %5644 = vmatpush1.bf16.msra.mxu1 %v9435_v17  ;;  %5519 = vmatprep.subr.bf16.mxu0 %v9442_v8  ;;  %v1563_v17 = vld [vmem:[%s14612_s3 + $0x510] sm:$0xff] }
 0x2ce   : > { %5645 = vmatprep.subr.bf16.mxu1 %v9444_v21  ;;  %v1567_v8 = vld [vmem:[%s14612_s3 + $0x530] sm:$0xff]  ;;  %v1564_v21 = vld [vmem:[%s14612_s3 + $0x518] sm:$0xff] }
 0x2cf   : > { %v9490_v34 = vcombine.high %v1563_v17, %v1567_v8  ;;  %v9491_v25 = vcombine.low %v1564_v21, %v1568_v44  ;;  %v1603_v42 = vld [vmem:[%s14612_s3 + $0x650] sm:$0xff] }
 0x2d0   : > { %5520 = vmatpush1.bf16.msra.mxu0 %v9441_v7  ;;  %v1571_v7 = vld [vmem:[%s14612_s3 + $0x550] sm:$0xff] }
 0x2d1   : > { %5646 = vmatpush1.bf16.msra.mxu1 %v9443_v14  ;;  %5521 = vmatprep.subr.bf16.mxu0 %v9450_v10  ;;  %v1575_v14 = vld [vmem:[%s14612_s3 + $0x570] sm:$0xff]  ;;  %v1572_v10 = vld [vmem:[%s14612_s3 + $0x558] sm:$0xff] }
 0x2d2   : > { %5647 = vmatprep.subr.bf16.mxu1 %v9452_v56  ;;  %v9489_v56 = vcombine.low %v1563_v17, %v1567_v8  ;;  %v9498_v63 = vcombine.high %v1571_v7, %v1575_v14  ;;  %v1611_v8 = vld [vmem:[%s14612_s3 + $0x690] sm:$0xff] }
 0x2d4   : > { %5522 = vmatpush1.bf16.msra.mxu0 %v9449_v61  ;;  %v1583_v61 = vld [vmem:[%s14612_s3 + $0x5b0] sm:$0xff] }
 0x2d5   : > { %5648 = vmatpush1.bf16.msra.mxu1 %v9451_v15  ;;  %5554 = vmatprep.subr.bf16.mxu0 %v9458_v11  ;;  %v1580_v15 = vld [vmem:[%s14612_s3 + $0x598] sm:$0xff]  ;;  %v9506_v18 = vcombine.high %v1579_v16, %v1583_v61 }
 0x2d6   : > { %5680 = vmatprep.subr.bf16.mxu1 %v9460_v48  ;;  %v1584_v11 = vld [vmem:[%s14612_s3 + $0x5b8] sm:$0xff]  ;;  %v9497_v48 = vcombine.low %v1571_v7, %v1575_v14  ;;  %v1619_v14 = vld [vmem:[%s14612_s3 + $0x6d0] sm:$0xff] }
 0x2d7   : > { %5524 = vmatmul.mubr.bf16.vlgmr.msra.gmra.mrb[24].mxu0 %v12663_v60 }
 0x2d8   : > { %5650 = vmatmul.mubr.bf16.vlgmr.msra.gmra.mrb[24].mxu1 %v12663_v60  ;;  %5533 = vmatprep.mubr.bf16.mxu0 %v12665_v57  ;;  %v9476_v60 = vcombine.high %v1548_v50, %v1552_v4  ;;  %v1599_v50 = vld [vmem:[%s14612_s3 + $0x630] sm:$0xff]  ;;  %v1596_v4 = vld [vmem:[%s14612_s3 + $0x618] sm:$0xff] }
 0x2d9   : > { %5555 = vmatpush1.bf16.msra.mxu0 %v9457_v22  ;;  %5659 = vmatprep.mubr.bf16.mxu1 %v12665_v57  ;;  %v1560_v57 = vld [vmem:[%s14612_s3 + $0x4f8] sm:$0xff] }
 0x2da   : > { %5681 = vmatpush1.bf16.msra.mxu1 %v9459_v24  ;;  %5556 = vmatprep.subr.bf16.mxu0 %v9466_v19  ;;  %v9484_v0 = vcombine.high %v1556_v31, %v1560_v57  ;;  %v9483_v47 = vcombine.low %v1556_v31, %v1560_v57  ;;  %v1588_v22 = vld [vmem:[%s14612_s3 + $0x5d8] sm:$0xff]  ;;  %v9505_v24 = vcombine.low %v1579_v16, %v1583_v61  ;;  %v1607_v31 = vld [vmem:[%s14612_s3 + $0x670] sm:$0xff] }
 0x2db   : > { %5682 = vmatprep.subr.bf16.mxu1 %v9468_v40  ;;  %v9507_v19 = vcombine.low %v1580_v15, %v1584_v11  ;;  %v9514_v40 = vcombine.high %v1587_v55, %v1591_v46  ;;  %v1604_v57 = vld [vmem:[%s14612_s3 + $0x658] sm:$0xff]  ;;  %v1627_v61 = vld [vmem:[%s14612_s3 + $0x710] sm:$0xff] }
 0x2dd   : > { %5557 = vmatpush1.bf16.msra.mxu0 %v9465_v12  ;;  %v1600_v12 = vld [vmem:[%s14612_s3 + $0x638] sm:$0xff] }
 0x2de   : > { %5683 = vmatpush1.bf16.msra.mxu1 %v9467_v41  ;;  %5558 = vmatprep.subr.bf16.mxu0 %v9474_v33  ;;  %v9513_v41 = vcombine.low %v1587_v55, %v1591_v46  ;;  %v9524_v43 = vcombine.high %v1596_v4, %v1600_v12  ;;  %v1635_v46 = vld [vmem:[%s14612_s3 + $0x750] sm:$0xff] }
 0x2df   : > { %5534 = vmatmul.mubr.bf16.gmra.mrb[28].mxu0 %v12695_v30  ;;  %5684 = vmatprep.subr.bf16.mxu1 %v9476_v60  ;;  %v9522_v60 = vcombine.high %v1595_v35, %v1599_v50 }
 0x2e0   : > { %5660 = vmatmul.mubr.bf16.gmra.mrb[28].mxu1 %v12695_v30  ;;  %5543 = vmatprep.mubr.bf16.mxu0 %v11875_v27  ;;  %v9492_v30 = vcombine.high %v1564_v21, %v1568_v44  ;;  %v1615_v21 = vld [vmem:[%s14612_s3 + $0x6b0] sm:$0xff]  ;;  %v1612_v44 = vld [vmem:[%s14612_s3 + $0x698] sm:$0xff] }
 0x2e1   : > { %5559 = vmatpush1.bf16.msra.mxu0 %v9473_v36  ;;  %5669 = vmatprep.mubr.bf16.mxu1 %v11875_v27  ;;  %v1576_v27 = vld [vmem:[%s14612_s3 + $0x578] sm:$0xff] }
 0x2e2   : > { %5685 = vmatpush1.bf16.msra.mxu1 %v9475_v9  ;;  %5560 = vmatprep.subr.bf16.mxu0 %v9482_v26  ;;  %v9500_v58 = vcombine.high %v1572_v10, %v1576_v27  ;;  %v9499_v2 = vcombine.low %v1572_v10, %v1576_v27  ;;  %v1608_v36 = vld [vmem:[%s14612_s3 + $0x678] sm:$0xff]  ;;  %v9521_v9 = vcombine.low %v1595_v35, %v1599_v50  ;;  %v1623_v10 = vld [vmem:[%s14612_s3 + $0x6f0] sm:$0xff] }
 0x2e3   : > { %5686 = vmatprep.subr.bf16.mxu1 %v9484_v0  ;;  %v9523_v26 = vcombine.low %v1596_v4, %v1600_v12  ;;  %v9530_v0 = vcombine.high %v1603_v42, %v1607_v31  ;;  %v9532_v17 = vcombine.high %v1604_v57, %v1608_v36  ;;  %v1620_v27 = vld [vmem:[%s14612_s3 + $0x6d8] sm:$0xff]  ;;  %v1643_v50 = vld [vmem:[%s14612_s3 + $0x790] sm:$0xff] }
 0x2e4   : > { %v1647_v4 = vld [vmem:[%s14612_s3 + $0x7b0] sm:$0xff]  ;;  %v1644_v12 = vld [vmem:[%s14612_s3 + $0x798] sm:$0xff] }
 0x2e5   : > { %5561 = vmatpush1.bf16.msra.mxu0 %v9481_v32  ;;  %v1616_v32 = vld [vmem:[%s14612_s3 + $0x6b8] sm:$0xff] }
 0x2e6   : > { %5687 = vmatpush1.bf16.msra.mxu1 %v9483_v47  ;;  %5562 = vmatprep.subr.bf16.mxu0 %v9490_v34  ;;  %v9529_v47 = vcombine.low %v1603_v42, %v1607_v31  ;;  %v9531_v34 = vcombine.low %v1604_v57, %v1608_v36  ;;  %v9540_v7 = vcombine.high %v1612_v44, %v1616_v32  ;;  %v1651_v31 = vld [vmem:[%s14612_s3 + $0x7d0] sm:$0xff]  ;;  %v1652_v36 = vld [vmem:[%s14612_s3 + $0x7d8] sm:$0xff] }
 0x2e7   : > { %5544 = vmatmul.mubr.bf16.gmra.mrb[32].mxu0 %v11890_v38  ;;  %5688 = vmatprep.subr.bf16.mxu1 %v9492_v30  ;;  %v9538_v30 = vcombine.high %v1611_v8, %v1615_v21  ;;  %v1655_v57 = vld [vmem:[%s14612_s3 + $0x7f0] sm:$0xff] }
 0x2e8   : > { %5670 = vmatmul.mubr.bf16.gmra.mrb[32].mxu1 %v11890_v38  ;;  %5586 = vmatprep.mubr.bf16.mxu0 %v12731_v13  ;;  %v9508_v38 = vcombine.high %v1580_v15, %v1584_v11  ;;  %v1631_v15 = vld [vmem:[%s14612_s3 + $0x730] sm:$0xff]  ;;  %v1628_v11 = vld [vmem:[%s14612_s3 + $0x718] sm:$0xff] }
 0x2e9   : > { %5563 = vmatpush1.bf16.msra.mxu0 %v9489_v56  ;;  %5712 = vmatprep.mubr.bf16.mxu1 %v12731_v13  ;;  %v1592_v13 = vld [vmem:[%s14612_s3 + $0x5f8] sm:$0xff] }
 0x2ea   : > { %5689 = vmatpush1.bf16.msra.mxu1 %v9491_v25  ;;  %5564 = vmatprep.subr.bf16.mxu0 %v9498_v63  ;;  %v9516_v59 = vcombine.high %v1588_v22, %v1592_v13  ;;  %v9515_v33 = vcombine.low %v1588_v22, %v1592_v13  ;;  %v1624_v56 = vld [vmem:[%s14612_s3 + $0x6f8] sm:$0xff]  ;;  %v9537_v25 = vcombine.low %v1611_v8, %v1615_v21  ;;  %v1639_v22 = vld [vmem:[%s14612_s3 + $0x770] sm:$0xff]  ;;  %v9587_v21 = vld [vmem:[%s14612_s3 + $0x1000] sm:$0xff] }
 0x2eb   : > { %5690 = vmatprep.subr.bf16.mxu1 %v9500_v58  ;;  %v9539_v63 = vcombine.low %v1612_v44, %v1616_v32  ;;  %v9546_v58 = vcombine.high %v1619_v14, %v1623_v10  ;;  %v9548_v16 = vcombine.high %v1620_v27, %v1624_v56  ;;  %v1636_v13 = vld [vmem:[%s14612_s3 + $0x758] sm:$0xff]  ;;  %v9591_v44 = vld [vmem:[%s14612_s3 + $0x1020] sm:$0xff]  ;;  %v9588_v32 = vld [vmem:[%s14612_s3 + $0x1008] sm:$0xff] }
 0x2ed   : > { %5565 = vmatpush1.bf16.msra.mxu0 %v9497_v48  ;;  %v1632_v48 = vld [vmem:[%s14612_s3 + $0x738] sm:$0xff] }
 0x2ee   : > { %5691 = vmatpush1.bf16.msra.mxu1 %v9499_v2  ;;  %5566 = vmatprep.subr.bf16.mxu0 %v9506_v18  ;;  %v9545_v2 = vcombine.low %v1619_v14, %v1623_v10  ;;  %v9547_v18 = vcombine.low %v1620_v27, %v1624_v56  ;;  %v9556_v55 = vcombine.high %v1628_v11, %v1632_v48  ;;  %v9595_v10 = vld [vmem:[%s14612_s3 + $0x1040] sm:$0xff]  ;;  %v9596_v56 = vld [vmem:[%s14612_s3 + $0x1048] sm:$0xff] }
 0x2ef   : > { %5692 = vmatprep.subr.bf16.mxu1 %v9508_v38  ;;  %v9554_v38 = vcombine.high %v1627_v61, %v1631_v15  ;;  %v9599_v27 = vld [vmem:[%s14612_s3 + $0x1060] sm:$0xff] }
 0x2f1   : > { %5567 = vmatpush1.bf16.msra.mxu0 %v9505_v24  ;;  %v1640_v24 = vld [vmem:[%s14612_s3 + $0x778] sm:$0xff] }
 0x2f2   : > { %5693 = vmatpush1.bf16.msra.mxu1 %v9507_v19  ;;  %5568 = vmatprep.subr.bf16.mxu0 %v9514_v40  ;;  %v9553_v19 = vcombine.low %v1627_v61, %v1631_v15  ;;  %v9555_v40 = vcombine.low %v1628_v11, %v1632_v48  ;;  %v9564_v35 = vcombine.high %v1636_v13, %v1640_v24  ;;  %v9603_v15 = vld [vmem:[%s14612_s3 + $0x1080] sm:$0xff]  ;;  %v9604_v48 = vld [vmem:[%s14612_s3 + $0x1088] sm:$0xff] }
 0x2f3   : > { %5694 = vmatprep.subr.bf16.mxu1 %v9516_v59  ;;  %v9562_v59 = vcombine.high %v1635_v46, %v1639_v22  ;;  %v9607_v11 = vld [vmem:[%s14612_s3 + $0x10a0] sm:$0xff] }
 0x2f5   : > { %5569 = vmatpush1.bf16.msra.mxu0 %v9513_v41  ;;  %v1648_v41 = vld [vmem:[%s14612_s3 + $0x7b8] sm:$0xff] }
 0x2f6   : > { %5695 = vmatpush1.bf16.msra.mxu1 %v9515_v33  ;;  %5570 = vmatprep.subr.bf16.mxu0 %v9522_v60  ;;  %v9561_v33 = vcombine.low %v1635_v46, %v1639_v22  ;;  %v9563_v60 = vcombine.low %v1636_v13, %v1640_v24  ;;  %v9572_v42 = vcombine.high %v1644_v12, %v1648_v41  ;;  %v9611_v46 = vld [vmem:[%s14612_s3 + $0x10c0] sm:$0xff]  ;;  %v9616_v13 = vld [vmem:[%s14612_s3 + $0x10e8] sm:$0xff] }
 0x2f7   : > { %5696 = vmatprep.subr.bf16.mxu1 %v9524_v43  ;;  %v9570_v43 = vcombine.high %v1643_v50, %v1647_v4  ;;  %v9615_v22 = vld [vmem:[%s14612_s3 + $0x10e0] sm:$0xff]  ;;  %v9871_v24 = vcombine.low %v9603_v15, %v9607_v11 }
 0x2f9   : > { %5571 = vmatpush1.bf16.msra.mxu0 %v9521_v9  ;;  %v1656_v9 = vld [vmem:[%s14612_s3 + $0x7f8] sm:$0xff] }
 0x2fa   : > { %5697 = vmatpush1.bf16.msra.mxu1 %v9523_v26  ;;  %5572 = vmatprep.subr.bf16.mxu0 %v9530_v0  ;;  %v9569_v26 = vcombine.low %v1643_v50, %v1647_v4  ;;  %v9571_v0 = vcombine.low %v1644_v12, %v1648_v41  ;;  %v9580_v8 = vcombine.high %v1652_v36, %v1656_v9  ;;  %v5743_v50 = vld [vmem:[#allocation2] sm:$0xee] }
 0x2fb   : > { %5698 = vmatprep.subr.bf16.mxu1 %v9532_v17  ;;  %v9578_v17 = vcombine.high %v1651_v31, %v1655_v57  ;;  %v9619_v12 = vld [vmem:[%s14612_s3 + $0x1100] sm:$0xff] }
 0x2fc   : > { %v9623_v41 = vld [vmem:[%s14612_s3 + $0x1120] sm:$0xff] }
 0x2fd   : > { %5573 = vmatpush1.bf16.msra.mxu0 %v9529_v47  ;;  %v9592_v47 = vld [vmem:[%s14612_s3 + $0x1028] sm:$0xff] }
 0x2fe   : > { %5699 = vmatpush1.bf16.msra.mxu1 %v9531_v34  ;;  %5574 = vmatprep.subr.bf16.mxu0 %v9538_v30  ;;  %v9577_v34 = vcombine.low %v1651_v31, %v1655_v57  ;;  %v9579_v30 = vcombine.low %v1652_v36, %v1656_v9  ;;  %v9858_v14 = vcombine.high %v9588_v32, %v9592_v47  ;;  %v9581_v57 = vrot.slane %v5743_v50, 9 }
 0x2ff   : > { %5700 = vmatprep.subr.bf16.mxu1 %v9540_v7  ;;  %v9856_v7 = vcombine.high %v9587_v21, %v9591_v44  ;;  %v9879_v31 = vcombine.low %v9611_v46, %v9615_v22 }
 0x301   : > { %5575 = vmatpush1.bf16.msra.mxu0 %v9537_v25  ;;  %v9600_v25 = vld [vmem:[%s14612_s3 + $0x1068] sm:$0xff] }
 0x302   : > { %5701 = vmatpush1.bf16.msra.mxu1 %v9539_v63  ;;  %5576 = vmatprep.subr.bf16.mxu0 %v9546_v58  ;;  %v9855_v63 = vcombine.low %v9587_v21, %v9591_v44  ;;  %v9857_v58 = vcombine.low %v9588_v32, %v9592_v47  ;;  %v9866_v61 = vcombine.high %v9596_v56, %v9600_v25  ;;  %v9632_v21 = vld [vmem:[%s14612_s3 + $0x1168] sm:$0xff] }
 0x303   : > { %5702 = vmatprep.subr.bf16.mxu1 %v9548_v16  ;;  %v9864_v16 = vcombine.high %v9595_v10, %v9599_v27  ;;  %v9887_v44 = vcombine.low %v9619_v12, %v9623_v41 }
 0x305   : > { %5577 = vmatpush1.bf16.msra.mxu0 %v9545_v2  ;;  %v9608_v2 = vld [vmem:[%s14612_s3 + $0x10a8] sm:$0xff] }
 0x306   : > { %5703 = vmatpush1.bf16.msra.mxu1 %v9547_v18  ;;  %5578 = vmatprep.subr.bf16.mxu0 %v9554_v38  ;;  %v9863_v18 = vcombine.low %v9595_v10, %v9599_v27  ;;  %v9865_v38 = vcombine.low %v9596_v56, %v9600_v25  ;;  %v9636_v10 = vld [vmem:[%s14612_s3 + $0x1188] sm:$0xff] }
 0x307   : > { %5704 = vmatprep.subr.bf16.mxu1 %v9556_v55  ;;  %v9872_v55 = vcombine.high %v9603_v15, %v9607_v11  ;;  %v9640_v27 = vld [vmem:[%s14612_s3 + $0x11a8] sm:$0xff] }
 0x308   : > { %v9648_v15 = vld [vmem:[%s14612_s3 + $0x11e8] sm:$0xff] }
 0x309   : > { %5579 = vmatpush1.bf16.msra.mxu0 %v9553_v19  ;;  %v10829_v19 = vld [vmem:[#allocation2 + $0x10] sm:$0xff] }
 0x30a   : > { %5705 = vmatpush1.bf16.msra.mxu1 %v9555_v40  ;;  %5580 = vmatprep.subr.bf16.mxu0 %v9562_v59  ;;  %v5766_v40 = vrot.slane %v10829_v19, 5  ;;  %v9873_v59 = vcombine.low %v9604_v48, %v9608_v2  ;;  %v9659_v19 = vld [vmem:[%s14612_s3 + $0x1240] sm:$0xff] }
 0x30b   : > { %5706 = vmatprep.subr.bf16.mxu1 %v9564_v35  ;;  %v9880_v35 = vcombine.high %v9611_v46, %v9615_v22  ;;  %v9656_v46 = vld [vmem:[%s14612_s3 + $0x1228] sm:$0xff] }
 0x30c   : > { %v5772_v36 = vrot.slane %v5766_v40, 4  ;;  %v13355_v32 = vsel %vm11937_vm12, %v9581_v57, %v5766_v40  ;;  %v9663_v40 = vld [vmem:[%s14612_s3 + $0x1260] sm:$0xff] }
 0x30d   : > { %5581 = vmatpush1.bf16.msra.mxu0 %v9561_v33  ;;  %v10830_v33 = vld [vmem:[#allocation2 + $0x20] sm:$0x11] }
 0x30e   : > { %5707 = vmatpush1.bf16.msra.mxu1 %v9563_v60  ;;  %5582 = vmatprep.subr.bf16.mxu0 %v9570_v43  ;;  %v5773_v60 = vrot.slane %v10830_v33, 5  ;;  %v9620_v43 = vld [vmem:[%s14612_s3 + $0x1108] sm:$0xff]  ;;  %v9667_v33 = vld [vmem:[%s14612_s3 + $0x1280] sm:$0xff] }
 0x30f   : > { %5708 = vmatprep.subr.bf16.mxu1 %v9572_v42  ;;  %v9624_v42 = vld [vmem:[%s14612_s3 + $0x1128] sm:$0xff] }
 0x310   : > { %v9889_v47 = vcombine.low %v9620_v43, %v9624_v42 }
 0x311   : > { %5583 = vmatpush1.bf16.msra.mxu0 %v9569_v26  ;;  %v9890_v26 = vcombine.high %v9620_v43, %v9624_v42  ;;  %v9668_v43 = vld [vmem:[%s14612_s3 + $0x1288] sm:$0xff] }
 0x312   : > { %5709 = vmatpush1.bf16.msra.mxu1 %v9571_v0  ;;  %5584 = vmatprep.subr.bf16.mxu0 %v9578_v17  ;;  %v13339_v0 = vsel %vm11937_vm12, %v5772_v36, %v5773_v60  ;;  %v9627_v17 = vld [vmem:[%s14612_s3 + $0x1140] sm:$0xff]  ;;  %v9672_v42 = vld [vmem:[%s14612_s3 + $0x12a8] sm:$0xff] }
 0x313   : > { %5710 = vmatprep.subr.bf16.mxu1 %v9580_v8  ;;  %v9628_v8 = vld [vmem:[%s14612_s3 + $0x1148] sm:$0xff]  ;;  %v9671_v60 = vld [vmem:[%s14612_s3 + $0x12a0] sm:$0xff] }
 0x314   : > { %v9897_v25 = vcombine.low %v9628_v8, %v9632_v21  ;;  %v9936_v36 = vcombine.high %v9667_v33, %v9671_v60 }
 0x315   : > { %5585 = vmatpush1.bf16.msra.mxu0 %v9577_v34  ;;  %v13359_v34 = vcombine.high %v13355_v32, %v13339_v0 }
 0x316   : > { %5711 = vmatpush1.bf16.msra.mxu1 %v9579_v30  ;;  %7391 = vmatprep.subr.bf16.mxu0 %v9856_v7  ;;  %v9898_v7 = vcombine.high %v9628_v8, %v9632_v21  ;;  %v9935_v8 = vcombine.low %v9667_v33, %v9671_v60  ;;  %v9937_v21 = vcombine.low %v9668_v43, %v9672_v42  ;;  %v9716_v33 = vld [vmem:[%s14612_s3 + $0x1408] sm:$0xff] }
 0x317   : > { %7517 = vmatprep.subr.bf16.mxu1 %v9858_v14  ;;  %v9635_v14 = vld [vmem:[%s14612_s3 + $0x1180] sm:$0xff]  ;;  %v9720_v60 = vld [vmem:[%s14612_s3 + $0x1428] sm:$0xff] }
 0x318   : > { %5587 = vmatmul.mubr.bf16.vlgmr.msra.gmra.mrb[24].mxu0 %v12883_v6  ;;  %v9903_v11 = vcombine.low %v9635_v14, %v9639_v49 }
 0x319   : > { %5713 = vmatmul.mubr.bf16.vlgmr.msra.gmra.mrb[24].mxu1 %v12883_v6  ;;  %5596 = vmatprep.mubr.bf16.mxu0 %v11906_v20  ;;  %v9874_v6 = vcombine.high %v9604_v48, %v9608_v2  ;;  %v9905_v48 = vcombine.low %v9636_v10, %v9640_v27 }
 0x31a   : > { %5722 = vmatprep.mubr.bf16.mxu1 %v11906_v20  ;;  %7392 = vmatpush1.bf16.msra.mxu0 %v9855_v63  ;;  %v9612_v20 = vld [vmem:[%s14612_s3 + $0x10c8] sm:$0xff]  ;;  %v9904_v63 = vcombine.high %v9635_v14, %v9639_v49 }
 0x31b   : > { %7518 = vmatpush1.bf16.msra.mxu1 %v9857_v58  ;;  %7393 = vmatprep.subr.bf16.mxu0 %v9864_v16  ;;  %v9882_v4 = vcombine.high %v9612_v20, %v9616_v13  ;;  %v9881_v9 = vcombine.low %v9612_v20, %v9616_v13  ;;  %v9643_v58 = vld [vmem:[%s14612_s3 + $0x11c0] sm:$0xff]  ;;  %v9684_v14 = vld [vmem:[%s14612_s3 + $0x1308] sm:$0xff] }
 0x31c   : > { %7519 = vmatprep.subr.bf16.mxu1 %v9866_v61  ;;  %v9647_v16 = vld [vmem:[%s14612_s3 + $0x11e0] sm:$0xff]  ;;  %v9644_v61 = vld [vmem:[%s14612_s3 + $0x11c8] sm:$0xff] }
 0x31d   : > { %v9912_v2 = vcombine.high %v9643_v58, %v9647_v16  ;;  %v9911_v22 = vcombine.low %v9643_v58, %v9647_v16  ;;  %v9913_v20 = vcombine.low %v9644_v61, %v9648_v15  ;;  %v9688_v49 = vld [vmem:[%s14612_s3 + $0x1328] sm:$0xff] }
 0x31e   : > { %7394 = vmatpush1.bf16.msra.mxu0 %v9863_v18  ;;  %v9914_v18 = vcombine.high %v9644_v61, %v9648_v15  ;;  %v9692_v58 = vld [vmem:[%s14612_s3 + $0x1348] sm:$0xff]  ;;  %v9953_v15 = vcombine.low %v9684_v14, %v9688_v49 }
 0x31f   : > { %7520 = vmatpush1.bf16.msra.mxu1 %v9865_v38  ;;  %7395 = vmatprep.subr.bf16.mxu0 %v9872_v55  ;;  %v9651_v38 = vld [vmem:[%s14612_s3 + $0x1200] sm:$0xff]  ;;  %v9696_v16 = vld [vmem:[%s14612_s3 + $0x1368] sm:$0xff] }
 0x320   : > { %5597 = vmatmul.mubr.bf16.gmra.mrb[28].mxu0 %v11912_v52  ;;  %7521 = vmatprep.subr.bf16.mxu1 %v9874_v6  ;;  %v9655_v55 = vld [vmem:[%s14612_s3 + $0x1220] sm:$0xff]  ;;  %v9652_v6 = vld [vmem:[%s14612_s3 + $0x1208] sm:$0xff] }
 0x321   : > { %5723 = vmatmul.mubr.bf16.gmra.mrb[28].mxu1 %v11912_v52  ;;  %5606 = vmatprep.mubr.bf16.mxu0 %v11916_v53  ;;  %v9888_v52 = vcombine.high %v9619_v12, %v9623_v41  ;;  %v9920_v13 = vcombine.high %v9651_v38, %v9655_v55  ;;  %v9919_v50 = vcombine.low %v9651_v38, %v9655_v55  ;;  %v9700_v38 = vld [vmem:[%s14612_s3 + $0x1388] sm:$0xff] }
 0x322   : > { %5732 = vmatprep.mubr.bf16.mxu1 %v11916_v53  ;;  %7396 = vmatpush1.bf16.msra.mxu0 %v9871_v24  ;;  %v9631_v53 = vld [vmem:[%s14612_s3 + $0x1160] sm:$0xff]  ;;  %v9922_v24 = vcombine.high %v9652_v6, %v9656_v46  ;;  %v9928_v12 = vcombine.high %v9659_v19, %v9663_v40  ;;  %v9704_v55 = vld [vmem:[%s14612_s3 + $0x13a8] sm:$0xff] }
 0x323   : > { %7522 = vmatpush1.bf16.msra.mxu1 %v9873_v59  ;;  %7397 = vmatprep.subr.bf16.mxu0 %v9880_v35  ;;  %v9896_v30 = vcombine.high %v9627_v17, %v9631_v53  ;;  %v9895_v56 = vcombine.low %v9627_v17, %v9631_v53  ;;  %v9660_v59 = vld [vmem:[%s14612_s3 + $0x1248] sm:$0xff] }
 0x324   : > { %7523 = vmatprep.subr.bf16.mxu1 %v9882_v4  ;;  %v9664_v35 = vld [vmem:[%s14612_s3 + $0x1268] sm:$0xff]  ;;  %v9921_v4 = vcombine.low %v9652_v6, %v9656_v46  ;;  %v9961_v46 = vcombine.low %v9692_v58, %v9696_v16 }
 0x325   : > { %v9930_v41 = vcombine.high %v9660_v59, %v9664_v35  ;;  %v9929_v57 = vcombine.low %v9660_v59, %v9664_v35  ;;  %v9676_v17 = vld [vmem:[%s14612_s3 + $0x12c8] sm:$0xff]  ;;  %v9969_v35 = vcombine.low %v9700_v38, %v9704_v55 }
 0x326   : > { %7398 = vmatpush1.bf16.msra.mxu0 %v9879_v31  ;;  %v9927_v31 = vcombine.low %v9659_v19, %v9663_v40  ;;  %v9680_v53 = vld [vmem:[%s14612_s3 + $0x12e8] sm:$0xff] }
 0x327   : > { %7524 = vmatpush1.bf16.msra.mxu1 %v9881_v9  ;;  %7399 = vmatprep.subr.bf16.mxu0 %v9888_v52  ;;  %v9938_v9 = vcombine.high %v9668_v43, %v9672_v42  ;;  %v9675_v52 = vld [vmem:[%s14612_s3 + $0x12c0] sm:$0xff]  ;;  %v9708_v19 = vld [vmem:[%s14612_s3 + $0x13c8] sm:$0xff] }
 0x328   : > { %5607 = vmatmul.mubr.bf16.gmra.mrb[32].mxu0 %v11920_v28  ;;  %7525 = vmatprep.subr.bf16.mxu1 %v9890_v26  ;;  %v9679_v26 = vld [vmem:[%s14612_s3 + $0x12e0] sm:$0xff]  ;;  %v9712_v40 = vld [vmem:[%s14612_s3 + $0x13e8] sm:$0xff] }
 0x329   : > { %5733 = vmatmul.mubr.bf16.gmra.mrb[32].mxu1 %v11920_v28  ;;  %7423 = vmatprep.mubr.bf16.mxu0 %v13359_v34  ;;  %v9906_v28 = vcombine.high %v9636_v10, %v9640_v27  ;;  %v9943_v10 = vcombine.low %v9675_v52, %v9679_v26  ;;  %v9945_v27 = vcombine.low %v9676_v17, %v9680_v53 }
 0x32a   : > { %7400 = vmatpush1.bf16.msra.mxu0 %v9887_v44  ;;  %7549 = vmatprep.mubr.bf16.mxu1 %v13359_v34  ;;  %v9944_v44 = vcombine.high %v9675_v52, %v9679_v26  ;;  %v9977_v42 = vcombine.low %v9708_v19, %v9712_v40  ;;  %v9724_v52 = vld [vmem:[%s14612_s3 + $0x1448] sm:$0xff] }
 0x32b   : > { %7526 = vmatpush1.bf16.msra.mxu1 %v9889_v47  ;;  %7401 = vmatprep.subr.bf16.mxu0 %v9896_v30  ;;  %v9946_v47 = vcombine.high %v9676_v17, %v9680_v53  ;;  %v9683_v30 = vld [vmem:[%s14612_s3 + $0x1300] sm:$0xff]  ;;  %v9728_v26 = vld [vmem:[%s14612_s3 + $0x1468] sm:$0xff]  ;;  %v13511_v17 = vcombine.low %v13355_v32, %v13339_v0 }
 0x32c   : > { %7527 = vmatprep.subr.bf16.mxu1 %v9898_v7  ;;  %v9687_v7 = vld [vmem:[%s14612_s3 + $0x1320] sm:$0xff]  ;;  %v9732_v0 = vld [vmem:[%s14612_s3 + $0x1488] sm:$0xff] }
 0x32d   : > { %v9951_v61 = vcombine.low %v9683_v30, %v9687_v7  ;;  %v9736_v32 = vld [vmem:[%s14612_s3 + $0x14a8] sm:$0xff] }
 0x32e   : > { %7402 = vmatpush1.bf16.msra.mxu0 %v9895_v56  ;;  %v9952_v56 = vcombine.high %v9683_v30, %v9687_v7  ;;  %v9735_v30 = vld [vmem:[%s14612_s3 + $0x14a0] sm:$0xff] }
 0x32f   : > { %7528 = vmatpush1.bf16.msra.mxu1 %v9897_v25  ;;  %7403 = vmatprep.subr.bf16.mxu0 %v9904_v63  ;;  %v9954_v25 = vcombine.high %v9684_v14, %v9688_v49  ;;  %v9691_v63 = vld [vmem:[%s14612_s3 + $0x1340] sm:$0xff]  ;;  %v9993_v14 = vcombine.low %v9724_v52, %v9728_v26 }
 0x330   : > { %7529 = vmatprep.subr.bf16.mxu1 %v9906_v28  ;;  %v9695_v28 = vld [vmem:[%s14612_s3 + $0x1360] sm:$0xff] }
 0x331   : > { %v9959_v6 = vcombine.low %v9691_v63, %v9695_v28 }
 0x332   : > { %7404 = vmatpush1.bf16.msra.mxu0 %v9903_v11  ;;  %v9960_v11 = vcombine.high %v9691_v63, %v9695_v28  ;;  %v9744_v63 = vld [vmem:[%s14612_s3 + $0x14e8] sm:$0xff] }
 0x333   : > { %7530 = vmatpush1.bf16.msra.mxu1 %v9905_v48  ;;  %7405 = vmatprep.subr.bf16.mxu0 %v9912_v2  ;;  %v9962_v48 = vcombine.high %v9692_v58, %v9696_v16  ;;  %v9699_v2 = vld [vmem:[%s14612_s3 + $0x1380] sm:$0xff]  ;;  %v10001_v58 = vcombine.low %v9732_v0, %v9736_v32 }
 0x334   : > { %7531 = vmatprep.subr.bf16.mxu1 %v9914_v18  ;;  %v9703_v18 = vld [vmem:[%s14612_s3 + $0x13a0] sm:$0xff] }
 0x335   : > { %v9967_v59 = vcombine.low %v9699_v2, %v9703_v18 }
 0x336   : > { %7406 = vmatpush1.bf16.msra.mxu0 %v9911_v22  ;;  %v9968_v22 = vcombine.high %v9699_v2, %v9703_v18  ;;  %v9752_v2 = vld [vmem:[%s14612_s3 + $0x1528] sm:$0xff] }
 0x337   : > { %7532 = vmatpush1.bf16.msra.mxu1 %v9913_v20  ;;  %7407 = vmatprep.subr.bf16.mxu0 %v9920_v13  ;;  %v9970_v20 = vcombine.high %v9700_v38, %v9704_v55  ;;  %v9707_v13 = vld [vmem:[%s14612_s3 + $0x13c0] sm:$0xff] }
 0x338   : > { %7533 = vmatprep.subr.bf16.mxu1 %v9922_v24  ;;  %v9711_v24 = vld [vmem:[%s14612_s3 + $0x13e0] sm:$0xff] }
 0x339   : > { %v9975_v43 = vcombine.low %v9707_v13, %v9711_v24 }
 0x33a   : > { %7408 = vmatpush1.bf16.msra.mxu0 %v9919_v50  ;;  %v9976_v50 = vcombine.high %v9707_v13, %v9711_v24  ;;  %v9760_v13 = vld [vmem:[%s14612_s3 + $0x1568] sm:$0xff] }
 0x33b   : > { %7534 = vmatpush1.bf16.msra.mxu1 %v9921_v4  ;;  %7409 = vmatprep.subr.bf16.mxu0 %v9928_v12  ;;  %v9978_v4 = vcombine.high %v9708_v19, %v9712_v40  ;;  %v9715_v12 = vld [vmem:[%s14612_s3 + $0x1400] sm:$0xff] }
 0x33c   : > { %7535 = vmatprep.subr.bf16.mxu1 %v9930_v41  ;;  %v9719_v41 = vld [vmem:[%s14612_s3 + $0x1420] sm:$0xff] }
 0x33d   : > { %v9983_v53 = vcombine.low %v9715_v12, %v9719_v41 }
 0x33e   : > { %7410 = vmatpush1.bf16.msra.mxu0 %v9927_v31  ;;  %v9984_v31 = vcombine.high %v9715_v12, %v9719_v41  ;;  %v9768_v12 = vld [vmem:[%s14612_s3 + $0x15a8] sm:$0xff] }
 0x33f   : > { %7536 = vmatpush1.bf16.msra.mxu1 %v9929_v57  ;;  %7411 = vmatprep.subr.bf16.mxu0 %v9936_v36  ;;  %v9986_v57 = vcombine.high %v9716_v33, %v9720_v60  ;;  %v9723_v36 = vld [vmem:[%s14612_s3 + $0x1440] sm:$0xff] }
 0x340   : > { %7537 = vmatprep.subr.bf16.mxu1 %v9938_v9  ;;  %v9727_v9 = vld [vmem:[%s14612_s3 + $0x1460] sm:$0xff] }
 0x341   : > { %v9991_v7 = vcombine.low %v9723_v36, %v9727_v9 }
 0x342   : > { %7412 = vmatpush1.bf16.msra.mxu0 %v9935_v8  ;;  %v9985_v8 = vcombine.low %v9716_v33, %v9720_v60 }
 0x343   : > { %7538 = vmatpush1.bf16.msra.mxu1 %v9937_v21  ;;  %7413 = vmatprep.subr.bf16.mxu0 %v9944_v44  ;;  %v9992_v21 = vcombine.high %v9723_v36, %v9727_v9  ;;  %v9994_v44 = vcombine.high %v9724_v52, %v9728_v26  ;;  %v9776_v36 = vld [vmem:[%s14612_s3 + $0x15e8] sm:$0xff] }
 0x344   : > { %7539 = vmatprep.subr.bf16.mxu1 %v9946_v47  ;;  %v9731_v47 = vld [vmem:[%s14612_s3 + $0x1480] sm:$0xff] }
 0x345   : > { %v10000_v49 = vcombine.high %v9731_v47, %v9735_v30  ;;  %v9999_v28 = vcombine.low %v9731_v47, %v9735_v30  ;;  %v9784_v47 = vld [vmem:[%s14612_s3 + $0x1628] sm:$0xff] }
 0x346   : > { %7414 = vmatpush1.bf16.msra.mxu0 %v9943_v10  ;;  %v10002_v10 = vcombine.high %v9732_v0, %v9736_v32 }
 0x347   : > { %7540 = vmatpush1.bf16.msra.mxu1 %v9945_v27  ;;  %7415 = vmatprep.subr.bf16.mxu0 %v9952_v56  ;;  %v9739_v27 = vld [vmem:[%s14612_s3 + $0x14c0] sm:$0xff] }
 0x348   : > { %7541 = vmatprep.subr.bf16.mxu1 %v9954_v25  ;;  %v9743_v56 = vld [vmem:[%s14612_s3 + $0x14e0] sm:$0xff]  ;;  %v9740_v25 = vld [vmem:[%s14612_s3 + $0x14c8] sm:$0xff] }
 0x349   : > { %v10008_v16 = vcombine.high %v9739_v27, %v9743_v56  ;;  %v10007_v18 = vcombine.low %v9739_v27, %v9743_v56  ;;  %v10009_v38 = vcombine.low %v9740_v25, %v9744_v63  ;;  %v9792_v27 = vld [vmem:[%s14612_s3 + $0x1668] sm:$0xff] }
 0x34a   : > { %7416 = vmatpush1.bf16.msra.mxu0 %v9951_v61  ;;  %v10010_v61 = vcombine.high %v9740_v25, %v9744_v63 }
 0x34b   : > { %7542 = vmatpush1.bf16.msra.mxu1 %v9953_v15  ;;  %7417 = vmatprep.subr.bf16.mxu0 %v9960_v11  ;;  %v9747_v15 = vld [vmem:[%s14612_s3 + $0x1500] sm:$0xff] }
 0x34c   : > { %7543 = vmatprep.subr.bf16.mxu1 %v9962_v48  ;;  %v9751_v11 = vld [vmem:[%s14612_s3 + $0x1520] sm:$0xff]  ;;  %v9748_v48 = vld [vmem:[%s14612_s3 + $0x1508] sm:$0xff] }
 0x34d   : > { %v10016_v55 = vcombine.high %v9747_v15, %v9751_v11  ;;  %v10015_v24 = vcombine.low %v9747_v15, %v9751_v11  ;;  %v10017_v19 = vcombine.low %v9748_v48, %v9752_v2  ;;  %v9800_v15 = vld [vmem:[%s14612_s3 + $0x16a8] sm:$0xff] }
 0x34e   : > { %7418 = vmatpush1.bf16.msra.mxu0 %v9959_v6  ;;  %v10018_v6 = vcombine.high %v9748_v48, %v9752_v2 }
 0x34f   : > { %7544 = vmatpush1.bf16.msra.mxu1 %v9961_v46  ;;  %7419 = vmatprep.subr.bf16.mxu0 %v9968_v22  ;;  %v9755_v46 = vld [vmem:[%s14612_s3 + $0x1540] sm:$0xff] }
 0x350   : > { %7545 = vmatprep.subr.bf16.mxu1 %v9970_v20  ;;  %v9759_v22 = vld [vmem:[%s14612_s3 + $0x1560] sm:$0xff]  ;;  %v9756_v20 = vld [vmem:[%s14612_s3 + $0x1548] sm:$0xff] }
 0x351   : > { %v10024_v40 = vcombine.high %v9755_v46, %v9759_v22  ;;  %v10023_v41 = vcombine.low %v9755_v46, %v9759_v22  ;;  %v10025_v33 = vcombine.low %v9756_v20, %v9760_v13  ;;  %v9808_v46 = vld [vmem:[%s14612_s3 + $0x16e8] sm:$0xff] }
 0x352   : > { %7420 = vmatpush1.bf16.msra.mxu0 %v9967_v59  ;;  %v10026_v59 = vcombine.high %v9756_v20, %v9760_v13 }
 0x353   : > { %7546 = vmatpush1.bf16.msra.mxu1 %v9969_v35  ;;  %7421 = vmatprep.subr.bf16.mxu0 %v9976_v50  ;;  %v9763_v35 = vld [vmem:[%s14612_s3 + $0x1580] sm:$0xff] }
 0x354   : > { %7547 = vmatprep.subr.bf16.mxu1 %v9978_v4  ;;  %v9767_v50 = vld [vmem:[%s14612_s3 + $0x15a0] sm:$0xff]  ;;  %v9764_v4 = vld [vmem:[%s14612_s3 + $0x1588] sm:$0xff] }
 0x355   : > { %v10032_v60 = vcombine.high %v9763_v35, %v9767_v50  ;;  %v10031_v9 = vcombine.low %v9763_v35, %v9767_v50  ;;  %v10033_v52 = vcombine.low %v9764_v4, %v9768_v12  ;;  %v9816_v35 = vld [vmem:[%s14612_s3 + $0x1728] sm:$0xff] }
 0x356   : > { %7422 = vmatpush1.bf16.msra.mxu0 %v9975_v43  ;;  %v10034_v43 = vcombine.high %v9764_v4, %v9768_v12 }
 0x357   : > { %7548 = vmatpush1.bf16.msra.mxu1 %v9977_v42  ;;  %7454 = vmatprep.subr.bf16.mxu0 %v9984_v31  ;;  %v9771_v42 = vld [vmem:[%s14612_s3 + $0x15c0] sm:$0xff] }
 0x358   : > { %7580 = vmatprep.subr.bf16.mxu1 %v9986_v57  ;;  %v9775_v31 = vld [vmem:[%s14612_s3 + $0x15e0] sm:$0xff]  ;;  %v9772_v57 = vld [vmem:[%s14612_s3 + $0x15c8] sm:$0xff] }
 0x359   : > { %7424 = vmatmul.mubr.bf16.vlgmr.msra.gmra.mrb[12].mxu0 %v13511_v17  ;;  %v10040_v26 = vcombine.high %v9771_v42, %v9775_v31  ;;  %v10039_v30 = vcombine.low %v9771_v42, %v9775_v31  ;;  %v10041_v0 = vcombine.low %v9772_v57, %v9776_v36  ;;  %v9824_v42 = vld [vmem:[%s14612_s3 + $0x1768] sm:$0xff] }
 0x35a   : > { %7550 = vmatmul.mubr.bf16.vlgmr.msra.gmra.mrb[12].mxu1 %v13511_v17  ;;  %7433 = vmatprep.mubr.bf16.mxu0 %v11957_v23 }
 0x35b   : > { %7455 = vmatpush1.bf16.msra.mxu0 %v9983_v53  ;;  %7559 = vmatprep.mubr.bf16.mxu1 %v11957_v23  ;;  %v10042_v53 = vcombine.high %v9772_v57, %v9776_v36 }
 0x35c   : > { %7581 = vmatpush1.bf16.msra.mxu1 %v9985_v8  ;;  %7456 = vmatprep.subr.bf16.mxu0 %v9992_v21  ;;  %v9779_v8 = vld [vmem:[%s14612_s3 + $0x1600] sm:$0xff] }
 0x35d   : > { %7582 = vmatprep.subr.bf16.mxu1 %v9994_v44  ;;  %v9783_v21 = vld [vmem:[%s14612_s3 + $0x1620] sm:$0xff]  ;;  %v9780_v44 = vld [vmem:[%s14612_s3 + $0x1608] sm:$0xff] }
 0x35e   : > { %v10048_v32 = vcombine.high %v9779_v8, %v9783_v21  ;;  %v10047_v56 = vcombine.low %v9779_v8, %v9783_v21  ;;  %v10049_v25 = vcombine.low %v9780_v44, %v9784_v47  ;;  %v9832_v8 = vld [vmem:[%s14612_s3 + $0x17a8] sm:$0xff] }
 0x35f   : > { %7457 = vmatpush1.bf16.msra.mxu0 %v9991_v7  ;;  %v10050_v7 = vcombine.high %v9780_v44, %v9784_v47 }
 0x360   : > { %7583 = vmatpush1.bf16.msra.mxu1 %v9993_v14  ;;  %7458 = vmatprep.subr.bf16.mxu0 %v10000_v49  ;;  %v9787_v14 = vld [vmem:[%s14612_s3 + $0x1640] sm:$0xff] }
 0x361   : > { %7434 = vmatmul.mubr.bf16.gmra.mrb[16].mxu0 %v11959_v62  ;;  %7584 = vmatprep.subr.bf16.mxu1 %v10002_v10  ;;  %v9791_v49 = vld [vmem:[%s14612_s3 + $0x1660] sm:$0xff]  ;;  %v9788_v10 = vld [vmem:[%s14612_s3 + $0x1648] sm:$0xff] }
 0x362   : > { %7560 = vmatmul.mubr.bf16.gmra.mrb[16].mxu1 %v11959_v62  ;;  %7443 = vmatprep.mubr.bf16.mxu0 %v11969_v37  ;;  %v10056_v63 = vcombine.high %v9787_v14, %v9791_v49  ;;  %v10055_v11 = vcombine.low %v9787_v14, %v9791_v49  ;;  %v10057_v48 = vcombine.low %v9788_v10, %v9792_v27  ;;  %v9840_v14 = vld [vmem:[%s14612_s3 + $0x17e8] sm:$0xff] }
 0x363   : > { %7459 = vmatpush1.bf16.msra.mxu0 %v9999_v28  ;;  %7569 = vmatprep.mubr.bf16.mxu1 %v11969_v37  ;;  %v10058_v28 = vcombine.high %v9788_v10, %v9792_v27 }
 0x364   : > { %7585 = vmatpush1.bf16.msra.mxu1 %v10001_v58  ;;  %7460 = vmatprep.subr.bf16.mxu0 %v10008_v16  ;;  %v9795_v58 = vld [vmem:[%s14612_s3 + $0x1680] sm:$0xff] }
 0x365   : > { %7586 = vmatprep.subr.bf16.mxu1 %v10010_v61  ;;  %v9799_v16 = vld [vmem:[%s14612_s3 + $0x16a0] sm:$0xff]  ;;  %v9796_v61 = vld [vmem:[%s14612_s3 + $0x1688] sm:$0xff] }
 0x366   : > { %v10064_v2 = vcombine.high %v9795_v58, %v9799_v16  ;;  %v10063_v22 = vcombine.low %v9795_v58, %v9799_v16  ;;  %v10065_v20 = vcombine.low %v9796_v61, %v9800_v15  ;;  %v9594_v58 = vld [vmem:[%s14612_s3 + $0x1038] sm:$0xff] }
 0x367   : > { %7461 = vmatpush1.bf16.msra.mxu0 %v10007_v18  ;;  %v10066_v18 = vcombine.high %v9796_v61, %v9800_v15 }
 0x368   : > { %7587 = vmatpush1.bf16.msra.mxu1 %v10009_v38  ;;  %7462 = vmatprep.subr.bf16.mxu0 %v10016_v55  ;;  %v9803_v38 = vld [vmem:[%s14612_s3 + $0x16c0] sm:$0xff] }
 0x369   : > { %7444 = vmatmul.mubr.bf16.gmra.mrb[20].mxu0 %v11971_v51  ;;  %7588 = vmatprep.subr.bf16.mxu1 %v10018_v6  ;;  %v9807_v55 = vld [vmem:[%s14612_s3 + $0x16e0] sm:$0xff]  ;;  %v9804_v6 = vld [vmem:[%s14612_s3 + $0x16c8] sm:$0xff] }
 0x36a   : > { %7570 = vmatmul.mubr.bf16.gmra.mrb[20].mxu1 %v11971_v51  ;;  %7486 = vmatprep.mubr.bf16.mxu0 %v11991_v1  ;;  %v10072_v13 = vcombine.high %v9803_v38, %v9807_v55  ;;  %v10071_v50 = vcombine.low %v9803_v38, %v9807_v55  ;;  %v10073_v4 = vcombine.low %v9804_v6, %v9808_v46  ;;  %v9602_v38 = vld [vmem:[%s14612_s3 + $0x1078] sm:$0xff] }
 0x36b   : > { %7463 = vmatpush1.bf16.msra.mxu0 %v10015_v24  ;;  %7612 = vmatprep.mubr.bf16.mxu1 %v11991_v1  ;;  %v10074_v24 = vcombine.high %v9804_v6, %v9808_v46 }
 0x36c   : > { %7589 = vmatpush1.bf16.msra.mxu1 %v10017_v19  ;;  %7464 = vmatprep.subr.bf16.mxu0 %v10024_v40  ;;  %v9811_v19 = vld [vmem:[%s14612_s3 + $0x1700] sm:$0xff] }
 0x36d   : > { %7590 = vmatprep.subr.bf16.mxu1 %v10026_v59  ;;  %v9815_v40 = vld [vmem:[%s14612_s3 + $0x1720] sm:$0xff]  ;;  %v9812_v59 = vld [vmem:[%s14612_s3 + $0x1708] sm:$0xff] }
 0x36e   : > { %v10080_v12 = vcombine.high %v9811_v19, %v9815_v40  ;;  %v10079_v31 = vcombine.low %v9811_v19, %v9815_v40  ;;  %v10081_v57 = vcombine.low %v9812_v59, %v9816_v35  ;;  %v9610_v19 = vld [vmem:[%s14612_s3 + $0x10b8] sm:$0xff] }
 0x36f   : > { %7465 = vmatpush1.bf16.msra.mxu0 %v10023_v41  ;;  %v10082_v41 = vcombine.high %v9812_v59, %v9816_v35 }
 0x370   : > { %7591 = vmatpush1.bf16.msra.mxu1 %v10025_v33  ;;  %7466 = vmatprep.subr.bf16.mxu0 %v10032_v60  ;;  %v9819_v33 = vld [vmem:[%s14612_s3 + $0x1740] sm:$0xff] }
 0x371   : > { %7592 = vmatprep.subr.bf16.mxu1 %v10034_v43  ;;  %v9823_v60 = vld [vmem:[%s14612_s3 + $0x1760] sm:$0xff]  ;;  %v9820_v43 = vld [vmem:[%s14612_s3 + $0x1748] sm:$0xff] }
 0x372   : > { %v10088_v36 = vcombine.high %v9819_v33, %v9823_v60  ;;  %v10087_v21 = vcombine.low %v9819_v33, %v9823_v60  ;;  %v10089_v44 = vcombine.low %v9820_v43, %v9824_v42  ;;  %v9618_v33 = vld [vmem:[%s14612_s3 + $0x10f8] sm:$0xff] }
 0x373   : > { %7467 = vmatpush1.bf16.msra.mxu0 %v10031_v9  ;;  %v10090_v9 = vcombine.high %v9820_v43, %v9824_v42 }
 0x374   : > { %7593 = vmatpush1.bf16.msra.mxu1 %v10033_v52  ;;  %7468 = vmatprep.subr.bf16.mxu0 %v10040_v26  ;;  %v9827_v52 = vld [vmem:[%s14612_s3 + $0x1780] sm:$0xff] }
 0x375   : > { %7594 = vmatprep.subr.bf16.mxu1 %v10042_v53  ;;  %v9831_v26 = vld [vmem:[%s14612_s3 + $0x17a0] sm:$0xff]  ;;  %v9828_v53 = vld [vmem:[%s14612_s3 + $0x1788] sm:$0xff] }
 0x376   : > { %v10096_v47 = vcombine.high %v9827_v52, %v9831_v26  ;;  %v10095_v49 = vcombine.low %v9827_v52, %v9831_v26  ;;  %v10097_v10 = vcombine.low %v9828_v53, %v9832_v8  ;;  %v9626_v52 = vld [vmem:[%s14612_s3 + $0x1138] sm:$0xff] }
 0x377   : > { %7469 = vmatpush1.bf16.msra.mxu0 %v10039_v30  ;;  %v10098_v30 = vcombine.high %v9828_v53, %v9832_v8 }
 0x378   : > { %7595 = vmatpush1.bf16.msra.mxu1 %v10041_v0  ;;  %7470 = vmatprep.subr.bf16.mxu0 %v10048_v32  ;;  %v9835_v0 = vld [vmem:[%s14612_s3 + $0x17c0] sm:$0xff] }
 0x379   : > { %7596 = vmatprep.subr.bf16.mxu1 %v10050_v7  ;;  %v9839_v32 = vld [vmem:[%s14612_s3 + $0x17e0] sm:$0xff]  ;;  %v9836_v7 = vld [vmem:[%s14612_s3 + $0x17c8] sm:$0xff] }
 0x37a   : > { %v10104_v27 = vcombine.high %v9835_v0, %v9839_v32  ;;  %v10103_v16 = vcombine.low %v9835_v0, %v9839_v32  ;;  %v10105_v61 = vcombine.low %v9836_v7, %v9840_v14  ;;  %v9634_v0 = vld [vmem:[%s14612_s3 + $0x1178] sm:$0xff] }
 0x37b   : > { %7471 = vmatpush1.bf16.msra.mxu0 %v10047_v56  ;;  %v10106_v56 = vcombine.high %v9836_v7, %v9840_v14 }
 0x37c   : > { %7597 = vmatpush1.bf16.msra.mxu1 %v10049_v25  ;;  %7472 = vmatprep.subr.bf16.mxu0 %v10056_v63  ;;  %v9589_v25 = vld [vmem:[%s14612_s3 + $0x1010] sm:$0xff] }
 0x37d   : > { %7598 = vmatprep.subr.bf16.mxu1 %v10058_v28  ;;  %v9593_v63 = vld [vmem:[%s14612_s3 + $0x1030] sm:$0xff]  ;;  %v9590_v28 = vld [vmem:[%s14612_s3 + $0x1018] sm:$0xff] }
 0x37e   : > { %v9860_v15 = vcombine.high %v9589_v25, %v9593_v63  ;;  %v9859_v55 = vcombine.low %v9589_v25, %v9593_v63  ;;  %v9861_v6 = vcombine.low %v9590_v28, %v9594_v58  ;;  %v9642_v25 = vld [vmem:[%s14612_s3 + $0x11b8] sm:$0xff] }
 0x37f   : > { %7473 = vmatpush1.bf16.msra.mxu0 %v10055_v11  ;;  %v9862_v11 = vcombine.high %v9590_v28, %v9594_v58 }
 0x380   : > { %7599 = vmatpush1.bf16.msra.mxu1 %v10057_v48  ;;  %7474 = vmatprep.subr.bf16.mxu0 %v10064_v2  ;;  %v9597_v48 = vld [vmem:[%s14612_s3 + $0x1050] sm:$0xff] }
 0x381   : > { %7600 = vmatprep.subr.bf16.mxu1 %v10066_v18  ;;  %v9601_v2 = vld [vmem:[%s14612_s3 + $0x1070] sm:$0xff]  ;;  %v9598_v18 = vld [vmem:[%s14612_s3 + $0x1058] sm:$0xff] }
 0x382   : > { %v9868_v46 = vcombine.high %v9597_v48, %v9601_v2  ;;  %v9867_v40 = vcombine.low %v9597_v48, %v9601_v2  ;;  %v9869_v59 = vcombine.low %v9598_v18, %v9602_v38 }
 0x383   : > { %7475 = vmatpush1.bf16.msra.mxu0 %v10063_v22  ;;  %v9870_v22 = vcombine.high %v9598_v18, %v9602_v38 }
 0x384   : > { %7601 = vmatpush1.bf16.msra.mxu1 %v10065_v20  ;;  %7476 = vmatprep.subr.bf16.mxu0 %v10072_v13  ;;  %v9605_v20 = vld [vmem:[%s14612_s3 + $0x1090] sm:$0xff] }
 0x385   : > { %7602 = vmatprep.subr.bf16.mxu1 %v10074_v24  ;;  %v9609_v13 = vld [vmem:[%s14612_s3 + $0x10b0] sm:$0xff]  ;;  %v9606_v24 = vld [vmem:[%s14612_s3 + $0x1098] sm:$0xff] }
 0x386   : > { %v9876_v35 = vcombine.high %v9605_v20, %v9609_v13  ;;  %v9875_v60 = vcombine.low %v9605_v20, %v9609_v13  ;;  %v9877_v43 = vcombine.low %v9606_v24, %v9610_v19 }
 0x387   : > { %7477 = vmatpush1.bf16.msra.mxu0 %v10071_v50  ;;  %v9878_v50 = vcombine.high %v9606_v24, %v9610_v19 }
 0x388   : > { %7603 = vmatpush1.bf16.msra.mxu1 %v10073_v4  ;;  %7478 = vmatprep.subr.bf16.mxu0 %v10080_v12  ;;  %v9613_v4 = vld [vmem:[%s14612_s3 + $0x10d0] sm:$0xff] }
 0x389   : > { %7604 = vmatprep.subr.bf16.mxu1 %v10082_v41  ;;  %v9617_v12 = vld [vmem:[%s14612_s3 + $0x10f0] sm:$0xff]  ;;  %v9614_v41 = vld [vmem:[%s14612_s3 + $0x10d8] sm:$0xff] }
 0x38a   : > { %v9884_v42 = vcombine.high %v9613_v4, %v9617_v12  ;;  %v9883_v26 = vcombine.low %v9613_v4, %v9617_v12  ;;  %v9885_v53 = vcombine.low %v9614_v41, %v9618_v33 }
 0x38b   : > { %7479 = vmatpush1.bf16.msra.mxu0 %v10079_v31  ;;  %v9886_v31 = vcombine.high %v9614_v41, %v9618_v33 }
 0x38c   : > { %7605 = vmatpush1.bf16.msra.mxu1 %v10081_v57  ;;  %7480 = vmatprep.subr.bf16.mxu0 %v10088_v36  ;;  %v9621_v57 = vld [vmem:[%s14612_s3 + $0x1110] sm:$0xff] }
 0x38d   : > { %7606 = vmatprep.subr.bf16.mxu1 %v10090_v9  ;;  %v9625_v36 = vld [vmem:[%s14612_s3 + $0x1130] sm:$0xff]  ;;  %v9622_v9 = vld [vmem:[%s14612_s3 + $0x1118] sm:$0xff] }
 0x38e   : > { %v9892_v8 = vcombine.high %v9621_v57, %v9625_v36  ;;  %v9891_v32 = vcombine.low %v9621_v57, %v9625_v36  ;;  %v9893_v7 = vcombine.low %v9622_v9, %v9626_v52 }
 0x38f   : > { %7481 = vmatpush1.bf16.msra.mxu0 %v10087_v21  ;;  %v9894_v21 = vcombine.high %v9622_v9, %v9626_v52 }
 0x390   : > { %7607 = vmatpush1.bf16.msra.mxu1 %v10089_v44  ;;  %7482 = vmatprep.subr.bf16.mxu0 %v10096_v47  ;;  %v9629_v44 = vld [vmem:[%s14612_s3 + $0x1150] sm:$0xff] }
 0x391   : > { %7608 = vmatprep.subr.bf16.mxu1 %v10098_v30  ;;  %v9633_v47 = vld [vmem:[%s14612_s3 + $0x1170] sm:$0xff]  ;;  %v9630_v30 = vld [vmem:[%s14612_s3 + $0x1158] sm:$0xff] }
 0x392   : > { %v9900_v14 = vcombine.high %v9629_v44, %v9633_v47  ;;  %v9899_v63 = vcombine.low %v9629_v44, %v9633_v47  ;;  %v9901_v28 = vcombine.low %v9630_v30, %v9634_v0 }
 0x393   : > { %7483 = vmatpush1.bf16.msra.mxu0 %v10095_v49  ;;  %v9902_v49 = vcombine.high %v9630_v30, %v9634_v0 }
 0x394   : > { %7609 = vmatpush1.bf16.msra.mxu1 %v10097_v10  ;;  %7484 = vmatprep.subr.bf16.mxu0 %v10104_v27  ;;  %v9637_v10 = vld [vmem:[%s14612_s3 + $0x1190] sm:$0xff] }
 0x395   : > { %7610 = vmatprep.subr.bf16.mxu1 %v10106_v56  ;;  %v9641_v27 = vld [vmem:[%s14612_s3 + $0x11b0] sm:$0xff]  ;;  %v9638_v56 = vld [vmem:[%s14612_s3 + $0x1198] sm:$0xff] }
 0x396   : > { %v9908_v58 = vcombine.high %v9637_v10, %v9641_v27  ;;  %v9907_v48 = vcombine.low %v9637_v10, %v9641_v27  ;;  %v9909_v2 = vcombine.low %v9638_v56, %v9642_v25 }
 0x397   : > { %7485 = vmatpush1.bf16.msra.mxu0 %v10103_v16  ;;  %v9910_v16 = vcombine.high %v9638_v56, %v9642_v25 }
 0x398   : > { %7611 = vmatpush1.bf16.msra.mxu1 %v10105_v61  ;;  %7643 = vmatprep.subr.bf16.mxu0 %v9860_v15  ;;  %v9645_v61 = vld [vmem:[%s14612_s3 + $0x11d0] sm:$0xff] }
 0x399   : > { %7769 = vmatprep.subr.bf16.mxu1 %v9862_v11  ;;  %v9649_v15 = vld [vmem:[%s14612_s3 + $0x11f0] sm:$0xff]  ;;  %v9646_v11 = vld [vmem:[%s14612_s3 + $0x11d8] sm:$0xff] }
 0x39a   : > { %7487 = vmatmul.mubr.bf16.vlgmr.msra.gmra.mrb[12].mxu0 %v11989_v45  ;;  %v9916_v18 = vcombine.high %v9645_v61, %v9649_v15  ;;  %v9915_v20 = vcombine.low %v9645_v61, %v9649_v15 }
 0x39b   : > { %7613 = vmatmul.mubr.bf16.vlgmr.msra.gmra.mrb[12].mxu1 %v11989_v45  ;;  %7496 = vmatprep.mubr.bf16.mxu0 %v12004_v54 }
 0x39c   : > { %7622 = vmatprep.mubr.bf16.mxu1 %v12004_v54  ;;  %7644 = vmatpush1.bf16.msra.mxu0 %v9859_v55  ;;  %v9653_v55 = vld [vmem:[%s14612_s3 + $0x1210] sm:$0xff] }
 0x39d   : > { %7770 = vmatpush1.bf16.msra.mxu1 %v9861_v6  ;;  %7645 = vmatprep.subr.bf16.mxu0 %v9868_v46  ;;  %v9657_v6 = vld [vmem:[%s14612_s3 + $0x1230] sm:$0xff]  ;;  %v9654_v46 = vld [vmem:[%s14612_s3 + $0x1218] sm:$0xff] }
 0x39e   : > { %7771 = vmatprep.subr.bf16.mxu1 %v9870_v22  ;;  %v9658_v22 = vld [vmem:[%s14612_s3 + $0x1238] sm:$0xff]  ;;  %v9924_v24 = vcombine.high %v9653_v55, %v9657_v6  ;;  %v9923_v4 = vcombine.low %v9653_v55, %v9657_v6 }
 0x39f   : > { %v9926_v19 = vcombine.high %v9654_v46, %v9658_v22  ;;  %v9925_v12 = vcombine.low %v9654_v46, %v9658_v22 }
 0x3a0   : > { %7646 = vmatpush1.bf16.msra.mxu0 %v9867_v40  ;;  %v9661_v40 = vld [vmem:[%s14612_s3 + $0x1250] sm:$0xff] }
 0x3a1   : > { %7772 = vmatpush1.bf16.msra.mxu1 %v9869_v59  ;;  %7647 = vmatprep.subr.bf16.mxu0 %v9876_v35  ;;  %v9665_v59 = vld [vmem:[%s14612_s3 + $0x1270] sm:$0xff]  ;;  %v9662_v35 = vld [vmem:[%s14612_s3 + $0x1258] sm:$0xff] }
 0x3a2   : > { %7497 = vmatmul.mubr.bf16.gmra.mrb[16].mxu0 %v12006_v39  ;;  %7773 = vmatprep.subr.bf16.mxu1 %v9878_v50  ;;  %v9666_v50 = vld [vmem:[%s14612_s3 + $0x1278] sm:$0xff]  ;;  %v9932_v41 = vcombine.high %v9661_v40, %v9665_v59  ;;  %v9931_v57 = vcombine.low %v9661_v40, %v9665_v59 }
 0x3a3   : > { %7623 = vmatmul.mubr.bf16.gmra.mrb[16].mxu1 %v12006_v39  ;;  %7506 = vmatprep.mubr.bf16.mxu0 %v12021_v29  ;;  %v9934_v33 = vcombine.high %v9662_v35, %v9666_v50  ;;  %v9933_v36 = vcombine.low %v9662_v35, %v9666_v50 }
 0x3a4   : > { %7632 = vmatprep.mubr.bf16.mxu1 %v12021_v29  ;;  %7648 = vmatpush1.bf16.msra.mxu0 %v9875_v60  ;;  %v9669_v60 = vld [vmem:[%s14612_s3 + $0x1290] sm:$0xff] }
 0x3a5   : > { %7774 = vmatpush1.bf16.msra.mxu1 %v9877_v43  ;;  %7649 = vmatprep.subr.bf16.mxu0 %v9884_v42  ;;  %v9673_v43 = vld [vmem:[%s14612_s3 + $0x12b0] sm:$0xff]  ;;  %v9670_v42 = vld [vmem:[%s14612_s3 + $0x1298] sm:$0xff] }
 0x3a6   : > { %7775 = vmatprep.subr.bf16.mxu1 %v9886_v31  ;;  %v9674_v31 = vld [vmem:[%s14612_s3 + $0x12b8] sm:$0xff]  ;;  %v9940_v9 = vcombine.high %v9669_v60, %v9673_v43  ;;  %v9939_v44 = vcombine.low %v9669_v60, %v9673_v43 }
 0x3a7   : > { %v9942_v52 = vcombine.high %v9670_v42, %v9674_v31  ;;  %v9941_v47 = vcombine.low %v9670_v42, %v9674_v31 }
 0x3a8   : > { %7650 = vmatpush1.bf16.msra.mxu0 %v9883_v26  ;;  %v9677_v26 = vld [vmem:[%s14612_s3 + $0x12d0] sm:$0xff] }
 0x3a9   : > { %7776 = vmatpush1.bf16.msra.mxu1 %v9885_v53  ;;  %7651 = vmatprep.subr.bf16.mxu0 %v9892_v8  ;;  %v9681_v53 = vld [vmem:[%s14612_s3 + $0x12f0] sm:$0xff]  ;;  %v9678_v8 = vld [vmem:[%s14612_s3 + $0x12d8] sm:$0xff] }
 0x3aa   : > { %7507 = vmatmul.mubr.bf16.gmra.mrb[20].mxu0 %v12023_v3  ;;  %7777 = vmatprep.subr.bf16.mxu1 %v9894_v21  ;;  %v9682_v21 = vld [vmem:[%s14612_s3 + $0x12f8] sm:$0xff]  ;;  %v9948_v30 = vcombine.high %v9677_v26, %v9681_v53  ;;  %v9947_v10 = vcombine.low %v9677_v26, %v9681_v53 }
 0x3ab   : > { %7633 = vmatmul.mubr.bf16.gmra.mrb[20].mxu1 %v12023_v3  ;;  %7675 = vmatprep.mubr.bf16.mxu0 %v13359_v34  ;;  %v9950_v0 = vcombine.high %v9678_v8, %v9682_v21  ;;  %v9949_v27 = vcombine.low %v9678_v8, %v9682_v21 }
 0x3ac   : > { %7652 = vmatpush1.bf16.msra.mxu0 %v9891_v32  ;;  %7801 = vmatprep.mubr.bf16.mxu1 %v13359_v34  ;;  %v9650_v34 = vld [vmem:[%s14612_s3 + $0x11f8] sm:$0xff]  ;;  %v9685_v32 = vld [vmem:[%s14612_s3 + $0x1310] sm:$0xff] }
 0x3ad   : > { %7778 = vmatpush1.bf16.msra.mxu1 %v9893_v7  ;;  %7653 = vmatprep.subr.bf16.mxu0 %v9900_v14  ;;  %v9918_v38 = vcombine.high %v9646_v11, %v9650_v34  ;;  %v9917_v13 = vcombine.low %v9646_v11, %v9650_v34  ;;  %v9689_v7 = vld [vmem:[%s14612_s3 + $0x1330] sm:$0xff]  ;;  %v9686_v14 = vld [vmem:[%s14612_s3 + $0x1318] sm:$0xff] }
 0x3ae   : > { %7779 = vmatprep.subr.bf16.mxu1 %v9902_v49  ;;  %v9690_v49 = vld [vmem:[%s14612_s3 + $0x1338] sm:$0xff]  ;;  %v9956_v56 = vcombine.high %v9685_v32, %v9689_v7  ;;  %v9955_v61 = vcombine.low %v9685_v32, %v9689_v7 }
 0x3af   : > { %v9958_v25 = vcombine.high %v9686_v14, %v9690_v49  ;;  %v9957_v15 = vcombine.low %v9686_v14, %v9690_v49  ;;  %v9741_v49 = vld [vmem:[%s14612_s3 + $0x14d0] sm:$0xff] }
 0x3b0   : > { %7654 = vmatpush1.bf16.msra.mxu0 %v9899_v63  ;;  %v9693_v63 = vld [vmem:[%s14612_s3 + $0x1350] sm:$0xff] }
 0x3b1   : > { %7780 = vmatpush1.bf16.msra.mxu1 %v9901_v28  ;;  %7655 = vmatprep.subr.bf16.mxu0 %v9908_v58  ;;  %v9697_v28 = vld [vmem:[%s14612_s3 + $0x1370] sm:$0xff]  ;;  %v9694_v58 = vld [vmem:[%s14612_s3 + $0x1358] sm:$0xff] }
 0x3b2   : > { %7781 = vmatprep.subr.bf16.mxu1 %v9910_v16  ;;  %v9698_v16 = vld [vmem:[%s14612_s3 + $0x1378] sm:$0xff]  ;;  %v9964_v11 = vcombine.high %v9693_v63, %v9697_v28  ;;  %v9963_v55 = vcombine.low %v9693_v63, %v9697_v28 }
 0x3b3   : > { %v9966_v34 = vcombine.high %v9694_v58, %v9698_v16  ;;  %v9965_v6 = vcombine.low %v9694_v58, %v9698_v16  ;;  %v9749_v58 = vld [vmem:[%s14612_s3 + $0x1510] sm:$0xff] }
 0x3b4   : > { %7656 = vmatpush1.bf16.msra.mxu0 %v9907_v48  ;;  %v9701_v48 = vld [vmem:[%s14612_s3 + $0x1390] sm:$0xff] }
 0x3b5   : > { %7782 = vmatpush1.bf16.msra.mxu1 %v9909_v2  ;;  %7657 = vmatprep.subr.bf16.mxu0 %v9916_v18  ;;  %v9705_v2 = vld [vmem:[%s14612_s3 + $0x13b0] sm:$0xff]  ;;  %v9702_v18 = vld [vmem:[%s14612_s3 + $0x1398] sm:$0xff] }
 0x3b6   : > { %7783 = vmatprep.subr.bf16.mxu1 %v9918_v38  ;;  %v9706_v38 = vld [vmem:[%s14612_s3 + $0x13b8] sm:$0xff]  ;;  %v9972_v46 = vcombine.high %v9701_v48, %v9705_v2  ;;  %v9971_v40 = vcombine.low %v9701_v48, %v9705_v2  ;;  %v9753_v16 = vld [vmem:[%s14612_s3 + $0x1530] sm:$0xff] }
 0x3b7   : > { %v9974_v22 = vcombine.high %v9702_v18, %v9706_v38  ;;  %v9973_v59 = vcombine.low %v9702_v18, %v9706_v38  ;;  %v10020_v48 = vcombine.high %v9749_v58, %v9753_v16  ;;  %v9757_v2 = vld [vmem:[%s14612_s3 + $0x1550] sm:$0xff]  ;;  %v9758_v38 = vld [vmem:[%s14612_s3 + $0x1558] sm:$0xff] }
 0x3b8   : > { %7658 = vmatpush1.bf16.msra.mxu0 %v9915_v20  ;;  %v9709_v20 = vld [vmem:[%s14612_s3 + $0x13d0] sm:$0xff] }
 0x3b9   : > { %7784 = vmatpush1.bf16.msra.mxu1 %v9917_v13  ;;  %7659 = vmatprep.subr.bf16.mxu0 %v9924_v24  ;;  %v9713_v13 = vld [vmem:[%s14612_s3 + $0x13f0] sm:$0xff]  ;;  %v9710_v24 = vld [vmem:[%s14612_s3 + $0x13d8] sm:$0xff] }
 0x3ba   : > { %7785 = vmatprep.subr.bf16.mxu1 %v9926_v19  ;;  %v9714_v19 = vld [vmem:[%s14612_s3 + $0x13f8] sm:$0xff]  ;;  %v9980_v35 = vcombine.high %v9709_v20, %v9713_v13  ;;  %v9979_v60 = vcombine.low %v9709_v20, %v9713_v13  ;;  %v9761_v18 = vld [vmem:[%s14612_s3 + $0x1570] sm:$0xff] }
 0x3bb   : > { %v9982_v50 = vcombine.high %v9710_v24, %v9714_v19  ;;  %v9981_v43 = vcombine.low %v9710_v24, %v9714_v19  ;;  %v9765_v20 = vld [vmem:[%s14612_s3 + $0x1590] sm:$0xff]  ;;  %v9766_v24 = vld [vmem:[%s14612_s3 + $0x1598] sm:$0xff] }
 0x3bc   : > { %7660 = vmatpush1.bf16.msra.mxu0 %v9923_v4  ;;  %v9717_v4 = vld [vmem:[%s14612_s3 + $0x1410] sm:$0xff]  ;;  %v9770_v19 = vld [vmem:[%s14612_s3 + $0x15b8] sm:$0xff] }
 0x3bd   : > { %7786 = vmatpush1.bf16.msra.mxu1 %v9925_v12  ;;  %7661 = vmatprep.subr.bf16.mxu0 %v9932_v41  ;;  %v9721_v12 = vld [vmem:[%s14612_s3 + $0x1430] sm:$0xff]  ;;  %v9718_v41 = vld [vmem:[%s14612_s3 + $0x1418] sm:$0xff] }
 0x3be   : > { %7787 = vmatprep.subr.bf16.mxu1 %v9934_v33  ;;  %v9722_v33 = vld [vmem:[%s14612_s3 + $0x1438] sm:$0xff]  ;;  %v9988_v42 = vcombine.high %v9717_v4, %v9721_v12  ;;  %v9987_v26 = vcombine.low %v9717_v4, %v9721_v12  ;;  %v9769_v13 = vld [vmem:[%s14612_s3 + $0x15b0] sm:$0xff] }
 0x3bf   : > { %v9990_v31 = vcombine.high %v9718_v41, %v9722_v33  ;;  %v9989_v53 = vcombine.low %v9718_v41, %v9722_v33  ;;  %v9777_v4 = vld [vmem:[%s14612_s3 + $0x15f0] sm:$0xff]  ;;  %v9774_v12 = vld [vmem:[%s14612_s3 + $0x15d8] sm:$0xff]  ;;  %v10035_v41 = vcombine.low %v9765_v20, %v9769_v13  ;;  %v10037_v33 = vcombine.low %v9766_v24, %v9770_v19 }
 0x3c0   : > { %7662 = vmatpush1.bf16.msra.mxu0 %v9931_v57  ;;  %v9725_v57 = vld [vmem:[%s14612_s3 + $0x1450] sm:$0xff] }
 0x3c1   : > { %7788 = vmatpush1.bf16.msra.mxu1 %v9933_v36  ;;  %7663 = vmatprep.subr.bf16.mxu0 %v9940_v9  ;;  %v9729_v36 = vld [vmem:[%s14612_s3 + $0x1470] sm:$0xff]  ;;  %v9726_v9 = vld [vmem:[%s14612_s3 + $0x1458] sm:$0xff] }
 0x3c2   : > { %7789 = vmatprep.subr.bf16.mxu1 %v9942_v52  ;;  %v9730_v52 = vld [vmem:[%s14612_s3 + $0x1478] sm:$0xff]  ;;  %v9996_v8 = vcombine.high %v9725_v57, %v9729_v36  ;;  %v9995_v32 = vcombine.low %v9725_v57, %v9729_v36 }
 0x3c3   : > { %v9998_v21 = vcombine.high %v9726_v9, %v9730_v52  ;;  %v9997_v7 = vcombine.low %v9726_v9, %v9730_v52  ;;  %v9782_v57 = vld [vmem:[%s14612_s3 + $0x1618] sm:$0xff] }
 0x3c4   : > { %7664 = vmatpush1.bf16.msra.mxu0 %v9939_v44  ;;  %v9733_v44 = vld [vmem:[%s14612_s3 + $0x1490] sm:$0xff]  ;;  %v9786_v36 = vld [vmem:[%s14612_s3 + $0x1638] sm:$0xff] }
 0x3c5   : > { %7790 = vmatpush1.bf16.msra.mxu1 %v9941_v47  ;;  %7665 = vmatprep.subr.bf16.mxu0 %v9948_v30  ;;  %v9737_v47 = vld [vmem:[%s14612_s3 + $0x14b0] sm:$0xff]  ;;  %v9734_v30 = vld [vmem:[%s14612_s3 + $0x1498] sm:$0xff] }
 0x3c6   : > { %7791 = vmatprep.subr.bf16.mxu1 %v9950_v0  ;;  %v9738_v0 = vld [vmem:[%s14612_s3 + $0x14b8] sm:$0xff]  ;;  %v10004_v14 = vcombine.high %v9733_v44, %v9737_v47 }
 0x3c8   : > { %7666 = vmatpush1.bf16.msra.mxu0 %v9947_v10  ;;  %v9745_v10 = vld [vmem:[%s14612_s3 + $0x14f0] sm:$0xff] }
 0x3c9   : > { %7792 = vmatpush1.bf16.msra.mxu1 %v9949_v27  ;;  %7667 = vmatprep.subr.bf16.mxu0 %v9956_v56  ;;  %v9742_v27 = vld [vmem:[%s14612_s3 + $0x14d8] sm:$0xff]  ;;  %v10003_v56 = vcombine.low %v9733_v44, %v9737_v47  ;;  %v10012_v63 = vcombine.high %v9741_v49, %v9745_v10 }
 0x3ca   : > { %7793 = vmatprep.subr.bf16.mxu1 %v9958_v25  ;;  %v10005_v25 = vcombine.low %v9734_v30, %v9738_v0  ;;  %v9790_v44 = vld [vmem:[%s14612_s3 + $0x1658] sm:$0xff] }
 0x3cb   : > { %v9794_v47 = vld [vmem:[%s14612_s3 + $0x1678] sm:$0xff] }
 0x3cc   : > { %7668 = vmatpush1.bf16.msra.mxu0 %v9955_v61  ;;  %v9750_v61 = vld [vmem:[%s14612_s3 + $0x1518] sm:$0xff] }
 0x3cd   : > { %7794 = vmatpush1.bf16.msra.mxu1 %v9957_v15  ;;  %7669 = vmatprep.subr.bf16.mxu0 %v9964_v11  ;;  %v9754_v15 = vld [vmem:[%s14612_s3 + $0x1538] sm:$0xff]  ;;  %v10011_v11 = vcombine.low %v9741_v49, %v9745_v10 }
 0x3ce   : > { %7795 = vmatprep.subr.bf16.mxu1 %v9966_v34  ;;  %v9798_v49 = vld [vmem:[%s14612_s3 + $0x1698] sm:$0xff] }
 0x3cf   : > { %v9802_v10 = vld [vmem:[%s14612_s3 + $0x16b8] sm:$0xff] }
 0x3d0   : > { %7670 = vmatpush1.bf16.msra.mxu0 %v9963_v55  ;;  %v10019_v55 = vcombine.low %v9749_v58, %v9753_v16  ;;  %v9806_v58 = vld [vmem:[%s14612_s3 + $0x16d8] sm:$0xff] }
 0x3d1   : > { %7796 = vmatpush1.bf16.msra.mxu1 %v9965_v6  ;;  %7671 = vmatprep.subr.bf16.mxu0 %v9972_v46  ;;  %v10021_v6 = vcombine.low %v9750_v61, %v9754_v15  ;;  %v10028_v46 = vcombine.high %v9757_v2, %v9761_v18  ;;  %v9810_v16 = vld [vmem:[%s14612_s3 + $0x16f8] sm:$0xff] }
 0x3d2   : > { %7797 = vmatprep.subr.bf16.mxu1 %v9974_v22 }
 0x3d4   : > { %7672 = vmatpush1.bf16.msra.mxu0 %v9971_v40  ;;  %v10027_v40 = vcombine.low %v9757_v2, %v9761_v18  ;;  %v9814_v2 = vld [vmem:[%s14612_s3 + $0x1718] sm:$0xff] }
 0x3d5   : > { %7798 = vmatpush1.bf16.msra.mxu1 %v9973_v59  ;;  %7673 = vmatprep.subr.bf16.mxu0 %v9980_v35  ;;  %v10036_v35 = vcombine.high %v9765_v20, %v9769_v13  ;;  %v9818_v18 = vld [vmem:[%s14612_s3 + $0x1738] sm:$0xff] }
 0x3d6   : > { %7799 = vmatprep.subr.bf16.mxu1 %v9982_v50  ;;  %v9773_v50 = vld [vmem:[%s14612_s3 + $0x15d0] sm:$0xff]  ;;  %v9822_v20 = vld [vmem:[%s14612_s3 + $0x1758] sm:$0xff] }
 0x3d7   : > { %v10043_v9 = vcombine.low %v9773_v50, %v9777_v4  ;;  %v9826_v13 = vld [vmem:[%s14612_s3 + $0x1778] sm:$0xff] }
 0x3d8   : > { %7674 = vmatpush1.bf16.msra.mxu0 %v9979_v60  ;;  %v10044_v60 = vcombine.high %v9773_v50, %v9777_v4  ;;  %v9830_v50 = vld [vmem:[%s14612_s3 + $0x1798] sm:$0xff] }
 0x3d9   : > { %7800 = vmatpush1.bf16.msra.mxu1 %v9981_v43  ;;  %7706 = vmatprep.subr.bf16.mxu0 %v9988_v42  ;;  %v9781_v42 = vld [vmem:[%s14612_s3 + $0x1610] sm:$0xff]  ;;  %v9834_v4 = vld [vmem:[%s14612_s3 + $0x17b8] sm:$0xff] }
 0x3da   : > { %7832 = vmatprep.subr.bf16.mxu1 %v9990_v31  ;;  %v9785_v31 = vld [vmem:[%s14612_s3 + $0x1630] sm:$0xff] }
 0x3db   : > { %7676 = vmatmul.mubr.bf16.vlgmr.msra.gmra.mrb[24].mxu0 %v13511_v17 }
 0x3dc   : > { %7802 = vmatmul.mubr.bf16.vlgmr.msra.gmra.mrb[24].mxu1 %v13511_v17  ;;  %7685 = vmatprep.mubr.bf16.mxu0 %v11957_v23  ;;  %v10006_v17 = vcombine.high %v9734_v30, %v9738_v0  ;;  %v10051_v30 = vcombine.low %v9781_v42, %v9785_v31  ;;  %v10053_v0 = vcombine.low %v9782_v57, %v9786_v36 }
 0x3dd   : > { %7707 = vmatpush1.bf16.msra.mxu0 %v9987_v26  ;;  %7811 = vmatprep.mubr.bf16.mxu1 %v11957_v23  ;;  %v9746_v23 = vld [vmem:[%s14612_s3 + $0x14f8] sm:$0xff]  ;;  %v10052_v26 = vcombine.high %v9781_v42, %v9785_v31 }
 0x3de   : > { %7833 = vmatpush1.bf16.msra.mxu1 %v9989_v53  ;;  %7708 = vmatprep.subr.bf16.mxu0 %v9996_v8  ;;  %v10014_v28 = vcombine.high %v9742_v27, %v9746_v23  ;;  %v10013_v34 = vcombine.low %v9742_v27, %v9746_v23  ;;  %v10054_v53 = vcombine.high %v9782_v57, %v9786_v36  ;;  %v9789_v8 = vld [vmem:[%s14612_s3 + $0x1650] sm:$0xff]  ;;  %v9838_v42 = vld [vmem:[%s14612_s3 + $0x17d8] sm:$0xff] }
 0x3df   : > { %7834 = vmatprep.subr.bf16.mxu1 %v9998_v21  ;;  %v9793_v21 = vld [vmem:[%s14612_s3 + $0x1670] sm:$0xff]  ;;  %v10061_v23 = vcombine.low %v9790_v44, %v9794_v47  ;;  %v9842_v31 = vld [vmem:[%s14612_s3 + $0x17f8] sm:$0xff]  ;;  %v10101_v36 = vcombine.low %v9830_v50, %v9834_v4 }
 0x3e0   : > { %v10059_v27 = vcombine.low %v9789_v8, %v9793_v21 }
 0x3e1   : > { %7709 = vmatpush1.bf16.msra.mxu0 %v9995_v32  ;;  %v10060_v32 = vcombine.high %v9789_v8, %v9793_v21  ;;  %v8129_v8 = vld [vmem:[%s14614_s5 + $0x180] sm:$0xff]  ;;  %v8130_v21 = vld [vmem:[%s14614_s5 + $0x188] sm:$0xff] }
 0x3e2   : > { %7835 = vmatpush1.bf16.msra.mxu1 %v9997_v7  ;;  %7710 = vmatprep.subr.bf16.mxu0 %v10004_v14  ;;  %v10062_v7 = vcombine.high %v9790_v44, %v9794_v47  ;;  %v9797_v14 = vld [vmem:[%s14612_s3 + $0x1690] sm:$0xff]  ;;  %v10109_v47 = vcombine.low %v9838_v42, %v9842_v31 }
 0x3e3   : > { %7686 = vmatmul.mubr.bf16.gmra.mrb[28].mxu0 %v11959_v62  ;;  %7836 = vmatprep.subr.bf16.mxu1 %v10006_v17  ;;  %v9801_v17 = vld [vmem:[%s14612_s3 + $0x16b0] sm:$0xff] }
 0x3e4   : > { %7812 = vmatmul.mubr.bf16.gmra.mrb[28].mxu1 %v11959_v62  ;;  %7695 = vmatprep.mubr.bf16.mxu0 %v11969_v37  ;;  %v10022_v62 = vcombine.high %v9750_v61, %v9754_v15  ;;  %v10067_v61 = vcombine.low %v9797_v14, %v9801_v17  ;;  %v10069_v15 = vcombine.low %v9798_v49, %v9802_v10 }
 0x3e5   : > { %7711 = vmatpush1.bf16.msra.mxu0 %v10003_v56  ;;  %7821 = vmatprep.mubr.bf16.mxu1 %v11969_v37  ;;  %v9762_v37 = vld [vmem:[%s14612_s3 + $0x1578] sm:$0xff]  ;;  %v10068_v56 = vcombine.high %v9797_v14, %v9801_v17  ;;  %v8113_v14 = vld [vmem:[%s14614_s5 + $0x100] sm:$0xff]  ;;  %v8114_v17 = vld [vmem:[%s14614_s5 + $0x108] sm:$0xff] }
 0x3e6   : > { %7837 = vmatpush1.bf16.msra.mxu1 %v10005_v25  ;;  %7712 = vmatprep.subr.bf16.mxu0 %v10012_v63  ;;  %v10030_v22 = vcombine.high %v9758_v38, %v9762_v37  ;;  %v10029_v59 = vcombine.low %v9758_v38, %v9762_v37  ;;  %v10070_v25 = vcombine.high %v9798_v49, %v9802_v10  ;;  %v9805_v63 = vld [vmem:[%s14612_s3 + $0x16d0] sm:$0xff]  ;;  %v8100_v10 = vld [vmem:[%s14614_s5 + $0x98] sm:$0xff] }
 0x3e7   : > { %7838 = vmatprep.subr.bf16.mxu1 %v10014_v28  ;;  %v9809_v28 = vld [vmem:[%s14612_s3 + $0x16f0] sm:$0xff]  ;;  %v10077_v37 = vcombine.low %v9806_v58, %v9810_v16 }
 0x3e8   : > { %v10075_v38 = vcombine.low %v9805_v63, %v9809_v28  ;;  %v8099_v49 = vld [vmem:[%s14614_s5 + $0x90] sm:$0xff] }
 0x3e9   : > { %7713 = vmatpush1.bf16.msra.mxu0 %v10011_v11  ;;  %v10076_v11 = vcombine.high %v9805_v63, %v9809_v28  ;;  %v10329_v63 = vpack.c.bf16 %v8100_v10, %v8099_v49  ;;  %v8083_v28 = vld [vmem:[%s14614_s5 + $0x10] sm:$0xff]  ;;  %v8141_v49 = vld [vmem:[%s14614_s5 + $0x1e0] sm:$0xff]  ;;  %v8142_v10 = vld [vmem:[%s14614_s5 + $0x1e8] sm:$0xff] }
 0x3ea   : > { %7839 = vmatpush1.bf16.msra.mxu1 %v10013_v34  ;;  %7714 = vmatprep.subr.bf16.mxu0 %v10020_v48  ;;  %v10078_v34 = vcombine.high %v9806_v58, %v9810_v16  ;;  %v9813_v48 = vld [vmem:[%s14612_s3 + $0x1710] sm:$0xff]  ;;  %v8084_v58 = vld [vmem:[%s14614_s5 + $0x18] sm:$0xff] }
 0x3eb   : > { %7696 = vmatmul.mubr.bf16.gmra.mrb[32].mxu0 %v11971_v51  ;;  %7840 = vmatprep.subr.bf16.mxu1 %v10022_v62  ;;  %v9817_v62 = vld [vmem:[%s14612_s3 + $0x1730] sm:$0xff] }
 0x3ec   : > { %7822 = vmatmul.mubr.bf16.gmra.mrb[32].mxu1 %v11971_v51  ;;  %7738 = vmatprep.mubr.bf16.mxu0 %v11991_v1  ;;  %v10038_v51 = vcombine.high %v9766_v24, %v9770_v19  ;;  %v10083_v24 = vcombine.low %v9813_v48, %v9817_v62  ;;  %v10085_v19 = vcombine.low %v9814_v2, %v9818_v18  ;;  %v8115_v16 = vld [vmem:[%s14614_s5 + $0x110] sm:$0xff] }
 0x3ed   : > { %7715 = vmatpush1.bf16.msra.mxu0 %v10019_v55  ;;  %7864 = vmatprep.mubr.bf16.mxu1 %v11991_v1  ;;  %v9778_v1 = vld [vmem:[%s14612_s3 + $0x15f8] sm:$0xff]  ;;  %v10084_v55 = vcombine.high %v9813_v48, %v9817_v62  ;;  %v8133_v48 = vld [vmem:[%s14614_s5 + $0x1a0] sm:$0xff]  ;;  %v8134_v62 = vld [vmem:[%s14614_s5 + $0x1a8] sm:$0xff] }
 0x3ee   : > { %7841 = vmatpush1.bf16.msra.mxu1 %v10021_v6  ;;  %7716 = vmatprep.subr.bf16.mxu0 %v10028_v46  ;;  %v10046_v43 = vcombine.high %v9774_v12, %v9778_v1  ;;  %v10045_v52 = vcombine.low %v9774_v12, %v9778_v1  ;;  %v10086_v6 = vcombine.high %v9814_v2, %v9818_v18  ;;  %v9821_v46 = vld [vmem:[%s14612_s3 + $0x1750] sm:$0xff] }
 0x3ef   : > { %7842 = vmatprep.subr.bf16.mxu1 %v10030_v22  ;;  %v9825_v22 = vld [vmem:[%s14612_s3 + $0x1770] sm:$0xff]  ;;  %v10093_v1 = vcombine.low %v9822_v20, %v9826_v13  ;;  %v10331_v2 = vpack.c.bf16 %v8084_v58, %v8083_v28  ;;  %v10381_v28 = vpack.c.bf16 %v8142_v10, %v8141_v49  ;;  %v8126_v58 = vld [vmem:[%s14614_s5 + $0x168] sm:$0xff] }
 0x3f0   : > { %v10091_v12 = vcombine.low %v9821_v46, %v9825_v22 }
 0x3f1   : > { %7717 = vmatpush1.bf16.msra.mxu0 %v10027_v40  ;;  %v10092_v40 = vcombine.high %v9821_v46, %v9825_v22  ;;  %v8103_v46 = vld [vmem:[%s14614_s5 + $0xb0] sm:$0xff]  ;;  %v8104_v22 = vld [vmem:[%s14614_s5 + $0xb8] sm:$0xff] }
 0x3f2   : > { %7843 = vmatpush1.bf16.msra.mxu1 %v10029_v59  ;;  %7718 = vmatprep.subr.bf16.mxu0 %v10036_v35  ;;  %v10094_v59 = vcombine.high %v9822_v20, %v9826_v13  ;;  %v9829_v35 = vld [vmem:[%s14612_s3 + $0x1790] sm:$0xff]  ;;  %v8136_v13 = vld [vmem:[%s14614_s5 + $0x1b8] sm:$0xff] }
 0x3f3   : > { %7844 = vmatprep.subr.bf16.mxu1 %v10038_v51  ;;  %v9833_v51 = vld [vmem:[%s14612_s3 + $0x17b0] sm:$0xff] }
 0x3f4   : > { %v10099_v57 = vcombine.low %v9829_v35, %v9833_v51  ;;  %v8135_v20 = vld [vmem:[%s14614_s5 + $0x1b0] sm:$0xff] }
 0x3f5   : > { %7719 = vmatpush1.bf16.msra.mxu0 %v10035_v41  ;;  %v10100_v41 = vcombine.high %v9829_v35, %v9833_v51  ;;  %v8088_v35 = vld [vmem:[%s14614_s5 + $0x38] sm:$0xff]  ;;  %v8119_v51 = vld [vmem:[%s14614_s5 + $0x130] sm:$0xff] }
 0x3f6   : > { %7845 = vmatpush1.bf16.msra.mxu1 %v10037_v33  ;;  %7720 = vmatprep.subr.bf16.mxu0 %v10044_v60  ;;  %v10102_v33 = vcombine.high %v9830_v50, %v9834_v4  ;;  %v9837_v60 = vld [vmem:[%s14612_s3 + $0x17d0] sm:$0xff]  ;;  %v10369_v50 = vpack.c.bf16 %v8136_v13, %v8135_v20  ;;  %v8120_v4 = vld [vmem:[%s14614_s5 + $0x138] sm:$0xff] }
 0x3f7   : > { %7846 = vmatprep.subr.bf16.mxu1 %v10046_v43  ;;  %v9841_v43 = vld [vmem:[%s14612_s3 + $0x17f0] sm:$0xff] }
 0x3f8   : > { %v10107_v44 = vcombine.low %v9837_v60, %v9841_v43 }
 0x3f9   : > { %7721 = vmatpush1.bf16.msra.mxu0 %v10043_v9  ;;  %v10108_v9 = vcombine.high %v9837_v60, %v9841_v43  ;;  %v10371_v43 = vpack.c.bf16 %v8120_v4, %v8119_v51 }
 0x3fa   : > { %7847 = vmatpush1.bf16.msra.mxu1 %v10045_v52  ;;  %7722 = vmatprep.subr.bf16.mxu0 %v10052_v26  ;;  %v10110_v52 = vcombine.high %v9838_v42, %v9842_v31  ;;  %v8097_v26 = vld [vmem:[%s14614_s5 + $0x80] sm:$0xff]  ;;  %v8090_v31 = vld [vmem:[%s14614_s5 + $0x48] sm:$0xff] }
 0x3fb   : > { %7848 = vmatprep.subr.bf16.mxu1 %v10054_v53  ;;  %v8098_v53 = vld [vmem:[%s14614_s5 + $0x88] sm:$0xff] }
 0x3fd   : > { %7723 = vmatpush1.bf16.msra.mxu0 %v10051_v30  ;;  %v10325_v30 = vpack.c.bf16 %v8098_v53, %v8097_v26  ;;  %v8139_v26 = vld [vmem:[%s14614_s5 + $0x1d0] sm:$0xff]  ;;  %v8140_v53 = vld [vmem:[%s14614_s5 + $0x1d8] sm:$0xff] }
 0x3fe   : > { %7849 = vmatpush1.bf16.msra.mxu1 %v10053_v0  ;;  %7724 = vmatprep.subr.bf16.mxu0 %v10060_v32  ;;  %v10357_v0 = vpack.c.bf16 %v8130_v21, %v8129_v8  ;;  %v8081_v32 = vld [vmem:[%s14614_s5] sm:$0xff] }
 0x3ff   : > { %7850 = vmatprep.subr.bf16.mxu1 %v10062_v7  ;;  %v8082_v7 = vld [vmem:[%s14614_s5 + $0x8] sm:$0xff] }
 0x401   : > { %7725 = vmatpush1.bf16.msra.mxu0 %v10059_v27  ;;  %v8131_v27 = vld [vmem:[%s14614_s5 + $0x190] sm:$0xff] }
 0x402   : > { %7851 = vmatpush1.bf16.msra.mxu1 %v10061_v23  ;;  %7726 = vmatprep.subr.bf16.mxu0 %v10068_v56  ;;  %v8132_v23 = vld [vmem:[%s14614_s5 + $0x198] sm:$0xff]  ;;  %v10327_v56 = vpack.c.bf16 %v8082_v7, %v8081_v32  ;;  %v10377_v32 = vpack.c.bf16 %v8140_v53, %v8139_v26 }
 0x403   : > { %7852 = vmatprep.subr.bf16.mxu1 %v10070_v25  ;;  %v10359_v25 = vpack.c.bf16 %v8114_v17, %v8113_v14  ;;  %v8124_v7 = vld [vmem:[%s14614_s5 + $0x158] sm:$0xff]  ;;  %v8109_v14 = vld [vmem:[%s14614_s5 + $0xe0] sm:$0xff]  ;;  %v8110_v17 = vld [vmem:[%s14614_s5 + $0xe8] sm:$0xff] }
 0x405   : > { %7727 = vmatpush1.bf16.msra.mxu0 %v10067_v61  ;;  %v10361_v61 = vpack.c.bf16 %v8132_v23, %v8131_v27 }
 0x406   : > { %7853 = vmatpush1.bf16.msra.mxu1 %v10069_v15  ;;  %7728 = vmatprep.subr.bf16.mxu0 %v10076_v11  ;;  %v8116_v15 = vld [vmem:[%s14614_s5 + $0x118] sm:$0xff]  ;;  %v8101_v11 = vld [vmem:[%s14614_s5 + $0xa0] sm:$0xff] }
 0x407   : > { %7854 = vmatprep.subr.bf16.mxu1 %v10078_v34  ;;  %v8102_v34 = vld [vmem:[%s14614_s5 + $0xa8] sm:$0xff]  ;;  %v10363_v18 = vpack.c.bf16 %v8116_v15, %v8115_v16  ;;  %v8111_v16 = vld [vmem:[%s14614_s5 + $0xf0] sm:$0xff] }
 0x408   : > { %v8143_v15 = vld [vmem:[%s14614_s5 + $0x1f0] sm:$0xff] }
 0x409   : > { %7729 = vmatpush1.bf16.msra.mxu0 %v10075_v38  ;;  %v10333_v38 = vpack.c.bf16 %v8102_v34, %v8101_v11  ;;  %v8144_v11 = vld [vmem:[%s14614_s5 + $0x1f8] sm:$0xff] }
 0x40a   : > { %7855 = vmatpush1.bf16.msra.mxu1 %v10077_v37  ;;  %7730 = vmatprep.subr.bf16.mxu0 %v10084_v55  ;;  %v8086_v37 = vld [vmem:[%s14614_s5 + $0x28] sm:$0xff]  ;;  %v8117_v55 = vld [vmem:[%s14614_s5 + $0x120] sm:$0xff] }
 0x40b   : > { %7856 = vmatprep.subr.bf16.mxu1 %v10086_v6  ;;  %v8118_v6 = vld [vmem:[%s14614_s5 + $0x128] sm:$0xff] }
 0x40d   : > { %7731 = vmatpush1.bf16.msra.mxu0 %v10083_v24 }
 0x40e   : > { %7857 = vmatpush1.bf16.msra.mxu1 %v10085_v19  ;;  %7732 = vmatprep.subr.bf16.mxu0 %v10092_v40  ;;  %v10367_v19 = vpack.c.bf16 %v8118_v6, %v8117_v55  ;;  %v10337_v40 = vpack.c.bf16 %v8104_v22, %v8103_v46  ;;  %v8161_v55 = vld [vmem:[%s14614_s5 + $0x280] sm:$0xff]  ;;  %v8194_v46 = vld [vmem:[%s14614_s5 + $0x388] sm:$0xff] }
 0x40f   : > { %7858 = vmatprep.subr.bf16.mxu1 %v10094_v59  ;;  %v8087_v59 = vld [vmem:[%s14614_s5 + $0x30] sm:$0xff]  ;;  %v8193_v6 = vld [vmem:[%s14614_s5 + $0x380] sm:$0xff] }
 0x410   : > { %v10339_v60 = vpack.c.bf16 %v8088_v35, %v8087_v59  ;;  %v14640_v35 = vsub.s32 2, %v11384_v5 }
 0x411   : > { %7733 = vmatpush1.bf16.msra.mxu0 %v10091_v12  ;;  %v8105_v12 = vld [vmem:[%s14614_s5 + $0xc0] sm:$0xff] }
 0x412   : > { %7859 = vmatpush1.bf16.msra.mxu1 %v10093_v1  ;;  %7734 = vmatprep.subr.bf16.mxu0 %v10100_v41  ;;  %v8106_v1 = vld [vmem:[%s14614_s5 + $0xc8] sm:$0xff]  ;;  %v8137_v41 = vld [vmem:[%s14614_s5 + $0x1c0] sm:$0xff] }
 0x413   : > { %7860 = vmatprep.subr.bf16.mxu1 %v10102_v33  ;;  %v8138_v33 = vld [vmem:[%s14614_s5 + $0x1c8] sm:$0xff]  ;;  %v10341_v42 = vpack.c.bf16 %v8106_v1, %v8105_v12  ;;  %v14642_v12 = vsub.s32 3, %v11384_v5 }
 0x415   : > { %7735 = vmatpush1.bf16.msra.mxu0 %v10099_v57  ;;  %v8121_v57 = vld [vmem:[%s14614_s5 + $0x140] sm:$0xff] }
 0x416   : > { %7861 = vmatpush1.bf16.msra.mxu1 %v10101_v36  ;;  %7736 = vmatprep.subr.bf16.mxu0 %v10108_v9  ;;  %v8122_v36 = vld [vmem:[%s14614_s5 + $0x148] sm:$0xff]  ;;  %v8107_v9 = vld [vmem:[%s14614_s5 + $0xd0] sm:$0xff] }
 0x417   : > { %7862 = vmatprep.subr.bf16.mxu1 %v10110_v52  ;;  %v8108_v52 = vld [vmem:[%s14614_s5 + $0xd8] sm:$0xff]  ;;  %v10375_v21 = vpack.c.bf16 %v8122_v36, %v8121_v57  ;;  %v8178_v57 = vld [vmem:[%s14614_s5 + $0x308] sm:$0xff] }
 0x419   : > { %7737 = vmatpush1.bf16.msra.mxu0 %v10107_v44  ;;  %v10345_v44 = vpack.c.bf16 %v8108_v52, %v8107_v9 }
 0x41a   : > { %7863 = vmatpush1.bf16.msra.mxu1 %v10109_v47  ;;  %10326 = vmatprep.subr.bf16.mxu0 %v10325_v30  ;;  %v8091_v47 = vld [vmem:[%s14614_s5 + $0x50] sm:$0xff]  ;;  %v8092_v30 = vld [vmem:[%s14614_s5 + $0x58] sm:$0xff] }
 0x41b   : > { %10358 = vmatprep.subr.bf16.mxu1 %v10357_v0  ;;  %v8123_v0 = vld [vmem:[%s14614_s5 + $0x150] sm:$0xff]  ;;  %v10347_v27 = vpack.c.bf16 %v8092_v30, %v8091_v47 }
 0x41c   : > { %7739 = vmatmul.mubr.bf16.vlgmr.msra.gmra.mrb[24].mxu0 %v11989_v45  ;;  %v10379_v23 = vpack.c.bf16 %v8124_v7, %v8123_v0 }
 0x41d   : > { %7865 = vmatmul.mubr.bf16.vlgmr.msra.gmra.mrb[24].mxu1 %v11989_v45  ;;  %7748 = vmatprep.mubr.bf16.mxu0 %v12004_v54  ;;  %v8085_v45 = vld [vmem:[%s14614_s5 + $0x20] sm:$0xff] }
 0x41e   : > { %7874 = vmatprep.mubr.bf16.mxu1 %v12004_v54  ;;  %10328 = vmatpush3.bf16.msra.mxu0 %v10327_v56  ;;  %v10365_v54 = vpack.c.bf16 %v8134_v62, %v8133_v48  ;;  %v10335_v24 = vpack.c.bf16 %v8086_v37, %v8085_v45  ;;  %v10349_v56 = vpack.c.bf16 %v8110_v17, %v8109_v14  ;;  %v8128_v37 = vld [vmem:[%s14614_s5 + $0x178] sm:$0xff]  ;;  %v8195_v14 = vld [vmem:[%s14614_s5 + $0x390] sm:$0xff] }
 0x41f   : > { %10360 = vmatpush3.bf16.msra.mxu1 %v10359_v25  ;;  %10330 = vmatprep.subr.bf16.mxu0 %v10329_v63  ;;  %v8093_v25 = vld [vmem:[%s14614_s5 + $0x60] sm:$0xff]  ;;  %v10385_v45 = vpack.c.bf16 %v8144_v11, %v8143_v15  ;;  %v8196_v17 = vld [vmem:[%s14614_s5 + $0x398] sm:$0xff]  ;;  %v8179_v15 = vld [vmem:[%s14614_s5 + $0x310] sm:$0xff] }
 0x420   : > { %10362 = vmatprep.subr.bf16.mxu1 %v10361_v61  ;;  %v8125_v63 = vld [vmem:[%s14614_s5 + $0x160] sm:$0xff]  ;;  %v8112_v61 = vld [vmem:[%s14614_s5 + $0xf8] sm:$0xff] }
 0x421   : > { %v10383_v48 = vpack.c.bf16 %v8126_v58, %v8125_v63  ;;  %v10353_v62 = vpack.c.bf16 %v8112_v61, %v8111_v16  ;;  %v8148_v58 = vld [vmem:[%s14614_s5 + $0x218] sm:$0xff]  ;;  %v10425_v61 = vpack.c.bf16 %v8196_v17, %v8195_v14  ;;  %v8151_v14 = vld [vmem:[%s14614_s5 + $0x230] sm:$0xff] }
 0x422   : > { %10332 = vmatpush3.bf16.msra.mxu0 %v10331_v2  ;;  %v8095_v2 = vld [vmem:[%s14614_s5 + $0x70] sm:$0xff]  ;;  %v8180_v11 = vld [vmem:[%s14614_s5 + $0x318] sm:$0xff] }
 0x423   : > { %10364 = vmatpush3.bf16.msra.mxu1 %v10363_v18  ;;  %10334 = vmatprep.subr.bf16.mxu0 %v10333_v38  ;;  %v8096_v18 = vld [vmem:[%s14614_s5 + $0x78] sm:$0xff]  ;;  %v8127_v38 = vld [vmem:[%s14614_s5 + $0x170] sm:$0xff] }
 0x424   : > { %7749 = vmatmul.mubr.bf16.gmra.mrb[28].mxu0 %v12006_v39  ;;  %10366 = vmatprep.subr.bf16.mxu1 %v10365_v54  ;;  %v8162_v54 = vld [vmem:[%s14614_s5 + $0x288] sm:$0xff]  ;;  %v10355_v22 = vpack.c.bf16 %v8096_v18, %v8095_v2  ;;  %v10387_v20 = vpack.c.bf16 %v8128_v37, %v8127_v38  ;;  %v8152_v17 = vld [vmem:[%s14614_s5 + $0x238] sm:$0xff] }
 0x425   : > { %7875 = vmatmul.mubr.bf16.gmra.mrb[28].mxu1 %v12006_v39  ;;  %7758 = vmatprep.mubr.bf16.mxu0 %v12021_v29  ;;  %v8089_v39 = vld [vmem:[%s14614_s5 + $0x40] sm:$0xff]  ;;  %v10389_v13 = vpack.c.bf16 %v8162_v54, %v8161_v55  ;;  %v8166_v37 = vld [vmem:[%s14614_s5 + $0x2a8] sm:$0xff] }
 0x426   : > { %7884 = vmatprep.mubr.bf16.mxu1 %v12021_v29  ;;  %10336 = vmatpush3.bf16.msra.mxu0 %v10335_v24  ;;  %v10373_v29 = vpack.c.bf16 %v8138_v33, %v8137_v41  ;;  %v10343_v8 = vpack.c.bf16 %v8090_v31, %v8089_v39  ;;  %v10421_v24 = vpack.c.bf16 %v8194_v46, %v8193_v6  ;;  %v8145_v33 = vld [vmem:[%s14614_s5 + $0x200] sm:$0xff]  ;;  %v8146_v39 = vld [vmem:[%s14614_s5 + $0x208] sm:$0xff] }
 0x427   : > { %10368 = vmatpush3.bf16.msra.mxu1 %v10367_v19  ;;  %10338 = vmatprep.subr.bf16.mxu0 %v10337_v40  ;;  %v14318_v19 = vld [vmem:[%s14613_s4] sm:$0xff]  ;;  %v14639_v40 = vsub.s32 0, %v11384_v5  ;;  %v14401_v54 = vld [vmem:[%s14614_s5 + $0x3a8] sm:$0xff] }
 0x428   : > { %10370 = vmatprep.subr.bf16.mxu1 %v10369_v50  ;;  %v14328_v51 = vrot.slane %v14318_v19, %v14640_v35  ;;  %v14641_v50 = vsub.s32 1, %v11384_v5  ;;  %v14338_v1 = vrot.slane %v14318_v19, %v14642_v12  ;;  %v8177_v31 = vld [vmem:[%s14614_s5 + $0x300] sm:$0xff] }
 0x429   : > { %v14323_v59 = vrot.slane %v14318_v19, %v14639_v40  ;;  %v10423_v7 = vpack.c.bf16 %v8178_v57, %v8177_v31  ;;  %v14396_v55 = vld [vmem:[%s14614_s5 + $0x3a0] sm:$0xff]  ;;  %v8182_v57 = vld [vmem:[%s14614_s5 + $0x328] sm:$0xff] }
 0x42a   : > { %10340 = vmatpush3.bf16.msra.mxu0 %v10339_v60  ;;  %v14333_v4 = vrot.slane %v14318_v19, %v14641_v50  ;;  %v8149_v12 = vld [vmem:[%s14614_s5 + $0x220] sm:$0xff] }
 0x42b   : > { %10372 = vmatpush3.bf16.msra.mxu1 %v10371_v43  ;;  %10342 = vmatprep.subr.bf16.mxu0 %v10341_v42  ;;  %v8181_v31 = vld [vmem:[%s14614_s5 + $0x320] sm:$0xff] }
 0x42c   : > { %7759 = vmatmul.mubr.bf16.gmra.mrb[32].mxu0 %v12023_v3  ;;  %10374 = vmatprep.subr.bf16.mxu1 %v10373_v29 }
 0x42d   : > { %7885 = vmatmul.mubr.bf16.gmra.mrb[32].mxu1 %v12023_v3  ;;  %v8094_v3 = vld [vmem:[%s14614_s5 + $0x68] sm:$0xff] }
 0x42e   : > { %10344 = vmatpush3.bf16.msra.mxu0 %v10343_v8  ;;  %v10351_v34 = vpack.c.bf16 %v8094_v3, %v8093_v25 }
 0x42f   : > { %10376 = vmatpush3.bf16.msra.mxu1 %v10375_v21  ;;  %10346 = vmatprep.subr.bf16.mxu0 %v10345_v44  ;;  %v8163_v21 = vld [vmem:[%s14614_s5 + $0x290] sm:$0xff]  ;;  %v8164_v44 = vld [vmem:[%s14614_s5 + $0x298] sm:$0xff] }
 0x430   : > { %10378 = vmatprep.subr.bf16.mxu1 %v10377_v32  ;;  %v10391_v32 = vpack.c.bf16 %v8146_v39, %v8145_v33  ;;  %v10393_v63 = vpack.c.bf16 %v8164_v44, %v8163_v21  ;;  %v10429_v39 = vpack.c.bf16 %v14401_v54, %v14396_v55 }
 0x432   : > { %10348 = vmatpush3.bf16.msra.mxu0 %v10347_v27 }
 0x433   : > { %10380 = vmatpush3.bf16.msra.mxu1 %v10379_v23  ;;  %10350 = vmatprep.subr.bf16.mxu0 %v10349_v56 }
 0x434   : > { %10382 = vmatprep.subr.bf16.mxu1 %v10381_v28  ;;  %v8147_v28 = vld [vmem:[%s14614_s5 + $0x210] sm:$0xff] }
 0x436   : > { %10352 = vmatpush3.bf16.msra.mxu0 %v10351_v34 }
 0x437   : > { %10384 = vmatpush3.bf16.msra.mxu1 %v10383_v48  ;;  %10354 = vmatprep.subr.bf16.mxu0 %v10353_v62  ;;  %v14387_v48 = vld [vmem:[%s14614_s5 + $0x2a0] sm:$0xff] }
 0x438   : > { %10386 = vmatprep.subr.bf16.mxu1 %v10385_v45  ;;  %v10395_v45 = vpack.c.bf16 %v8148_v58, %v8147_v28  ;;  %v8184_v28 = vld [vmem:[%s14614_s5 + $0x338] sm:$0xff]  ;;  %v8169_v58 = vld [vmem:[%s14614_s5 + $0x2c0] sm:$0xff] }
 0x43a   : > { %10356 = vmatpush3.bf16.msra.mxu0 %v10355_v22 }
 0x43b   : > { %10388 = vmatpush3.bf16.msra.mxu1 %v10387_v20  ;;  %10390 = vmatprep.subr.bf16.mxu0 %v10389_v13 }
 0x43c   : > { %10422 = vmatprep.subr.bf16.mxu1 %v10421_v24  ;;  %v10427_v24 = vpack.c.bf16 %v8180_v11, %v8179_v15 }
 0x46d   : > { %v7488_v41 = vpop.f32.mrb[12].mxu0 }
 0x46e   : > { %v7985_v60 = vadd.f32 %v14323_v59, %v7488_v41  ;;  %v7614_v43 = vpop.f32.mrb[12].mxu1  ;;  %v7490_v42 = vpop.f32.mrb[13].mxu0  ;;  %v8150_v41 = vld [vmem:[%s14614_s5 + $0x228] sm:$0xff] }
 0x46f   : > { %v7987_v29 = vadd.f32 %v14328_v51, %v7614_v43  ;;  %v7986_v36 = vadd.f32 %v14333_v4, %v7490_v42  ;;  %v7616_v9 = vpop.f32.mrb[13].mxu1  ;;  %v7492_v52 = vpop.f32.mrb[14].mxu0  ;;  %v10397_v42 = vpack.c.bf16 %v8166_v37, %v14387_v48  ;;  %v8202_v37 = vld [vmem:[%s14614_s5 + $0x3c8] sm:$0xff] }
 0x470   : > { %v7988_v26 = vadd.f32 %v14338_v1, %v7616_v9  ;;  %v7618_v53 = vpop.f32.mrb[14].mxu1  ;;  %v7494_v8 = vpop.f32.mrb[15].mxu0  ;;  %v8033_v49 = vmax.f32 %v7985_v60, 0.0  ;;  %v7993_v27 = vadd.f32 %v14323_v59, %v7492_v52 }
 0x471   : > { %v8034_v47 = vmax.f32 %v7986_v36, 0.0  ;;  %v7994_v30 = vadd.f32 %v14333_v4, %v7494_v8  ;;  %v7620_v0 = vpop.f32.mrb[15].mxu1  ;;  %v8035_v56 = vmax.f32 %v7987_v29, 0.0  ;;  %v7995_v25 = vadd.f32 %v14328_v51, %v7618_v53  ;;  %v8168_v53 = vld [vmem:[%s14614_s5 + $0x2b8] sm:$0xff] }
 0x472   : > { %v8036_v10 = vmax.f32 %v7988_v26, 0.0  ;;  %v7996_v23 = vadd.f32 %v14338_v1, %v7620_v0  ;;  %v8041_v62 = vmax.f32 %v7993_v27, 0.0  ;;  %v8167_v26 = vld [vmem:[%s14614_s5 + $0x2b0] sm:$0xff]  ;;  %v8200_v0 = vld [vmem:[%s14614_s5 + $0x3b8] sm:$0xff] }
 0x473   : > { %v8042_v3 = vmax.f32 %v7994_v30, 0.0  ;;  %8273 = vmatprep.mubr.f32.mxu0 %v8034_v47  ;;  %v8043_v6 = vmax.f32 %v7995_v25, 0.0  ;;  %v10399_v47 = vpack.c.bf16 %v8150_v41, %v8149_v12  ;;  %v8199_v30 = vld [vmem:[%s14614_s5 + $0x3b0] sm:$0xff] }
 0x474   : > { %v8044_v16 = vmax.f32 %v7996_v23, 0.0  ;;  %8368 = vmatprep.mubr.f32.mxu1 %v8036_v10  ;;  %8274 = vmatmul.mubr.f32.vlgmr.msra.gmra.mrb[36].mxu0 %v8033_v49  ;;  %v10401_v10 = vpack.c.bf16 %v8168_v53, %v8167_v26  ;;  %v8183_v27 = vld [vmem:[%s14614_s5 + $0x330] sm:$0xff] }
 0x475   : > { %8369 = vmatmul.mubr.f32.vlgmr.msra.gmra.mrb[36].mxu1 %v8035_v56  ;;  %v7498_v34 = vpop.f32.mrb[16].mxu0  ;;  %8278 = vmatprep.mubr.f32.mxu0 %v8042_v3  ;;  %v8187_v26 = vld [vmem:[%s14614_s5 + $0x350] sm:$0xff] }
 0x476   : > { %v8001_v2 = vadd.f32 %v14323_v59, %v7498_v34  ;;  %v7624_v18 = vpop.f32.mrb[16].mxu1  ;;  %8373 = vmatprep.mubr.f32.mxu1 %v8044_v16  ;;  %v7500_v38 = vpop.f32.mrb[17].mxu0  ;;  %10392 = vmatpush3.bf16.msra.mxu0 %v10391_v32  ;;  %v8170_v16 = vld [vmem:[%s14614_s5 + $0x2c8] sm:$0xff] }
 0x477   : > { %v8003_v46 = vadd.f32 %v14328_v51, %v7624_v18  ;;  %v8002_v22 = vadd.f32 %v14333_v4, %v7500_v38  ;;  %v7626_v20 = vpop.f32.mrb[17].mxu1  ;;  %v7502_v13 = vpop.f32.mrb[18].mxu0  ;;  %10424 = vmatpush3.bf16.msra.mxu1 %v10423_v7  ;;  %10394 = vmatprep.subr.bf16.mxu0 %v10393_v63  ;;  %v10431_v7 = vpack.c.bf16 %v8182_v57, %v8181_v31 }
 0x478   : > { %v8004_v40 = vadd.f32 %v14338_v1, %v7626_v20  ;;  %v7628_v35 = vpop.f32.mrb[18].mxu1  ;;  %v7504_v50 = vpop.f32.mrb[19].mxu0  ;;  %8279 = vmatmul.mubr.f32.gmra.mrb[38].mxu0 %v8041_v62  ;;  %10426 = vmatprep.subr.bf16.mxu1 %v10425_v61  ;;  %v8049_v29 = vmax.f32 %v8001_v2, 0.0  ;;  %v8009_v9 = vadd.f32 %v14323_v59, %v7502_v13  ;;  %v10433_v63 = vpack.c.bf16 %v8200_v0, %v8199_v30  ;;  %v8205_v30 = vld [vmem:[%s14614_s5 + $0x3e0] sm:$0xff]  ;;  %v8206_v0 = vld [vmem:[%s14614_s5 + $0x3e8] sm:$0xff] }
 0x479   : > { %v8050_v33 = vmax.f32 %v8002_v22, 0.0  ;;  %v8010_v60 = vadd.f32 %v14333_v4, %v7504_v50  ;;  %v7630_v43 = vpop.f32.mrb[19].mxu1  ;;  %8374 = vmatmul.mubr.f32.gmra.mrb[38].mxu1 %v8043_v6  ;;  %v8051_v8 = vmax.f32 %v8003_v46, 0.0  ;;  %v8011_v21 = vadd.f32 %v14328_v51, %v7628_v35  ;;  %v8153_v35 = vld [vmem:[%s14614_s5 + $0x240] sm:$0xff] }
 0x47a   : > { %v8052_v36 = vmax.f32 %v8004_v40, 0.0  ;;  %v8012_v52 = vadd.f32 %v14338_v1, %v7630_v43  ;;  %10396 = vmatpush3.bf16.msra.mxu0 %v10395_v45  ;;  %v8057_v23 = vmax.f32 %v8009_v9, 0.0  ;;  %v10403_v62 = vpack.c.bf16 %v8152_v17, %v8151_v14  ;;  %v8201_v45 = vld [vmem:[%s14614_s5 + $0x3c0] sm:$0xff]  ;;  %v8172_v43 = vld [vmem:[%s14614_s5 + $0x2d8] sm:$0xff]  ;;  %v8155_v9 = vld [vmem:[%s14614_s5 + $0x250] sm:$0xff] }
 0x47b   : > { %v8058_v44 = vmax.f32 %v8010_v60, 0.0  ;;  %8283 = vmatprep.mubr.f32.mxu0 %v8050_v33  ;;  %10428 = vmatpush3.bf16.msra.mxu1 %v10427_v24  ;;  %v8059_v61 = vmax.f32 %v8011_v21, 0.0  ;;  %v10435_v46 = vpack.c.bf16 %v8184_v28, %v8183_v27  ;;  %v10405_v22 = vpack.c.bf16 %v8170_v16, %v8169_v58  ;;  %v8185_v50 = vld [vmem:[%s14614_s5 + $0x340] sm:$0xff]  ;;  %v8171_v60 = vld [vmem:[%s14614_s5 + $0x2d0] sm:$0xff]  ;;  %v8188_v21 = vld [vmem:[%s14614_s5 + $0x358] sm:$0xff] }
 0x47c   : > { %v8060_v32 = vmax.f32 %v8012_v52, 0.0  ;;  %8378 = vmatprep.mubr.f32.mxu1 %v8052_v36  ;;  %8284 = vmatmul.mubr.f32.gmra.mrb[40].mxu0 %v8049_v29  ;;  %v10409_v36 = vpack.c.bf16 %v8172_v43, %v8171_v60  ;;  %v8156_v52 = vld [vmem:[%s14614_s5 + $0x258] sm:$0xff]  ;;  %v8157_v17 = vld [vmem:[%s14614_s5 + $0x260] sm:$0xff]  ;;  %v10445_v27 = vpack.c.bf16 %v8206_v0, %v8205_v30 }
 0x47d   : > { %8379 = vmatmul.mubr.f32.gmra.mrb[40].mxu1 %v8051_v8  ;;  %v7508_v49 = vpop.f32.mrb[20].mxu0  ;;  %8288 = vmatprep.mubr.f32.mxu0 %v8058_v44  ;;  %v8173_v44 = vld [vmem:[%s14614_s5 + $0x2e0] sm:$0xff] }
 0x47e   : > { %v8017_v56 = vadd.f32 %v14323_v59, %v7508_v49  ;;  %v7634_v25 = vpop.f32.mrb[20].mxu1  ;;  %8383 = vmatprep.mubr.f32.mxu1 %v8060_v32  ;;  %v7510_v3 = vpop.f32.mrb[21].mxu0  ;;  %10398 = vmatprep.subr.bf16.mxu0 %v10397_v42  ;;  %v10411_v32 = vpack.c.bf16 %v8156_v52, %v8155_v9  ;;  %v8158_v49 = vld [vmem:[%s14614_s5 + $0x268] sm:$0xff] }
 0x47f   : > { %v8019_v15 = vadd.f32 %v14328_v51, %v7634_v25  ;;  %v8018_v11 = vadd.f32 %v14333_v4, %v7510_v3  ;;  %v7636_v34 = vpop.f32.mrb[21].mxu1  ;;  %v7512_v48 = vpop.f32.mrb[22].mxu0  ;;  %10430 = vmatprep.subr.bf16.mxu1 %v10429_v39  ;;  %10400 = vmatpush3.bf16.msra.mxu0 %v10399_v47  ;;  %v8204_v39 = vld [vmem:[%s14614_s5 + $0x3d8] sm:$0xff]  ;;  %v8174_v47 = vld [vmem:[%s14614_s5 + $0x2e8] sm:$0xff]  ;;  %v8207_v3 = vld [vmem:[%s14614_s5 + $0x3f0] sm:$0xff]  ;;  %v10415_v28 = vpack.c.bf16 %v8158_v49, %v8157_v17 }
 0x480   : > { %v8020_v2 = vadd.f32 %v14338_v1, %v7636_v34  ;;  %v7638_v18 = vpop.f32.mrb[22].mxu1  ;;  %v7514_v38 = vpop.f32.mrb[23].mxu0  ;;  %8289 = vmatmul.mubr.f32.gmra.mrb[42].mxu0 %v8057_v23  ;;  %10432 = vmatpush3.bf16.msra.mxu1 %v10431_v7  ;;  %v8065_v20 = vmax.f32 %v8017_v56, 0.0  ;;  %v8025_v24 = vadd.f32 %v14323_v59, %v7512_v48  ;;  %v10437_v59 = vpack.c.bf16 %v8202_v37, %v8201_v45  ;;  %v8190_v23 = vld [vmem:[%s14614_s5 + $0x368] sm:$0xff]  ;;  %v8175_v56 = vld [vmem:[%s14614_s5 + $0x2f0] sm:$0xff]  ;;  %v8176_v25 = vld [vmem:[%s14614_s5 + $0x2f8] sm:$0xff] }
 0x481   : > { %v8066_v55 = vmax.f32 %v8018_v11, 0.0  ;;  %v8026_v54 = vadd.f32 %v14333_v4, %v7514_v38  ;;  %v7640_v6 = vpop.f32.mrb[23].mxu1  ;;  %8384 = vmatmul.mubr.f32.gmra.mrb[42].mxu1 %v8059_v61  ;;  %10402 = vmatprep.subr.bf16.mxu0 %v10401_v10  ;;  %v8154_v4 = vld [vmem:[%s14614_s5 + $0x248] sm:$0xff]  ;;  %v8067_v12 = vmax.f32 %v8019_v15, 0.0  ;;  %v8027_v41 = vadd.f32 %v14328_v51, %v7638_v18  ;;  %v8203_v51 = vld [vmem:[%s14614_s5 + $0x3d0] sm:$0xff]  ;;  %v8189_v10 = vld [vmem:[%s14614_s5 + $0x360] sm:$0xff] }
 0x482   : > { %v8068_v13 = vmax.f32 %v8020_v2, 0.0  ;;  %v8028_v40 = vadd.f32 %v14338_v1, %v7640_v6  ;;  %10434 = vmatprep.subr.bf16.mxu1 %v10433_v63  ;;  %v8186_v1 = vld [vmem:[%s14614_s5 + $0x348] sm:$0xff]  ;;  %v10407_v31 = vpack.c.bf16 %v8154_v4, %v8153_v35  ;;  %v8073_v57 = vmax.f32 %v8025_v24, 0.0  ;;  %v8208_v63 = vld [vmem:[%s14614_s5 + $0x3f8] sm:$0xff]  ;;  %v8159_v61 = vld [vmem:[%s14614_s5 + $0x270] sm:$0xff] }
 0x483   : > { %v8074_v33 = vmax.f32 %v8026_v54, 0.0  ;;  %8293 = vmatprep.mubr.f32.mxu0 %v8066_v55  ;;  %10404 = vmatpush3.bf16.msra.mxu0 %v10403_v62  ;;  %v10439_v29 = vpack.c.bf16 %v8186_v1, %v8185_v50  ;;  %v8075_v53 = vmax.f32 %v8027_v41, 0.0  ;;  %v10441_v8 = vpack.c.bf16 %v8204_v39, %v8203_v51  ;;  %v8160_v15 = vld [vmem:[%s14614_s5 + $0x278] sm:$0xff]  ;;  %v8191_v34 = vld [vmem:[%s14614_s5 + $0x370] sm:$0xff] }
 0x484   : > { %v8076_v42 = vmax.f32 %v8028_v40, 0.0  ;;  %8388 = vmatprep.mubr.f32.mxu1 %v8068_v13  ;;  %8294 = vmatmul.mubr.f32.gmra.mrb[44].mxu0 %v8065_v20  ;;  %v10443_v7 = vpack.c.bf16 %v8188_v21, %v8187_v26  ;;  %v10413_v14 = vpack.c.bf16 %v8174_v47, %v8173_v44  ;;  %v10447_v58 = vpack.c.bf16 %v8190_v23, %v8189_v10  ;;  %v8192_v48 = vld [vmem:[%s14614_s5 + $0x378] sm:$0xff] }
 0x485   : > { %8389 = vmatmul.mubr.f32.gmra.mrb[44].mxu1 %v8067_v12  ;;  %8298 = vmatprep.mubr.f32.mxu0 %v8074_v33  ;;  %v10417_v16 = vpack.c.bf16 %v8176_v25, %v8175_v56  ;;  %v10449_v11 = vpack.c.bf16 %v8208_v63, %v8207_v3  ;;  %v10419_v62 = vpack.c.bf16 %v8160_v15, %v8159_v61  ;;  %v7963_v18 = vsub.s32 4, %v11384_v5 }
 0x486   : > { %8393 = vmatprep.mubr.f32.mxu1 %v8076_v42  ;;  %10436 = vmatpush3.bf16.msra.mxu1 %v10435_v46  ;;  %v10451_v2 = vpack.c.bf16 %v8192_v48, %v8191_v34  ;;  %v7971_v38 = vsub.s32 6, %v11384_v5  ;;  %v7967_v45 = vsub.s32 5, %v11384_v5  ;;  %v7975_v37 = vsub.s32 7, %v11384_v5 }
 0x487   : > { %10406 = vmatprep.subr.bf16.mxu0 %v10405_v22  ;;  %10438 = vmatprep.subr.bf16.mxu1 %v10437_v59  ;;  %v14558_v55 = vrot.slane %v14318_v19, %v7963_v18 }
 0x488   : > { %8299 = vmatmul.mubr.f32.gmra.mrb[46].mxu0 %v8073_v57  ;;  %v14561_v54 = vrot.slane %v14318_v19, %v7971_v38  ;;  %v14564_v6 = vrot.slane %v14318_v19, %v7967_v45  ;;  %v14567_v46 = vrot.slane %v14318_v19, %v7975_v37 }
 0x489   : > { %8394 = vmatmul.mubr.f32.gmra.mrb[46].mxu1 %v8075_v53  ;;  %10408 = vmatpush3.bf16.msra.mxu0 %v10407_v31 }
 0x48a   : > { %10440 = vmatpush3.bf16.msra.mxu1 %v10439_v29  ;;  %10410 = vmatprep.subr.bf16.mxu0 %v10409_v36 }
 0x48b   : > { %10442 = vmatprep.subr.bf16.mxu1 %v10441_v8 }
 0x48d   : > { %10412 = vmatpush3.bf16.msra.mxu0 %v10411_v32 }
 0x48e   : > { %10444 = vmatpush3.bf16.msra.mxu1 %v10443_v7  ;;  %10414 = vmatprep.subr.bf16.mxu0 %v10413_v14 }
 0x48f   : > { %10446 = vmatprep.subr.bf16.mxu1 %v10445_v27 }
 0x491   : > { %10416 = vmatpush3.bf16.msra.mxu0 %v10415_v28 }
 0x492   : > { %10448 = vmatpush3.bf16.msra.mxu1 %v10447_v58  ;;  %10418 = vmatprep.subr.bf16.mxu0 %v10417_v16 }
 0x493   : > { %10450 = vmatprep.subr.bf16.mxu1 %v10449_v11 }
 0x495   : > { %10420 = vmatpush3.bf16.msra.mxu0 %v10419_v62 }
 0x496   : > { %10452 = vmatpush3.bf16.msra.mxu1 %v10451_v2 }
 0x4ef   : > { %v7740_v22 = vpop.f32.mrb[24].mxu0 }
 0x4f0   : > { %v7989_v20 = vadd.f32 %v14558_v55, %v7740_v22  ;;  %v7866_v13 = vpop.f32.mrb[24].mxu1  ;;  %v7742_v24 = vpop.f32.mrb[25].mxu0 }
 0x4f1   : > { %v7991_v40 = vadd.f32 %v14561_v54, %v7866_v13  ;;  %v7990_v5 = vadd.f32 %v14564_v6, %v7742_v24  ;;  %v7868_v35 = vpop.f32.mrb[25].mxu1  ;;  %v7744_v4 = vpop.f32.mrb[26].mxu0 }
 0x4f2   : > { %v7992_v50 = vadd.f32 %v14567_v46, %v7868_v35  ;;  %v7870_v12 = vpop.f32.mrb[26].mxu1  ;;  %v7746_v41 = vpop.f32.mrb[27].mxu0  ;;  %v8037_v1 = vmax.f32 %v7989_v20, 0.0  ;;  %v7997_v43 = vadd.f32 %v14558_v55, %v7744_v4 }
 0x4f3   : > { %v8038_v33 = vmax.f32 %v7990_v5, 0.0  ;;  %v7998_v59 = vadd.f32 %v14564_v6, %v7746_v41  ;;  %v7872_v19 = vpop.f32.mrb[27].mxu1  ;;  %v8039_v51 = vmax.f32 %v7991_v40, 0.0  ;;  %v7999_v39 = vadd.f32 %v14561_v54, %v7870_v12 }
 0x4f4   : > { %v8040_v60 = vmax.f32 %v7992_v50, 0.0  ;;  %v8000_v42 = vadd.f32 %v14567_v46, %v7872_v19  ;;  %v8045_v36 = vmax.f32 %v7997_v43, 0.0 }
 0x4f5   : > { %v8046_v31 = vmax.f32 %v7998_v59, 0.0  ;;  %8463 = vmatprep.mubr.f32.mxu0 %v8038_v33  ;;  %v8047_v53 = vmax.f32 %v7999_v39, 0.0 }
 0x4f6   : > { %v8048_v57 = vmax.f32 %v8000_v42, 0.0  ;;  %8558 = vmatprep.mubr.f32.mxu1 %v8040_v60  ;;  %8464 = vmatmul.mubr.f32.vlgmr.msra.gmra.mrb[48].mxu0 %v8037_v1 }
 0x4f7   : > { %8559 = vmatmul.mubr.f32.vlgmr.msra.gmra.mrb[48].mxu1 %v8039_v51  ;;  %v7750_v29 = vpop.f32.mrb[28].mxu0  ;;  %8468 = vmatprep.mubr.f32.mxu0 %v8046_v31 }
 0x4f8   : > { %v8005_v9 = vadd.f32 %v14558_v55, %v7750_v29  ;;  %v7876_v52 = vpop.f32.mrb[28].mxu1  ;;  %8563 = vmatprep.mubr.f32.mxu1 %v8048_v57  ;;  %v7752_v26 = vpop.f32.mrb[29].mxu0 }
 0x4f9   : > { %v8007_v8 = vadd.f32 %v14561_v54, %v7876_v52  ;;  %v8006_v21 = vadd.f32 %v14564_v6, %v7752_v26  ;;  %v7878_v44 = vpop.f32.mrb[29].mxu1  ;;  %v7754_v47 = vpop.f32.mrb[30].mxu0 }
 0x4fa   : > { %v8008_v30 = vadd.f32 %v14567_v46, %v7878_v44  ;;  %v7880_v0 = vpop.f32.mrb[30].mxu1  ;;  %v7756_v32 = vpop.f32.mrb[31].mxu0  ;;  %8469 = vmatmul.mubr.f32.gmra.mrb[50].mxu0 %v8045_v36  ;;  %v8053_v49 = vmax.f32 %v8005_v9, 0.0  ;;  %v8013_v27 = vadd.f32 %v14558_v55, %v7754_v47 }
 0x4fb   : > { %v8054_v7 = vmax.f32 %v8006_v21, 0.0  ;;  %v8014_v14 = vadd.f32 %v14564_v6, %v7756_v32  ;;  %v7882_v17 = vpop.f32.mrb[31].mxu1  ;;  %8564 = vmatmul.mubr.f32.gmra.mrb[50].mxu1 %v8047_v53  ;;  %v8055_v56 = vmax.f32 %v8007_v8, 0.0  ;;  %v8015_v25 = vadd.f32 %v14561_v54, %v7880_v0 }
 0x4fc   : > { %v8056_v10 = vmax.f32 %v8008_v30, 0.0  ;;  %v8016_v23 = vadd.f32 %v14567_v46, %v7882_v17  ;;  %v8061_v58 = vmax.f32 %v8013_v27, 0.0 }
 0x4fd   : > { %v8062_v3 = vmax.f32 %v8014_v14, 0.0  ;;  %8473 = vmatprep.mubr.f32.mxu0 %v8054_v7  ;;  %v8063_v11 = vmax.f32 %v8015_v25, 0.0 }
 0x4fe   : > { %v8064_v63 = vmax.f32 %v8016_v23, 0.0  ;;  %8568 = vmatprep.mubr.f32.mxu1 %v8056_v10  ;;  %8474 = vmatmul.mubr.f32.gmra.mrb[52].mxu0 %v8053_v49 }
 0x4ff   : > { %8569 = vmatmul.mubr.f32.gmra.mrb[52].mxu1 %v8055_v56  ;;  %v7760_v28 = vpop.f32.mrb[32].mxu0  ;;  %8478 = vmatprep.mubr.f32.mxu0 %v8062_v3 }
 0x500   : > { %v8021_v16 = vadd.f32 %v14558_v55, %v7760_v28  ;;  %v7886_v61 = vpop.f32.mrb[32].mxu1  ;;  %8573 = vmatprep.mubr.f32.mxu1 %v8064_v63  ;;  %v7762_v15 = vpop.f32.mrb[33].mxu0 }
 0x501   : > { %v8023_v34 = vadd.f32 %v14561_v54, %v7886_v61  ;;  %v8022_v48 = vadd.f32 %v14564_v6, %v7762_v15  ;;  %v7888_v62 = vpop.f32.mrb[33].mxu1  ;;  %v7764_v2 = vpop.f32.mrb[34].mxu0 }
 0x502   : > { %v8024_v18 = vadd.f32 %v14567_v46, %v7888_v62  ;;  %v7890_v38 = vpop.f32.mrb[34].mxu1  ;;  %v7766_v45 = vpop.f32.mrb[35].mxu0  ;;  %8479 = vmatmul.mubr.f32.gmra.mrb[54].mxu0 %v8061_v58  ;;  %v8069_v13 = vmax.f32 %v8021_v16, 0.0  ;;  %v8029_v40 = vadd.f32 %v14558_v55, %v7764_v2 }
 0x503   : > { %v8070_v37 = vmax.f32 %v8022_v48, 0.0  ;;  %v8030_v22 = vadd.f32 %v14564_v6, %v7766_v45  ;;  %v7892_v20 = vpop.f32.mrb[35].mxu1  ;;  %8574 = vmatmul.mubr.f32.gmra.mrb[54].mxu1 %v8063_v11  ;;  %v8071_v35 = vmax.f32 %v8023_v34, 0.0  ;;  %v8031_v4 = vadd.f32 %v14561_v54, %v7890_v38 }
 0x504   : > { %v8072_v24 = vmax.f32 %v8024_v18, 0.0  ;;  %v8032_v5 = vadd.f32 %v14567_v46, %v7892_v20  ;;  %v8077_v41 = vmax.f32 %v8029_v40, 0.0 }
 0x505   : > { %v8078_v50 = vmax.f32 %v8030_v22, 0.0  ;;  %8483 = vmatprep.mubr.f32.mxu0 %v8070_v37  ;;  %v8079_v6 = vmax.f32 %v8031_v4, 0.0 }
 0x506   : > { %v8080_v12 = vmax.f32 %v8032_v5, 0.0  ;;  %8578 = vmatprep.mubr.f32.mxu1 %v8072_v24  ;;  %8484 = vmatmul.mubr.f32.gmra.mrb[56].mxu0 %v8069_v13 }
 0x507   : > { %8579 = vmatmul.mubr.f32.gmra.mrb[56].mxu1 %v8071_v35  ;;  %8488 = vmatprep.mubr.f32.mxu0 %v8078_v50 }
 0x508   : > { %8583 = vmatprep.mubr.f32.mxu1 %v8080_v12 }
 0x50a   : > { %8489 = vmatmul.mubr.f32.gmra.mrb[58].mxu0 %v8077_v41 }
 0x50b   : > { %8584 = vmatmul.mubr.f32.gmra.mrb[58].mxu1 %v8079_v6 }
 0x547   : > { %v10157_v33 = vpop.f32.mrb[36].mxu0 }
 0x548   : > { %v10207_v59 = vpop.f32.mrb[36].mxu1  ;;  %v10158_v55 = vpop.f32.mrb[37].mxu0 }
 0x549   : > { %v10159_v19 = vadd.f32 %v10158_v55, %v10157_v33  ;;  %v10208_v46 = vpop.f32.mrb[37].mxu1 }
 0x54a   : > { %v10209_v1 = vadd.f32 %v10208_v46, %v10207_v59 }
 0x54b   : > { %v10160_v60 = vpop.f32.mrb[38].mxu0 }
 0x54c   : > { %v8371_v54 = vadd.f32 %v10209_v1, %v10159_v19  ;;  %v10210_v43 = vpop.f32.mrb[38].mxu1  ;;  %v10161_v42 = vpop.f32.mrb[39].mxu0 }
 0x54d   : > { %v10162_v51 = vadd.f32 %v10161_v42, %v10160_v60  ;;  %v10211_v39 = vpop.f32.mrb[39].mxu1 }
 0x54e   : > { %v10212_v31 = vadd.f32 %v10211_v39, %v10210_v43 }
 0x54f   : > { %v10163_v57 = vpop.f32.mrb[40].mxu0 }
 0x550   : > { %v8376_v29 = vadd.f32 %v10212_v31, %v10162_v51  ;;  %v10213_v36 = vpop.f32.mrb[40].mxu1  ;;  %v10164_v9 = vpop.f32.mrb[41].mxu0 }
 0x551   : > { %v10165_v52 = vadd.f32 %v10164_v9, %v10163_v57  ;;  %v10214_v26 = vpop.f32.mrb[41].mxu1 }
 0x552   : > { %v10215_v53 = vadd.f32 %v10214_v26, %v10213_v36 }
 0x553   : > { %v10166_v8 = vpop.f32.mrb[42].mxu0 }
 0x554   : > { %v8381_v21 = vadd.f32 %v10215_v53, %v10165_v52  ;;  %v10216_v44 = vpop.f32.mrb[42].mxu1  ;;  %v10167_v47 = vpop.f32.mrb[43].mxu0 }
 0x555   : > { %v10168_v30 = vadd.f32 %v10167_v47, %v10166_v8  ;;  %v10217_v0 = vpop.f32.mrb[43].mxu1 }
 0x556   : > { %v10218_v32 = vadd.f32 %v10217_v0, %v10216_v44 }
 0x557   : > { %v10169_v7 = vpop.f32.mrb[44].mxu0 }
 0x558   : > { %v8386_v14 = vadd.f32 %v10218_v32, %v10168_v30  ;;  %v10219_v17 = vpop.f32.mrb[44].mxu1  ;;  %v10170_v49 = vpop.f32.mrb[45].mxu0 }
 0x559   : > { %v10171_v10 = vadd.f32 %v10170_v49, %v10169_v7  ;;  %v10220_v27 = vpop.f32.mrb[45].mxu1 }
 0x55a   : > { %v10221_v23 = vadd.f32 %v10220_v27, %v10219_v17 }
 0x55b   : > { %v10172_v56 = vpop.f32.mrb[46].mxu0 }
 0x55c   : > { %v8391_v25 = vadd.f32 %v10221_v23, %v10171_v10  ;;  %v10222_v3 = vpop.f32.mrb[46].mxu1  ;;  %v10173_v63 = vpop.f32.mrb[47].mxu0 }
 0x55d   : > { %v10174_v28 = vadd.f32 %v10173_v63, %v10172_v56  ;;  %v10223_v58 = vpop.f32.mrb[47].mxu1 }
 0x55e   : > { %v10224_v16 = vadd.f32 %v10223_v58, %v10222_v3 }
 0x560   : > { %v8396_v61 = vadd.f32 %v10224_v16, %v10174_v28 }
 0x5c9   : > { %v10257_v15 = vpop.f32.mrb[48].mxu0 }
 0x5ca   : > { %v10307_v11 = vpop.f32.mrb[48].mxu1  ;;  %v10258_v34 = vpop.f32.mrb[49].mxu0 }
 0x5cb   : > { %v10259_v48 = vadd.f32 %v10258_v34, %v10257_v15  ;;  %v10308_v62 = vpop.f32.mrb[49].mxu1 }
 0x5cc   : > { %v10309_v2 = vadd.f32 %v10308_v62, %v10307_v11 }
 0x5cd   : > { %v8466_v18 = vadd.f32 %v10259_v48, %v8371_v54  ;;  %v10260_v38 = vpop.f32.mrb[50].mxu0 }
 0x5ce   : > { %v10310_v45 = vpop.f32.mrb[50].mxu1  ;;  %v10261_v37 = vpop.f32.mrb[51].mxu0 }
 0x5cf   : > { %v8561_v22 = vadd.f32 %v10309_v2, %v8466_v18  ;;  %v10262_v20 = vadd.f32 %v10261_v37, %v10260_v38  ;;  %v10311_v13 = vpop.f32.mrb[51].mxu1 }
 0x5d0   : > { %v10312_v24 = vadd.f32 %v10311_v13, %v10310_v45 }
 0x5d1   : > { %v8471_v40 = vadd.f32 %v10262_v20, %v8376_v29  ;;  %v10263_v5 = vpop.f32.mrb[52].mxu0  ;;  %v8589_v33 = vsel %vm422_vm1, %v8561_v22, 0.0 }
 0x5d2   : > { %v10313_v35 = vpop.f32.mrb[52].mxu1  ;;  %v10264_v4 = vpop.f32.mrb[53].mxu0 }
 0x5d3   : > { %v8566_v50 = vadd.f32 %v10312_v24, %v8471_v40  ;;  %v10265_v12 = vadd.f32 %v10264_v4, %v10263_v5  ;;  %v10314_v41 = vpop.f32.mrb[53].mxu1 }
 0x5d4   : > { %v10315_v6 = vadd.f32 %v10314_v41, %v10313_v35 }
 0x5d5   : > { %v8590_v59 = vsel %vm422_vm1, %v8566_v50, 0.0  ;;  %v8476_v55 = vadd.f32 %v10265_v12, %v8381_v21  ;;  %v10266_v19 = vpop.f32.mrb[54].mxu0 }
 0x5d6   : > { %v8591_v46 = vadd.f32 %v8590_v59, %v8589_v33  ;;  %v10316_v1 = vpop.f32.mrb[54].mxu1  ;;  %v10267_v60 = vpop.f32.mrb[55].mxu0 }
 0x5d7   : > { %v8571_v54 = vadd.f32 %v10315_v6, %v8476_v55  ;;  %v10268_v43 = vadd.f32 %v10267_v60, %v10266_v19  ;;  %v10317_v42 = vpop.f32.mrb[55].mxu1 }
 0x5d8   : > { %v8592_v51 = vrot.slane %v8591_v46, 4  ;;  %v10318_v39 = vadd.f32 %v10317_v42, %v10316_v1 }
 0x5d9   : > { %v8481_v31 = vadd.f32 %v10268_v43, %v8386_v14  ;;  %v10269_v57 = vpop.f32.mrb[56].mxu0  ;;  %v8598_v21 = vsel %vm422_vm1, %v8571_v54, 0.0 }
 0x5da   : > { %v8593_v29 = vadd.f32 %v8592_v51, %v8591_v46  ;;  %v10319_v36 = vpop.f32.mrb[56].mxu1  ;;  %v10270_v9 = vpop.f32.mrb[57].mxu0 }
 0x5db   : > { %v8576_v52 = vadd.f32 %v10318_v39, %v8481_v31  ;;  %v10271_v26 = vadd.f32 %v10270_v9, %v10269_v57  ;;  %v10320_v53 = vpop.f32.mrb[57].mxu1 }
 0x5dc   : > { %v8594_v8 = vrot.slane %v8593_v29, 2  ;;  %v10321_v44 = vadd.f32 %v10320_v53, %v10319_v36 }
 0x5dd   : > { %v8599_v47 = vsel %vm422_vm1, %v8576_v52, 0.0  ;;  %v8486_v30 = vadd.f32 %v10271_v26, %v8391_v25  ;;  %v10272_v0 = vpop.f32.mrb[58].mxu0 }
 0x5de   : > { %v8595_v32 = vadd.f32 %v8594_v8, %v8593_v29  ;;  %v8600_v7 = vadd.f32 %v8599_v47, %v8598_v21  ;;  %v10322_v17 = vpop.f32.mrb[58].mxu1  ;;  %v10273_v14 = vpop.f32.mrb[59].mxu0 }
 0x5df   : > { %v8581_v49 = vadd.f32 %v10321_v44, %v8486_v30  ;;  %v10274_v10 = vadd.f32 %v10273_v14, %v10272_v0  ;;  %v10323_v27 = vpop.f32.mrb[59].mxu1 }
 0x5e0   : > { %v8596_v23 = vrot.slane %v8595_v32, 1  ;;  %v8601_v56 = vrot.slane %v8600_v7, 4  ;;  %v10324_v3 = vadd.f32 %v10323_v27, %v10322_v17 }
 0x5e1   : > { %v8491_v63 = vadd.f32 %v10274_v10, %v8396_v61  ;;  %v8607_v11 = vsel %vm422_vm1, %v8581_v49, 0.0 }
 0x5e2   : > { %v8597_v28 = vadd.f32 %v8596_v23, %v8595_v32  ;;  %v8602_v58 = vadd.f32 %v8601_v56, %v8600_v7 }
 0x5e3   : > { %v8586_v25 = vadd.f32 %v10324_v3, %v8491_v63 }
 0x5e4   : > { %v8616_v16 = vmul.f32 0.00390625, %v8597_v28  ;;  %v8603_v15 = vrot.slane %v8602_v58, 2 }
 0x5e5   : > { %v8608_v34 = vsel %vm422_vm1, %v8586_v25, 0.0 }
 0x5e6   : > { %8620 = vst.msk [vmem:[%s254_s30] sm:$0x1] %vm8619_vm13, %v8616_v16  ;;  %v8604_v48 = vadd.f32 %v8603_v15, %v8602_v58  ;;  %v8609_v62 = vadd.f32 %v8608_v34, %v8607_v11 }
 0x5e8   : > { %v8605_v2 = vrot.slane %v8604_v48, 1  ;;  %v8610_v61 = vrot.slane %v8609_v62, 4 }
 0x5ea   : > { %v8606_v18 = vadd.f32 %v8605_v2, %v8604_v48  ;;  %v8611_v38 = vadd.f32 %v8610_v61, %v8609_v62 }
 0x5ec   : > { %v8617_v45 = vmul.f32 0.00390625, %v8606_v18  ;;  %v8612_v37 = vrot.slane %v8611_v38, 2 }
 0x5ee   : > { %8621 = vst.msk [vmem:[%s254_s30 + $0x1] sm:$0x1] %vm8619_vm13, %v8617_v45  ;;  %v8613_v22 = vadd.f32 %v8612_v37, %v8611_v38 }
 0x5f0   : > { %v8614_v20 = vrot.slane %v8613_v22, 1 }
 0x5f2   : > { %v8615_v13 = vadd.f32 %v8614_v20, %v8613_v22 }
 0x5f4   : > { %v8618_v24 = vmul.f32 0.00390625, %v8615_v13 }
 0x5f6   : > { %8622 = vst.msk [vmem:[%s254_s30 + $0x2] sm:$0x1] %vm8619_vm13, %v8618_v24 }
 0x5f7 PF: > { %s16_s21 = sadd.s32 1, %s10837_s21  }
 0x5f8   : > { %p13_p4 = scmp.ge.s32.totalorder %s16_s21, 4  }
 0x5fa   :  { %15 = sbr.rel (!%p13_p4) target bundleno = 1 (0x1), region = 78 }

</bundles_post_ra>
